<compile_context>
chip_gen: v6e
topology: v6e:2x2x1
jax: 0.10.0
libtpu: 0.0.40
codegen_flags: <defaults>
</compile_context>

<pallas_src>
import math

import numpy as np
import jax
import jax.numpy as jnp
from jax import lax
from jax.experimental import pallas as pl
from jax.experimental.pallas import tpu as pltpu


# ----------------------------------------------------------------------------
# Module-parameter resolution (mirrors the PyTorch __init__).
# ----------------------------------------------------------------------------

def _nyquist_num_frequencies(samples):
    nyquist_rate = 1 / (2 * (2 * 1 / samples))
    return int(math.floor(math.log(nyquist_rate, 2)))


def _resolve_num_frequencies(in_features, sidelength, fn_samples, use_nyquist,
                             num_frequencies):
    if num_frequencies is not None:
        return num_frequencies
    if in_features == 3:
        return 10
    if in_features == 2:
        assert sidelength is not None
        if isinstance(sidelength, int):
            sidelength = (sidelength, sidelength)
        nf = 4
        if use_nyquist:
            nf = _nyquist_num_frequencies(min(sidelength[0], sidelength[1]))
        return nf
    if in_features == 1:
        assert fn_samples is not None
        nf = 4
        if use_nyquist:
            nf = _nyquist_num_frequencies(fn_samples)
        return nf
    raise ValueError("unsupported in_features without explicit num_frequencies")


def _build_tables(in_features, num_frequencies, scale):
    """G (F, out_dim): one nonzero (scale^i * pi) per encoded column, identity on
    pass-through columns.  bias (1, out_dim): +pi/2 on cos columns so a single
    sin evaluates both sin and cos columns."""
    out_dim = in_features + in_features * 2 * num_frequencies
    g = np.zeros((in_features, out_dim), dtype=np.float32)
    bias = np.zeros((1, out_dim), dtype=np.float32)
    for j in range(in_features):
        g[j, j] = 1.0
    for i in range(num_frequencies):
        w = float(scale) ** i * math.pi
        for j in range(in_features):
            col = in_features + (i * in_features + j) * 2
            g[j, col] = w                      # sin column
            g[j, col + 1] = w                  # cos column
            bias[0, col + 1] = math.pi / 2.0   # cos(x) = sin(x + pi/2)
    return g, bias, out_dim


# ----------------------------------------------------------------------------
# Kernels
# ----------------------------------------------------------------------------

def _posenc_rows_kernel(x_ref, c_ref, out_ref):
    """Channels-last block: x (tile, F), c (F+1, out_dim) = [G; bias],
    out (tile, out_dim)."""
    f = x_ref.shape[1]
    x = x_ref[...]
    # Pinned precision: high-frequency phases (~2^9*pi) need full f32 accuracy.
    z = jnp.dot(x, c_ref[0:f, :],
                preferred_element_type=jnp.float32,
                precision=lax.Precision.HIGHEST)
    # Single EUP/VALU transcendental pass for both sin and cos columns.
    out_ref[...] = jnp.sin(z + c_ref[f:f + 1, :])
    # Pass-through columns: overwrite first F columns (tiny masked store)
    # instead of a full-width mask blend.
    out_ref[:, 0:f] = x


def _posenc_cols_kernel(xt_ref, c_ref, out_ref):
    """Channels-first block (lane-dense): xt (F, tile), c (out_dim, F+1) =
    [G^T | bias], out (out_dim, tile).  tile is a multiple of 128 lanes, so
    every vreg is full and every store is an unmasked vst."""
    f = xt_ref.shape[0]
    xt = xt_ref[...]
    z = jnp.dot(c_ref[:, 0:f], xt,
                preferred_element_type=jnp.float32,
                precision=lax.Precision.HIGHEST)
    out_ref[...] = jnp.sin(z + c_ref[:, f:f + 1])
    out_ref[0:f, :] = xt


# ----------------------------------------------------------------------------
# Tiling helpers
# ----------------------------------------------------------------------------

# Honest per-step VMEM (channels-last path, f32, lane-padded to 128):
#   coords block  ~ tile*512 B  x2 (double buffer)
#   output block  ~ tile*512 B  x2
#   z / sin intermediates ~ 2 * tile*512 B
#   => ~3 KiB per row  =>  ~24 MiB at tile=8192.
# 40 MiB gives headroom and stays well under v7x's 64 MiB physical VMEM.
_VMEM_LIMIT_BYTES = 40 * 1024 * 1024


def _round_up(x, m):
    return ((x + m - 1) // m) * m


def _choose_tile(n, max_tile, granule):
    """Largest tile <= max_tile (multiple of `granule`), biased toward an EVEN
    grid-step count so the single 'parallel' axis balances across v7x's two
    TensorCores (v5e/v6e have 1 TC and are unaffected)."""
    padded = _round_up(max(n, granule), granule)
    if padded <= max_tile:
        if padded < 2048:          # too small to be worth splitting across TCs
            return padded
        return _round_up(pl.cdiv(padded, 2), granule)
    steps = pl.cdiv(n, max_tile)
    if steps % 2:
        steps += 1
    return _round_up(pl.cdiv(n, steps), granule)


# ----------------------------------------------------------------------------
# pallas_call wrappers
# ----------------------------------------------------------------------------

def _encode_rows(flat, consts, out_dim, row_tile):
    n, f = flat.shape
    tile = _choose_tile(n, row_tile, 8)
    grid = pl.cdiv(n, tile)          # ragged last block masked by Pallas
    cost = pl.CostEstimate(
        flops=2 * n * f * out_dim + 2 * n * out_dim,
        transcendentals=n * out_dim,
        bytes_accessed=4 * (n * f + n * out_dim + consts.size),
    )
    return pl.pallas_call(
        _posenc_rows_kernel,
        out_shape=jax.ShapeDtypeStruct((n, out_dim), jnp.float32),
        grid=(grid,),
        in_specs=[
            pl.BlockSpec((tile, f), lambda i: (i, 0)),
            pl.BlockSpec(consts.shape, lambda i: (0, 0)),
        ],
        out_specs=pl.BlockSpec((tile, out_dim), lambda i: (i, 0)),
        compiler_params=pltpu.CompilerParams(
            dimension_semantics=("parallel",),
            vmem_limit_bytes=_VMEM_LIMIT_BYTES),
        cost_estimate=cost,
    )(flat, consts)


def _encode_cols(flat_t, consts_t, out_dim, col_tile):
    f, n = flat_t.shape
    tile = _choose_tile(n, col_tile, 128)   # lane dim: multiple of 128 -> dense vst
    grid = pl.cdiv(n, tile)
    cost = pl.CostEstimate(
        flops=2 * n * f * out_dim + 2 * n * out_dim,
        transcendentals=n * out_dim,
        bytes_accessed=4 * (n * f + n * out_dim + consts_t.size),
    )
    return pl.pallas_call(
        _posenc_cols_kernel,
        out_shape=jax.ShapeDtypeStruct((out_dim, n), jnp.float32),
        grid=(grid,),
        in_specs=[
            pl.BlockSpec((f, tile), lambda i: (0, i)),
            pl.BlockSpec(consts_t.shape, lambda i: (0, 0)),
        ],
        out_specs=pl.BlockSpec((out_dim, tile), lambda i: (0, i)),
        compiler_params=pltpu.CompilerParams(
            dimension_semantics=("parallel",),
            vmem_limit_bytes=_VMEM_LIMIT_BYTES),
        cost_estimate=cost,
    )(flat_t, consts_t)


def pos_encoding_nerf(coords, *, in_features, sidelength=None, fn_samples=None,
                      use_nyquist=True, num_frequencies=None, scale=2,
                      row_tile=8192, col_tile=16384, channels_first=False):
    """NeRF positional encoding.

    Default (channels_first=False): returns [..., out_dim] exactly like the
    PyTorch module.  channels_first=True returns the lane-dense (out_dim, N)
    slab (N = prod of leading dims) intended for consumers that contract over
    out_dim (first MLP matmul) without materializing a channels-last copy.
    """
    num_frequencies = _resolve_num_frequencies(
        in_features, sidelength, fn_samples, use_nyquist, num_frequencies)
    g_np, b_np, out_dim = _build_tables(in_features, num_frequencies, scale)

    orig_shape = coords.shape
    assert orig_shape[-1] == in_features
    flat = coords.reshape(-1, in_features).astype(jnp.float32)

    if channels_first:
        consts_t = jnp.asarray(np.concatenate([g_np.T, b_np.T], axis=1))
        return _encode_cols(flat.T, consts_t, out_dim, col_tile)

    consts = jnp.asarray(np.concatenate([g_np, b_np], axis=0))
    out = _encode_rows(flat, consts, out_dim, row_tile)
    return out.reshape(*orig_shape[:-1], out_dim)


# ----------------------------------------------------------------------------
# Pure-JAX reference (replica of the PyTorch forward loop)
# ----------------------------------------------------------------------------

def pos_encoding_nerf_ref(coords, *, in_features, num_frequencies, scale=2):
    out = coords
    for i in range(num_frequencies):
        for j in range(in_features):
            c = coords[..., j]
            s = jnp.sin((float(scale) ** i) * math.pi * c)[..., None]
            cc = jnp.cos((float(scale) ** i) * math.pi * c)[..., None]
            out = jnp.concatenate([out, s, cc], axis=-1)
    return out


if __name__ == "__main__":
    key = jax.random.PRNGKey(0)

    # --- 1) NeRF default: in_features=3 -> 10 freqs, out_dim = 3 + 3*2*10 = 63.
    coords = jax.random.uniform(key, (2, 128, 3), dtype=jnp.float32,
                                minval=-1.0, maxval=1.0)
    out = jax.block_until_ready(pos_encoding_nerf(coords, in_features=3))
    ref = pos_encoding_nerf_ref(coords, in_features=3, num_frequencies=10)
    assert out.shape == (2, 128, 63), out.shape
    # Low-frequency columns (args <= 32*pi): tight agreement.
    n_low = 3 + 3 * 2 * 6
    err_low = float(jnp.max(jnp.abs(out[..., :n_low] - ref[..., :n_low])))
    assert err_low < 5e-4, err_low
    # Full output (args up to ~512*pi): cos(x)=sin(x+pi/2) deviates by ~ulp(arg)/2.
    err_full = float(jnp.max(jnp.abs(out - ref)))
    assert err_full < 2e-3, err_full

    # --- 2) Ragged, multi-step grid: N=250 rows, row_tile=128 -> 2 blocks,
    #        last block partially masked (exercises the ragged-edge path).
    coords2 = jax.random.uniform(jax.random.PRNGKey(1), (250, 3),
                                 dtype=jnp.float32, minval=-1.0, maxval=1.0)
    out2 = jax.block_until_ready(
        pos_encoding_nerf(coords2, in_features=3, row_tile=128))
    ref2 = pos_encoding_nerf_ref(coords2, in_features=3, num_frequencies=10)
    assert out2.shape == (250, 63), out2.shape
    assert float(jnp.max(jnp.abs(out2 - ref2))) < 2e-3

    # --- 3) Lane-dense channels-first slab (review item 1) -----------------
    out_t = jax.block_until_ready(
        pos_encoding_nerf(coords, in_features=3, channels_first=True))
    assert out_t.shape == (63, 256), out_t.shape
    ref_t = ref.reshape(-1, 63).T
    assert float(jnp.max(jnp.abs(out_t - ref_t))) < 2e-3

    # --- 4) in_features=2 Nyquist path: sidelength=16 -> 2 freqs, out_dim=10.
    coords3 = jax.random.uniform(jax.random.PRNGKey(2), (10, 2),
                                 dtype=jnp.float32, minval=-1.0, maxval=1.0)
    out3 = jax.block_until_ready(
        pos_encoding_nerf(coords3, in_features=2, sidelength=16))
    ref3 = pos_encoding_nerf_ref(coords3, in_features=2, num_frequencies=2)
    assert out3.shape == (10, 10), out3.shape
    assert float(jnp.max(jnp.abs(out3 - ref3))) < 1e-4

    print("KERNEL_OK")
</pallas_src>

<mosaic_0001>
module attributes {stable_mosaic.version = 11 : i64} {
  func.func @_posenc_rows_kernel(%arg0: i32, %arg1: memref<256x3xf32, #tpu.memory_space<vmem>>, %arg2: memref<4x63xf32, #tpu.memory_space<vmem>>, %arg3: memref<256x63xf32, #tpu.memory_space<vmem>>) attributes {dimension_semantics = [#tpu.dimension_semantics<parallel>], iteration_bounds = array<i64: 1>, scalar_prefetch = 0 : i64, scratch_operands = 0 : i64, tpu.core_type = #tpu.core_type<tc>, window_params = [{transform_indices = @transform_0, window_bounds = array<i64: 256, 3>}, {pipeline_mode = #tpu.pipeline_mode<synchronous>, transform_indices = @transform_1, window_bounds = array<i64: 4, 63>}, {transform_indices = @transform_2, window_bounds = array<i64: 256, 63>}]} {
    %c0 = arith.constant 0 : index
    %c0_0 = arith.constant 0 : index
    %0 = vector.load %arg1[%c0, %c0_0] : memref<256x3xf32, #tpu.memory_space<vmem>>, vector<256x3xf32>
    %c0_1 = arith.constant 0 : index
    %c0_2 = arith.constant 0 : index
    %1 = vector.load %arg2[%c0_1, %c0_2] : memref<4x63xf32, #tpu.memory_space<vmem>>, vector<3x63xf32>
    %cst = arith.constant dense<0.000000e+00> : vector<256x63xf32>
    %2 = tpu.matmul %0, %1, %cst {dimension_numbers = #tpu.dot_dimension_numbers<[1], [0], [0], [1], [0, 0, 1, 1], [], []>, precision = #tpu.contract_precision<fp32>} : vector<256x3xf32>, vector<3x63xf32>, vector<256x63xf32> -> vector<256x63xf32>
    %c3 = arith.constant 3 : index
    %c0_3 = arith.constant 0 : index
    %3 = vector.load %arg2[%c3, %c0_3] : memref<4x63xf32, #tpu.memory_space<vmem>>, vector<1x63xf32>
    %4 = vector.broadcast %3 : vector<1x63xf32> to vector<256x63xf32>
    %5 = arith.addf %2, %4 : vector<256x63xf32>
    %6 = math.sin %5 : vector<256x63xf32>
    %c0_4 = arith.constant 0 : index
    %c0_5 = arith.constant 0 : index
    %7 = vector.load %arg3[%c0_4, %c0_5] : memref<256x63xf32, #tpu.memory_space<vmem>>, vector<256x63xf32>
    tpu.vector_store %arg3[%c0_4, %c0_5], %6 {strides = array<i32>} : memref<256x63xf32, #tpu.memory_space<vmem>>, vector<256x63xf32>,
    %c0_6 = arith.constant 0 : index
    %c0_7 = arith.constant 0 : index
    %8 = vector.load %arg3[%c0_6, %c0_7] : memref<256x63xf32, #tpu.memory_space<vmem>>, vector<256x3xf32>
    tpu.vector_store %arg3[%c0_6, %c0_7], %0 {strides = array<i32>} : memref<256x63xf32, #tpu.memory_space<vmem>>, vector<256x3xf32>,
    return
  }
  func.func @transform_0(%arg0: i32) -> (i32, i32) {
    %c0_i32 = arith.constant 0 : i32
    %c0_i32_0 = arith.constant 0 : i32
    return %arg0, %c0_i32 : i32, i32
  }
  func.func @transform_1(%arg0: i32) -> (i32, i32) {
    %c0_i32 = arith.constant 0 : i32
    %c0_i32_0 = arith.constant 0 : i32
    %c0_i32_1 = arith.constant 0 : i32
    return %c0_i32, %c0_i32_0 : i32, i32
  }
  func.func @transform_2(%arg0: i32) -> (i32, i32) {
    %c0_i32 = arith.constant 0 : i32
    %c0_i32_0 = arith.constant 0 : i32
    return %arg0, %c0_i32 : i32, i32
  }
}

</mosaic_0001>

<bundles_post_ra>
// kernel: tpu_custom_call.1
= control target key start
LH: loop header
LB: loop body
LE: loop exit
PB: predicated region body
PF: predicated region fallthrough
CT: control target
= control target key end

     0   :  { %vm146_vm0 = vcmask 1042432   ;;  %vm49_vm1 = vcmask 23552   ;;  %s9907_s1 = inlined_call_operand.vmem [shape: f32[4,63], index: 1, kind: input, shape index: {}]   ;;  %s9908_s0 = inlined_call_operand.vmem [shape: f32[256,3], index: 0, kind: input, shape index: {}]   ;;  %s9909_s2 = inlined_call_operand.vmem [shape: f32[256,63], index: 2, kind: output, shape index: {}]  }
   0x1   :  { %v43_v0 = vld [vmem:[%s9907_s1] sm:$0x7]  ;;  %v6249_v4 = vld [vmem:[%s9908_s0 + $0x8] sm:$0xff]  ;;  %v6254_v5 = vld [vmem:[%s9908_s0 + $0x10] sm:$0xff] }
   0x2   :  { %v6242_v1 = vld [vmem:[%s9908_s0] sm:$0xff]  ;;  %v148_v2 = vsel %vm146_vm0, %v43_v0, 0  ;;  %10005 = vst [vmem:[#allocation3_spill] sm:$0xff] %v6249_v4  ;;  %10006 = vst [vmem:[#allocation4_spill] sm:$0xff] %v6254_v5  ;;  %v6259_v6 = vld [vmem:[%s9908_s0 + $0x18] sm:$0xff]  ;;  %v54_v9 = vsel %vm49_vm1, %v6249_v4, 0 }
   0x3   :  { %10004 = vst [vmem:[#allocation2_spill] sm:$0xff] %v6242_v1  ;;  %v51_v3 = vsel %vm49_vm1, %v6242_v1, 0  ;;  %10007 = vst [vmem:[#allocation5_spill] sm:$0xff] %v6259_v6  ;;  %v6261_v7 = vand.u32 4294901760, %v148_v2  ;;  %v57_v10 = vsel %vm49_vm1, %v6254_v5, 0  ;;  %v6272_v11 = vld [vmem:[%s9908_s0 + $0x20] sm:$0xff] }
   0x4   :  { %v6263_v8 = vand.u32 4294901760, %v51_v3  ;;  %10008 = vst [vmem:[#allocation6_spill] sm:$0xff] %v6272_v11  ;;  %v6277_v12 = vld [vmem:[%s9908_s0 + $0x28] sm:$0xff]  ;;  %v6279_v13 = vand.u32 4294901760, %v54_v9  ;;  %v6281_v14 = vand.u32 4294901760, %v57_v10  ;;  %v60_v15 = vsel %vm49_vm1, %v6259_v6, 0 }
   0x5   :  { %10009 = vst [vmem:[#allocation7_spill] sm:$0xff] %v6277_v12  ;;  %v63_v16 = vsel %vm49_vm1, %v6272_v11, 0  ;;  %v6290_v17 = vld [vmem:[%s9908_s0 + $0x30] sm:$0xff]  ;;  %5653 = vmatprep.subr.mxu0 %v6261_v7  ;;  %v568_v19 = vsub.f32 %v148_v2, %v6261_v7  ;;  %v6298_v20 = vand.u32 4294901760, %v60_v15  ;;  %v66_v24 = vsel %vm49_vm1, %v6277_v12, 0  ;;  %v6349_v42 = vld [vmem:[%s9908_s0 + $0x38] sm:$0xff] }
   0x6   :  { %10010 = vst [vmem:[#allocation8_spill] sm:$0xff] %v6290_v17  ;;  %v6294_v18 = vsub.f32 %v51_v3, %v6263_v8  ;;  %5705 = vmatprep.mubr.f32.mxu1 %v6263_v8  ;;  %v6300_v21 = vand.u32 4294901760, %v63_v16  ;;  %5654 = vmatpush3.msra.mxu0 %v6261_v7  ;;  %v6304_v22 = vsub.f32 %v54_v9, %v6279_v13  ;;  %v69_v25 = vsel %vm49_vm1, %v6290_v17, 0  ;;  %v6354_v43 = vld [vmem:[%s9908_s0 + $0x40] sm:$0xff]  ;;  %v6365_v48 = vld [vmem:[%s9908_s0 + $0x48] sm:$0xff]  ;;  %v6370_v49 = vld [vmem:[%s9908_s0 + $0x50] sm:$0xff] }
   0x7   :  { %v6307_v23 = vsub.f32 %v57_v10, %v6281_v14  ;;  %v6314_v27 = vand.u32 4294901760, %v568_v19  ;;  %5753 = vmatprep.subr.mxu0 %v568_v19  ;;  %v6317_v28 = vsub.f32 %v60_v15, %v6298_v20  ;;  %v6324_v32 = vand.u32 4294901760, %v66_v24  ;;  %10012 = vst [vmem:[#allocation10_spill] sm:$0xff] %v6349_v42  ;;  %10013 = vst [vmem:[#allocation11_spill] sm:$0xff] %v6354_v43  ;;  %v6377_v54 = vld [vmem:[%s9908_s0 + $0x58] sm:$0xff]  ;;  %v6382_v55 = vld [vmem:[%s9908_s0 + $0x60] sm:$0xff] }
   0x8   :  { %v9921_v26 = vand.u32 4294901760, %v6294_v18  ;;  %v6320_v29 = vsub.f32 %v63_v16, %v6300_v21  ;;  %v9920_v30 = vand.u32 4294901760, %v6304_v22  ;;  %v6326_v33 = vand.u32 4294901760, %v69_v25  ;;  %10014 = vst [vmem:[#allocation12_spill] sm:$0xff] %v6365_v48  ;;  %10015 = vst [vmem:[#allocation13_spill] sm:$0xff] %v6370_v49  ;;  %v6410_v10 = vld [vmem:[%s9908_s0 + $0x68] sm:$0xff] }
   0x9   :  { %v9916_v31 = vand.u32 4294901760, %v6307_v23  ;;  %v570_v35 = vsub.f32 %v568_v19, %v6314_v27  ;;  %v9915_v36 = vand.u32 4294901760, %v6317_v28  ;;  %v6341_v40 = vsub.f32 %v66_v24, %v6324_v32  ;;  %10016 = vst [vmem:[#allocation14_spill] sm:$0xff] %v6377_v54  ;;  %10017 = vst [vmem:[#allocation15_spill] sm:$0xff] %v6382_v55  ;;  %v6415_v15 = vld [vmem:[%s9908_s0 + $0x70] sm:$0xff] }
   0xa   :  { %10011 = vst [vmem:[#allocation9_spill] sm:$0xff] %v6326_v33  ;;  %v219_v34 = vsub.f32 %v6294_v18, %v9921_v26  ;;  %v9914_v37 = vand.u32 4294901760, %v6320_v29  ;;  %v229_v38 = vsub.f32 %v6304_v22, %v9920_v30  ;;  %v6344_v41 = vsub.f32 %v69_v25, %v6326_v33  ;;  %10020 = vst [vmem:[#allocation18_spill] sm:$0xff] %v6410_v10 }
   0xb   :  { %v239_v39 = vsub.f32 %v6307_v23, %v9916_v31  ;;  %v571_v45 = vand.u32 4294901760, %v570_v35  ;;  %v249_v46 = vsub.f32 %v6317_v28, %v9915_v36  ;;  %v9913_v52 = vand.u32 4294901760, %v6341_v40  ;;  %10021 = vst [vmem:[#allocation19_spill] sm:$0xff] %v6415_v15 }
   0xc   :  { %v220_v44 = vand.u32 4294901760, %v219_v34  ;;  %v259_v47 = vsub.f32 %v6320_v29, %v9914_v37  ;;  %v230_v50 = vand.u32 4294901760, %v229_v38  ;;  %v9910_v53 = vand.u32 4294901760, %v6344_v41 }
   0xd   :  { %v240_v51 = vand.u32 4294901760, %v239_v39  ;;  %5703 = vmatprep.subr.mxu1 %v571_v45  ;;  %v250_v56 = vand.u32 4294901760, %v249_v46  ;;  %v72_v58 = vsel %vm49_vm1, %v6349_v42, 0  ;;  %v75_v59 = vsel %vm49_vm1, %v6354_v43, 0 }
   0xe   :  { %5655 = vmatprep.mubr.f32.mxu0 %v220_v44  ;;  %v260_v57 = vand.u32 4294901760, %v259_v47  ;;  %5704 = vmatpush3.msra.mxu1 %v571_v45  ;;  %v269_v60 = vsub.f32 %v6341_v40, %v9913_v52  ;;  %v279_v61 = vsub.f32 %v6344_v41, %v9910_v53  ;;  %v6394_v62 = vand.u32 4294901760, %v72_v58 }
   0xf   :  { %5656 = vmatmul.mubr.f32.vlgmr.msra.gmra.mxu0 %v230_v50  ;;  %v6396_v63 = vand.u32 4294901760, %v75_v59  ;;  %5706 = vmatmul.mubr.f32.vlgmr.msra.gmra.mxu1 %v6279_v13  ;;  %v78_v0 = vsel %vm49_vm1, %v6365_v48, 0  ;;  %v81_v2 = vsel %vm49_vm1, %v6370_v49, 0  ;;  %v84_v3 = vsel %vm49_vm1, %v6377_v54, 0 }
  0x10   :  { %10018 = vst [vmem:[#allocation16_spill] sm:$0xff] %v6394_v62  ;;  %5754 = vmatpush3.msra.mxu0 %v568_v19  ;;  %v87_v9 = vsel %vm49_vm1, %v6382_v55, 0  ;;  %5803 = vmatprep.subr.mxu1 %v6261_v7  ;;  %v270_v16 = vand.u32 4294901760, %v269_v60  ;;  %v280_v19 = vand.u32 4294901760, %v279_v61  ;;  %v6419_v24 = vsub.f32 %v72_v58, %v6394_v62 }
  0x11   :  { %10019 = vst [vmem:[#allocation17_spill] sm:$0xff] %v6396_v63  ;;  %5658 = vmatprep.mubr.f32.mxu0 %v240_v51  ;;  %v6422_v25 = vsub.f32 %v75_v59, %v6396_v63  ;;  %5804 = vmatpush3.msra.mxu1 %v6261_v7  ;;  %v6426_v34 = vand.u32 4294901760, %v78_v0  ;;  %v6428_v35 = vand.u32 4294901760, %v81_v2  ;;  %v6430_v38 = vand.u32 4294901760, %v84_v3 }
  0x12   :  { %5708 = vmatprep.mubr.f32.mxu1 %v6281_v14  ;;  %v6432_v39 = vand.u32 4294901760, %v87_v9  ;;  %v9912_v44 = vand.u32 4294901760, %v6419_v24  ;;  %v90_v46 = vsel %vm49_vm1, %v6410_v10, 0  ;;  %v93_v47 = vsel %vm49_vm1, %v6415_v15, 0  ;;  %5853 = vmatprep.subr.mxu0 %v6314_v27 }
  0x13   :  { %10022 = vst [vmem:[#allocation20_spill] sm:$0xff] %v6426_v34  ;;  %10023 = vst [vmem:[#allocation21_spill] sm:$0xff] %v6428_v35  ;;  %5659 = vmatmul.mubr.f32.gmra.mxu0 %v250_v56  ;;  %v9911_v45 = vand.u32 4294901760, %v6422_v25  ;;  %5709 = vmatmul.mubr.f32.gmra.mxu1 %v6298_v20  ;;  %v6443_v50 = vsub.f32 %v78_v0, %v6426_v34  ;;  %v6446_v51 = vsub.f32 %v81_v2, %v6428_v35 }
  0x14   :  { %10024 = vst [vmem:[#allocation22_spill] sm:$0xff] %v6430_v38  ;;  %10025 = vst [vmem:[#allocation23_spill] sm:$0xff] %v6432_v39  ;;  %5661 = vmatprep.mubr.f32.mxu0 %v260_v57  ;;  %v6449_v56 = vsub.f32 %v84_v3, %v6430_v38  ;;  %v6451_v58 = vand.u32 4294901760, %v90_v46  ;;  %5711 = vmatprep.mubr.f32.mxu1 %v6300_v21  ;;  %v289_v59 = vsub.f32 %v6419_v24, %v9912_v44 }
  0x15   :  { %v299_v57 = vsub.f32 %v6422_v25, %v9911_v45  ;;  %v6461_v60 = vsub.f32 %v87_v9, %v6432_v39  ;;  %v6463_v61 = vand.u32 4294901760, %v93_v47  ;;  %5903 = vmatprep.subr.mxu1 %v6261_v7  ;;  %v9919_v0 = vand.u32 4294901760, %v6443_v50  ;;  %v6475_v45 = vld [vmem:[%s9908_s0 + $0x78] sm:$0xff]  ;;  %v6480_v9 = vld [vmem:[%s9908_s0 + $0x80] sm:$0xff] }
  0x16   :  { %10026 = vst [vmem:[#allocation24_spill] sm:$0xff] %v6451_v58  ;;  %v9917_v2 = vand.u32 4294901760, %v6446_v51  ;;  %v9918_v3 = vand.u32 4294901760, %v6449_v56  ;;  %v6470_v53 = vsub.f32 %v90_v46, %v6451_v58  ;;  %10028 = vst [vmem:[#allocation26_spill] sm:$0xff] %v6475_v45  ;;  %v290_v44 = vand.u32 4294901760, %v289_v59 }
  0x17   :  { %10027 = vst [vmem:[#allocation25_spill] sm:$0xff] %v6463_v61  ;;  %10029 = vst [vmem:[#allocation27_spill] sm:$0xff] %v6480_v9  ;;  %5662 = vmatmul.mubr.f32.gmra.mxu0 %v270_v16  ;;  %v9926_v52 = vand.u32 4294901760, %v6461_v60  ;;  %v6484_v37 = vsub.f32 %v93_v47, %v6463_v61  ;;  %5712 = vmatmul.mubr.f32.gmra.mxu1 %v6324_v32  ;;  %v300_v46 = vand.u32 4294901760, %v299_v57  ;;  %v99_v59 = vsel %vm49_vm1, %v6480_v9, 0  ;;  %v6505_v57 = vld [vmem:[%s9908_s0 + $0x88] sm:$0xff] }
  0x18   :  { %5664 = vmatprep.mubr.f32.mxu0 %v280_v19  ;;  %v309_v36 = vsub.f32 %v6443_v50, %v9919_v0  ;;  %v319_v31 = vsub.f32 %v6446_v51, %v9917_v2  ;;  %v329_v16 = vsub.f32 %v6449_v56, %v9918_v3  ;;  %5714 = vmatprep.mubr.f32.mxu1 %v6326_v33  ;;  %v96_v19 = vsel %vm49_vm1, %v6475_v45, 0  ;;  %v6510_v2 = vld [vmem:[%s9908_s0 + $0x90] sm:$0xff]  ;;  %v6515_v3 = vld [vmem:[%s9908_s0 + $0x98] sm:$0xff]  ;;  %v6528_v45 = vld [vmem:[%s9908_s0 + $0xa0] sm:$0xff] }
  0x19   :  { %10030 = vst [vmem:[#allocation28_spill] sm:$0xff] %v6505_v57  ;;  %10031 = vst [vmem:[#allocation29_spill] sm:$0xff] %v6510_v2  ;;  %v339_v0 = vsub.f32 %v6461_v60, %v9926_v52  ;;  %v6521_v9 = vand.u32 4294901760, %v96_v19  ;;  %v6523_v15 = vand.u32 4294901760, %v99_v59  ;;  %v102_v52 = vsel %vm49_vm1, %v6505_v57, 0 }
  0x1a   :  { %10032 = vst [vmem:[#allocation30_spill] sm:$0xff] %v6515_v3  ;;  %v310_v26 = vand.u32 4294901760, %v309_v36  ;;  %v320_v47 = vand.u32 4294901760, %v319_v31  ;;  %10035 = vst [vmem:[#allocation33_spill] sm:$0xff] %v6528_v45  ;;  %v330_v55 = vand.u32 4294901760, %v329_v16  ;;  %v105_v36 = vsel %vm49_vm1, %v6510_v2, 0 }
  0x1b   :  { %5665 = vmatmul.mubr.f32.gmra.mxu0 %v290_v44  ;;  %10033 = vst [vmem:[#allocation31_spill] sm:$0xff] %v6521_v9  ;;  %10034 = vst [vmem:[#allocation32_spill] sm:$0xff] %v6523_v15  ;;  %5715 = vmatmul.mubr.f32.gmra.mxu1 %v6394_v62  ;;  %v108_v31 = vsel %vm49_vm1, %v6515_v3, 0  ;;  %v6540_v44 = vld [vmem:[%s9908_s0 + $0xa8] sm:$0xff]  ;;  %v10037_v30 = vand.u32 4294901760, %v6470_v53  ;;  %v6547_v16 = vsub.f32 %v96_v19, %v6521_v9  ;;  %v6552_v2 = vand.u32 4294901760, %v102_v52 }
  0x1c   :  { %5667 = vmatprep.mubr.f32.mxu0 %v300_v46  ;;  %10036 = vst [vmem:[#allocation34_spill] sm:$0xff] %v6540_v44  ;;  %5717 = vmatprep.mubr.f32.mxu1 %v6396_v63  ;;  %v6550_v57 = vsub.f32 %v99_v59, %v6523_v15  ;;  %v6557_v3 = vld [vmem:[%s9908_s0 + $0xb0] sm:$0xff]  ;;  %v340_v10 = vand.u32 4294901760, %v339_v0  ;;  %v6559_v49 = vand.u32 4294901760, %v105_v36  ;;  %v6561_v54 = vand.u32 4294901760, %v108_v31 }
  0x1d   :  { %v349_v46 = vsub.f32 %v6470_v53, %v10037_v30  ;;  %10038 = vst [vmem:[#allocation35_spill] sm:$0xff] %v6552_v2  ;;  %10039 = vst [vmem:[#allocation36_spill] sm:$0xff] %v6557_v3  ;;  %v111_v30 = vsel %vm49_vm1, %v6528_v45, 0  ;;  %v10042_v19 = vand.u32 4294901760, %v6484_v37  ;;  %v9940_v43 = vand.u32 4294901760, %v6547_v16 }
  0x1e   :  { %10040 = vst [vmem:[#allocation37_spill] sm:$0xff] %v6559_v49  ;;  %10041 = vst [vmem:[#allocation38_spill] sm:$0xff] %v6561_v54  ;;  %v6570_v48 = vsub.f32 %v102_v52, %v6552_v2  ;;  %v114_v0 = vsel %vm49_vm1, %v6540_v44, 0  ;;  %v6577_v45 = vsub.f32 %v105_v36, %v6559_v49  ;;  %v6588_v44 = vsub.f32 %v108_v31, %v6561_v54  ;;  %v6597_v36 = vld [vmem:[%s9908_s0 + $0xb8] sm:$0xff] }
  0x1f   :  { %5668 = vmatmul.mubr.f32.gmra.mxu0 %v310_v26  ;;  %v359_v59 = vsub.f32 %v6484_v37, %v10042_v19  ;;  %5718 = vmatmul.mubr.f32.gmra.mxu1 %v6426_v34  ;;  %v6579_v26 = vand.u32 4294901760, %v111_v30  ;;  %v117_v19 = vsel %vm49_vm1, %v6557_v3, 0  ;;  %v369_v52 = vsub.f32 %v6547_v16, %v9940_v43  ;;  %10044 = vst [vmem:[#allocation40_spill] sm:$0xff] %v6597_v36  ;;  %v6602_v3 = vld [vmem:[%s9908_s0 + $0xc0] sm:$0xff]  ;;  %v6633_v43 = vld [vmem:[%s9908_s0 + $0xd0] sm:$0xff] }
  0x20   :  { %5670 = vmatprep.mubr.f32.mxu0 %v320_v47  ;;  %5720 = vmatprep.mubr.f32.mxu1 %v6428_v35  ;;  %v6590_v47 = vand.u32 4294901760, %v114_v0  ;;  %v6592_v17 = vand.u32 4294901760, %v117_v19  ;;  %10045 = vst [vmem:[#allocation41_spill] sm:$0xff] %v6602_v3  ;;  %v350_v42 = vand.u32 4294901760, %v349_v46  ;;  %v10046_v11 = vand.u32 4294901760, %v6550_v57  ;;  %10048 = vst [vmem:[#allocation43_spill] sm:$0xff] %v6633_v43 }
  0x21   :  { %10043 = vst [vmem:[#allocation39_spill] sm:$0xff] %v6579_v26  ;;  %v360_v31 = vand.u32 4294901760, %v359_v59  ;;  %v6611_v6 = vsub.f32 %v111_v30, %v6579_v26  ;;  %v123_v46 = vsel %vm49_vm1, %v6602_v3, 0  ;;  %v370_v59 = vand.u32 4294901760, %v369_v52 }
  0x22   :  { %v379_v12 = vsub.f32 %v6550_v57, %v10046_v11  ;;  %v6625_v5 = vsub.f32 %v114_v0, %v6590_v47  ;;  %v6628_v30 = vsub.f32 %v117_v19, %v6592_v17  ;;  %v6640_v52 = vand.u32 4294901760, %v123_v46 }
  0x23   :  { %5671 = vmatmul.mubr.f32.gmra.mxu0 %v330_v55  ;;  %5721 = vmatmul.mubr.f32.gmra.mxu1 %v6430_v38  ;;  %v6616_v55 = vld [vmem:[%s9908_s0 + $0xc8] sm:$0xff]  ;;  %v10050_v11 = vand.u32 4294901760, %v6577_v45  ;;  %v10054_v38 = vand.u32 4294901760, %v6611_v6 }
  0x24   :  { %5673 = vmatprep.mubr.f32.mxu0 %v340_v10  ;;  %10047 = vst [vmem:[#allocation42_spill] sm:$0xff] %v6616_v55  ;;  %5723 = vmatprep.mubr.f32.mxu1 %v6432_v39  ;;  %v120_v10 = vsel %vm49_vm1, %v6597_v36, 0  ;;  %v10049_v36 = vand.u32 4294901760, %v6570_v48  ;;  %v126_v0 = vsel %vm49_vm1, %v6616_v55, 0  ;;  %v380_v19 = vand.u32 4294901760, %v379_v12  ;;  %v6655_v39 = vld [vmem:[%s9908_s0 + $0xd8] sm:$0xff] }
  0x25   :  { %v6638_v3 = vand.u32 4294901760, %v120_v10  ;;  %v399_v4 = vsub.f32 %v6577_v45, %v10050_v11  ;;  %10051 = vst [vmem:[#allocation44_spill] sm:$0xff] %v6655_v39  ;;  %v6664_v11 = vld [vmem:[%s9908_s0 + $0xe0] sm:$0xff]  ;;  %v6673_v55 = vsub.f32 %v123_v46, %v6640_v52  ;;  %v419_v35 = vsub.f32 %v6611_v6, %v10054_v38 }
  0x26   :  { %v389_v1 = vsub.f32 %v6570_v48, %v10049_v36  ;;  %v129_v36 = vsel %vm49_vm1, %v6633_v43, 0  ;;  %10052 = vst [vmem:[#allocation45_spill] sm:$0xff] %v6664_v11  ;;  %v10053_v43 = vand.u32 4294901760, %v6588_v44  ;;  %v10057_v38 = vand.u32 4294901760, %v6628_v30 }
  0x27   :  { %5674 = vmatmul.mubr.f32.gmra.mxu0 %v350_v42  ;;  %5724 = vmatmul.mubr.f32.gmra.mxu1 %v6451_v58  ;;  %v6670_v58 = vsub.f32 %v120_v10, %v6638_v3  ;;  %v400_v12 = vand.u32 4294901760, %v399_v4  ;;  %v6689_v10 = vld [vmem:[%s9908_s0 + $0xe8] sm:$0xff]  ;;  %v10056_v4 = vand.u32 4294901760, %v6625_v5 }
  0x28   :  { %5676 = vmatprep.mubr.f32.mxu0 %v360_v31  ;;  %5726 = vmatprep.mubr.f32.mxu1 %v6463_v61  ;;  %v6659_v31 = vand.u32 4294901760, %v126_v0  ;;  %v390_v42 = vand.u32 4294901760, %v389_v1  ;;  %v409_v61 = vsub.f32 %v6588_v44, %v10053_v43  ;;  %v132_v1 = vsel %vm49_vm1, %v6655_v39, 0  ;;  %10055 = vst [vmem:[#allocation46_spill] sm:$0xff] %v6689_v10 }
  0x29   :  { %v135_v43 = vsel %vm49_vm1, %v6664_v11, 0  ;;  %v429_v46 = vsub.f32 %v6625_v5, %v10056_v4  ;;  %v6703_v11 = vld [vmem:[%s9908_s0 + $0xf0] sm:$0xff]  ;;  %v6707_v63 = vand.u32 4294901760, %v132_v1  ;;  %v420_v4 = vand.u32 4294901760, %v419_v35 }
  0x2a   :  { %v6698_v39 = vsub.f32 %v126_v0, %v6659_v31  ;;  %10058 = vst [vmem:[#allocation47_spill] sm:$0xff] %v6703_v11  ;;  %v138_v62 = vsel %vm49_vm1, %v6689_v10, 0  ;;  %v10060_v10 = vand.u32 4294901760, %v6673_v55 }
  0x2b   :  { %5677 = vmatmul.mubr.f32.gmra.mxu0 %v370_v59  ;;  %5727 = vmatmul.mubr.f32.gmra.mxu1 %v6521_v9  ;;  %v6679_v59 = vand.u32 4294901760, %v129_v36  ;;  %v9979_v9 = vand.u32 4294901760, %v6670_v58 }
  0x2c   :  { %5679 = vmatprep.mubr.f32.mxu0 %v380_v19  ;;  %5729 = vmatprep.mubr.f32.mxu1 %v6523_v15  ;;  %v439_v19 = vsub.f32 %v6628_v30, %v10057_v38  ;;  %v410_v15 = vand.u32 4294901760, %v409_v61  ;;  %v6713_v38 = vand.u32 4294901760, %v135_v43  ;;  %v141_v61 = vsel %vm49_vm1, %v6703_v11, 0 }
  0x2d   :  { %v6711_v0 = vsub.f32 %v129_v36, %v6679_v59  ;;  %v468_v36 = vand.u32 4294901760, %v6698_v39  ;;  %v449_v34 = vsub.f32 %v6670_v58, %v9979_v9  ;;  %v6733_v11 = vsub.f32 %v132_v1, %v6707_v63 }
  0x2e   :  { %v440_v35 = vand.u32 4294901760, %v439_v19  ;;  %v6742_v19 = vand.u32 4294901760, %v141_v61 }
  0x2f   :  { %5680 = vmatmul.mubr.f32.gmra.mxu0 %v390_v42  ;;  %5730 = vmatmul.mubr.f32.gmra.mxu1 %v6552_v2  ;;  %v6723_v42 = vld [vmem:[%s9908_s0 + $0xf8] sm:$0xff]  ;;  %v6735_v2 = vand.u32 4294901760, %v138_v62  ;;  %v469_v1 = vsub.f32 %v6698_v39, %v468_v36 }
  0x30   :  { %5682 = vmatprep.mubr.f32.mxu0 %v400_v12  ;;  %5732 = vmatprep.mubr.f32.mxu1 %v6559_v49  ;;  %10059 = vst [vmem:[#allocation48_spill] sm:$0xff] %v6723_v42  ;;  %v430_v12 = vand.u32 4294901760, %v429_v46  ;;  %v459_v49 = vsub.f32 %v6673_v55, %v10060_v10  ;;  %v144_v9 = vsel %vm49_vm1, %v6723_v42, 0  ;;  %v450_v10 = vand.u32 4294901760, %v449_v34 }
  0x31   :  { %v6752_v46 = vsub.f32 %v138_v62, %v6735_v2  ;;  %v10061_v42 = vand.u32 4294901760, %v6711_v0  ;;  %v470_v62 = vand.u32 4294901760, %v469_v1 }
  0x33   :  { %5683 = vmatmul.mubr.f32.gmra.mxu0 %v410_v15  ;;  %5733 = vmatmul.mubr.f32.gmra.mxu1 %v6561_v54  ;;  %v6740_v15 = vsub.f32 %v135_v43, %v6713_v38  ;;  %v6754_v43 = vand.u32 4294901760, %v144_v9  ;;  %v460_v54 = vand.u32 4294901760, %v459_v49 }
  0x34   :  { %5685 = vmatprep.mubr.f32.mxu0 %v420_v4  ;;  %5735 = vmatprep.mubr.f32.mxu1 %v6579_v26  ;;  %v9987_v4 = vand.u32 4294901760, %v6733_v11  ;;  %v479_v26 = vsub.f32 %v6711_v0, %v10061_v42 }
  0x35   :  { %v9988_v33 = vand.u32 4294901760, %v6740_v15  ;;  %v6770_v49 = vsub.f32 %v144_v9, %v6754_v43 }
  0x36   :  { %v489_v34 = vsub.f32 %v6733_v11, %v9987_v4  ;;  %v480_v42 = vand.u32 4294901760, %v479_v26 }
  0x37   :  { %5686 = vmatmul.mubr.f32.gmra.mxu0 %v430_v12  ;;  %5736 = vmatmul.mubr.f32.gmra.mxu1 %v6590_v47  ;;  %v6762_v12 = vsub.f32 %v141_v61, %v6742_v19  ;;  %v499_v61 = vsub.f32 %v6740_v15, %v9988_v33  ;;  %v528_v9 = vand.u32 4294901760, %v6770_v49 }
  0x38   :  { %5688 = vmatprep.mubr.f32.mxu0 %v440_v35  ;;  %5738 = vmatprep.mubr.f32.mxu1 %v6592_v17  ;;  %v508_v35 = vand.u32 4294901760, %v6752_v46  ;;  %v490_v1 = vand.u32 4294901760, %v489_v34 }
  0x3a   :  { %v509_v4 = vsub.f32 %v6752_v46, %v508_v35 }
  0x3b   :  { %5689 = vmatmul.mubr.f32.gmra.mxu0 %v450_v10  ;;  %5739 = vmatmul.mubr.f32.gmra.mxu1 %v6638_v3  ;;  %v518_v10 = vand.u32 4294901760, %v6762_v12 }
  0x3c   :  { %5691 = vmatprep.mubr.f32.mxu0 %v460_v54  ;;  %5741 = vmatprep.mubr.f32.mxu1 %v6640_v52  ;;  %v500_v54 = vand.u32 4294901760, %v499_v61  ;;  %v510_v33 = vand.u32 4294901760, %v509_v4  ;;  %v10062_v4 = vand.u32 4294901760, %v6294_v18  ;;  %v10064_v61 = vand.u32 4294901760, %v6307_v23 }
  0x3d   :  { %v519_v26 = vsub.f32 %v6762_v12, %v518_v10 }
  0x3f   :  { %5692 = vmatmul.mubr.f32.gmra.mxu0 %v470_v62  ;;  %5742 = vmatmul.mubr.f32.gmra.mxu1 %v6659_v31  ;;  %v529_v62 = vsub.f32 %v6770_v49, %v528_v9  ;;  %v520_v34 = vand.u32 4294901760, %v519_v26 }
  0x40   :  { %5694 = vmatprep.mubr.f32.mxu0 %v480_v42  ;;  %5744 = vmatprep.mubr.f32.mxu1 %v6679_v59 }
  0x41   :  { %v530_v42 = vand.u32 4294901760, %v529_v62 }
  0x43   :  { %5695 = vmatmul.mubr.f32.gmra.mxu0 %v490_v1  ;;  %5745 = vmatmul.mubr.f32.gmra.mxu1 %v6707_v63  ;;  %v10065_v1 = vand.u32 4294901760, %v6317_v28 }
  0x44   :  { %5697 = vmatprep.mubr.f32.mxu0 %v500_v54  ;;  %5747 = vmatprep.mubr.f32.mxu1 %v6713_v38 }
  0x47   :  { %5698 = vmatmul.mubr.f32.gmra.mxu0 %v510_v33  ;;  %5748 = vmatmul.mubr.f32.gmra.mxu1 %v6735_v2  ;;  %v10063_v33 = vand.u32 4294901760, %v6304_v22 }
  0x48   :  { %5700 = vmatprep.mubr.f32.mxu0 %v520_v34  ;;  %5750 = vmatprep.mubr.f32.mxu1 %v6742_v19 }
  0x4b   :  { %5701 = vmatmul.mubr.f32.gmra.mxu0 %v530_v42  ;;  %5751 = vmatmul.mubr.f32.gmra.mxu1 %v6754_v43 }
  0x4c   :  { %5755 = vmatprep.mubr.f32.mxu0 %v6294_v18  ;;  %5805 = vmatprep.mubr.f32.mxu1 %v10062_v4  ;;  %v10066_v18 = vand.u32 4294901760, %v6320_v29 }
  0x4f   :  { %5756 = vmatmul.mubr.f32.vlgmr.msra.gmra.mxu0 %v6304_v22  ;;  %5806 = vmatmul.mubr.f32.vlgmr.msra.gmra.mxu1 %v10063_v33  ;;  %v10067_v22 = vand.u32 4294901760, %v6341_v40 }
  0x50   :  { %5854 = vmatpush3.msra.mxu0 %v6314_v27  ;;  %5904 = vmatpush3.msra.mxu1 %v6261_v7  ;;  %v10068_v7 = vand.u32 4294901760, %v6344_v41  ;;  %v10070_v27 = vand.u32 4294901760, %v6422_v25 }
  0x51   :  { %5758 = vmatprep.mubr.f32.mxu0 %v6307_v23  ;;  %5808 = vmatprep.mubr.f32.mxu1 %v10064_v61  ;;  %v10069_v23 = vand.u32 4294901760, %v6419_v24 }
  0x53   :  { %5759 = vmatmul.mubr.f32.gmra.mxu0 %v6317_v28  ;;  %5809 = vmatmul.mubr.f32.gmra.mxu1 %v10065_v1  ;;  %v10071_v28 = vand.u32 4294901760, %v6443_v50 }
  0x54   :  { %5761 = vmatprep.mubr.f32.mxu0 %v6320_v29  ;;  %5811 = vmatprep.mubr.f32.mxu1 %v10066_v18  ;;  %v10072_v29 = vand.u32 4294901760, %v6446_v51 }
  0x57   :  { %5762 = vmatmul.mubr.f32.gmra.mxu0 %v6341_v40  ;;  %5812 = vmatmul.mubr.f32.gmra.mxu1 %v10067_v22  ;;  %v10073_v40 = vand.u32 4294901760, %v6449_v56 }
  0x58   :  { %5764 = vmatprep.mubr.f32.mxu0 %v6344_v41  ;;  %5814 = vmatprep.mubr.f32.mxu1 %v10068_v7  ;;  %v10074_v41 = vand.u32 4294901760, %v6461_v60 }
  0x5b   :  { %5765 = vmatmul.mubr.f32.gmra.mxu0 %v6419_v24  ;;  %5815 = vmatmul.mubr.f32.gmra.mxu1 %v10069_v23  ;;  %v10075_v24 = vand.u32 4294901760, %v6470_v53 }
  0x5c   :  { %5767 = vmatprep.mubr.f32.mxu0 %v6422_v25  ;;  %5817 = vmatprep.mubr.f32.mxu1 %v10070_v27  ;;  %v10076_v25 = vand.u32 4294901760, %v6484_v37 }
  0x5f   :  { %5768 = vmatmul.mubr.f32.gmra.mxu0 %v6443_v50  ;;  %5818 = vmatmul.mubr.f32.gmra.mxu1 %v10071_v28  ;;  %v10077_v50 = vand.u32 4294901760, %v6547_v16 }
  0x60   :  { %5770 = vmatprep.mubr.f32.mxu0 %v6446_v51  ;;  %5820 = vmatprep.mubr.f32.mxu1 %v10072_v29  ;;  %v10078_v51 = vand.u32 4294901760, %v6550_v57 }
  0x63   :  { %5771 = vmatmul.mubr.f32.gmra.mxu0 %v6449_v56  ;;  %5821 = vmatmul.mubr.f32.gmra.mxu1 %v10073_v40  ;;  %v10081_v56 = vand.u32 4294901760, %v6588_v44 }
  0x64   :  { %5773 = vmatprep.mubr.f32.mxu0 %v6461_v60  ;;  %5823 = vmatprep.mubr.f32.mxu1 %v10074_v41  ;;  %v10082_v60 = vand.u32 4294901760, %v6611_v6 }
  0x67   :  { %5774 = vmatmul.mubr.f32.gmra.mxu0 %v6470_v53  ;;  %5824 = vmatmul.mubr.f32.gmra.mxu1 %v10075_v24  ;;  %v10079_v53 = vand.u32 4294901760, %v6570_v48 }
  0x68   :  { %5776 = vmatprep.mubr.f32.mxu0 %v6484_v37  ;;  %5826 = vmatprep.mubr.f32.mxu1 %v10076_v25  ;;  %v10080_v37 = vand.u32 4294901760, %v6577_v45 }
  0x6b   :  { %5777 = vmatmul.mubr.f32.gmra.mxu0 %v6547_v16  ;;  %5827 = vmatmul.mubr.f32.gmra.mxu1 %v10077_v50  ;;  %v10097_v16 = vld [vmem:[#allocation24_spill] sm:$0xff] }
  0x6c   :  { %5779 = vmatprep.mubr.f32.mxu0 %v6550_v57  ;;  %5829 = vmatprep.mubr.f32.mxu1 %v10078_v51  ;;  %v10085_v57 = vand.u32 4294901760, %v6670_v58 }
  0x6f   :  { %5780 = vmatmul.mubr.f32.gmra.mxu0 %v6570_v48  ;;  %5830 = vmatmul.mubr.f32.gmra.mxu1 %v10079_v53  ;;  %v10083_v48 = vand.u32 4294901760, %v6625_v5 }
  0x70   :  { %5782 = vmatprep.mubr.f32.mxu0 %v6577_v45  ;;  %5832 = vmatprep.mubr.f32.mxu1 %v10080_v37  ;;  %v10084_v45 = vand.u32 4294901760, %v6628_v30 }
  0x73   :  { %5783 = vmatmul.mubr.f32.gmra.mxu0 %v6588_v44  ;;  %5833 = vmatmul.mubr.f32.gmra.mxu1 %v10081_v56  ;;  %v10089_v44 = vand.u32 4294901760, %v6740_v15 }
  0x74   :  { %5785 = vmatprep.mubr.f32.mxu0 %v6611_v6  ;;  %5835 = vmatprep.mubr.f32.mxu1 %v10082_v60  ;;  %v10086_v6 = vand.u32 4294901760, %v6673_v55 }
  0x77   :  { %5786 = vmatmul.mubr.f32.gmra.mxu0 %v6625_v5  ;;  %5836 = vmatmul.mubr.f32.gmra.mxu1 %v10083_v48  ;;  %v10087_v5 = vand.u32 4294901760, %v6711_v0 }
  0x78   :  { %5788 = vmatprep.mubr.f32.mxu0 %v6628_v30  ;;  %5838 = vmatprep.mubr.f32.mxu1 %v10084_v45  ;;  %v10099_v30 = vld [vmem:[#allocation31_spill] sm:$0xff] }
  0x7b   :  { %5789 = vmatmul.mubr.f32.gmra.mxu0 %v6670_v58  ;;  %5839 = vmatmul.mubr.f32.gmra.mxu1 %v10085_v57  ;;  %v10088_v58 = vand.u32 4294901760, %v6733_v11 }
  0x7c   :  { %5791 = vmatprep.mubr.f32.mxu0 %v6673_v55  ;;  %5841 = vmatprep.mubr.f32.mxu1 %v10086_v6  ;;  %v10098_v55 = vld [vmem:[#allocation25_spill] sm:$0xff] }
  0x7f   :  { %5792 = vmatmul.mubr.f32.gmra.mxu0 %v6698_v39  ;;  %5842 = vmatmul.mubr.f32.gmra.mxu1 %v468_v36  ;;  %v10096_v39 = vld [vmem:[#allocation23_spill] sm:$0xff]  ;;  %v10102_v36 = vld [vmem:[#allocation37_spill] sm:$0xff] }
  0x80   :  { %5794 = vmatprep.mubr.f32.mxu0 %v6711_v0  ;;  %5844 = vmatprep.mubr.f32.mxu1 %v10087_v5  ;;  %v10101_v0 = vld [vmem:[#allocation35_spill] sm:$0xff] }
  0x83   :  { %5795 = vmatmul.mubr.f32.gmra.mxu0 %v6733_v11  ;;  %5845 = vmatmul.mubr.f32.gmra.mxu1 %v10088_v58  ;;  %v10100_v11 = vld [vmem:[#allocation32_spill] sm:$0xff] }
  0x84   :  { %5797 = vmatprep.mubr.f32.mxu0 %v6740_v15  ;;  %5847 = vmatprep.mubr.f32.mxu1 %v10089_v44  ;;  %v10104_v15 = vld [vmem:[#allocation39_spill] sm:$0xff] }
  0x87   :  { %5798 = vmatmul.mubr.f32.gmra.mxu0 %v6752_v46  ;;  %5848 = vmatmul.mubr.f32.gmra.mxu1 %v508_v35  ;;  %v10103_v46 = vld [vmem:[#allocation38_spill] sm:$0xff] }
  0x88   :  { %5800 = vmatprep.mubr.f32.mxu0 %v6762_v12  ;;  %5850 = vmatprep.mubr.f32.mxu1 %v518_v10 }
  0x8b   :  { %5801 = vmatmul.mubr.f32.gmra.mxu0 %v6770_v49  ;;  %5851 = vmatmul.mubr.f32.gmra.mxu1 %v528_v9 }
  0x8c   :  { %5855 = vmatprep.mubr.f32.mxu0 %v6263_v8  ;;  %5905 = vmatprep.mubr.f32.mxu1 %v6263_v8  ;;  %v10090_v8 = vld [vmem:[#allocation9_spill] sm:$0xff] }
  0x8f   :  { %5856 = vmatmul.mubr.f32.vlgmr.msra.gmra.mxu0 %v6279_v13  ;;  %5906 = vmatmul.mubr.f32.vlgmr.msra.gmra.mxu1 %v6279_v13  ;;  %v10091_v13 = vld [vmem:[#allocation16_spill] sm:$0xff] }
  0x90   :  { %5858 = vmatprep.mubr.f32.mxu0 %v6281_v14  ;;  %5908 = vmatprep.mubr.f32.mxu1 %v6281_v14  ;;  %v10092_v14 = vld [vmem:[#allocation17_spill] sm:$0xff] }
  0x93   :  { %5859 = vmatmul.mubr.f32.gmra.mxu0 %v6298_v20  ;;  %5909 = vmatmul.mubr.f32.gmra.mxu1 %v6298_v20  ;;  %v10093_v20 = vld [vmem:[#allocation20_spill] sm:$0xff] }
  0x94   :  { %5861 = vmatprep.mubr.f32.mxu0 %v6300_v21  ;;  %5911 = vmatprep.mubr.f32.mxu1 %v6300_v21  ;;  %v10094_v21 = vld [vmem:[#allocation21_spill] sm:$0xff] }
  0x97   :  { %5862 = vmatmul.mubr.f32.gmra.mxu0 %v6324_v32  ;;  %5912 = vmatmul.mubr.f32.gmra.mxu1 %v6324_v32  ;;  %v10095_v32 = vld [vmem:[#allocation22_spill] sm:$0xff] }
  0x98   :  { %5864 = vmatprep.mubr.f32.mxu0 %v10090_v8  ;;  %5914 = vmatprep.mubr.f32.mxu1 %v10090_v8 }
  0x9b   :  { %5865 = vmatmul.mubr.f32.gmra.mxu0 %v10091_v13  ;;  %5915 = vmatmul.mubr.f32.gmra.mxu1 %v10091_v13 }
  0x9c   :  { %5867 = vmatprep.mubr.f32.mxu0 %v10092_v14  ;;  %5917 = vmatprep.mubr.f32.mxu1 %v10092_v14 }
  0x9f   :  { %5868 = vmatmul.mubr.f32.gmra.mxu0 %v10093_v20  ;;  %5918 = vmatmul.mubr.f32.gmra.mxu1 %v10093_v20 }
  0xa0   :  { %5870 = vmatprep.mubr.f32.mxu0 %v10094_v21  ;;  %5920 = vmatprep.mubr.f32.mxu1 %v10094_v21 }
  0xa3   :  { %5871 = vmatmul.mubr.f32.gmra.mxu0 %v10095_v32  ;;  %5921 = vmatmul.mubr.f32.gmra.mxu1 %v10095_v32 }
  0xa4   :  { %5873 = vmatprep.mubr.f32.mxu0 %v10096_v39  ;;  %5923 = vmatprep.mubr.f32.mxu1 %v10096_v39 }
  0xa7   :  { %5874 = vmatmul.mubr.f32.gmra.mxu0 %v10097_v16  ;;  %5924 = vmatmul.mubr.f32.gmra.mxu1 %v10097_v16 }
  0xa8   :  { %5876 = vmatprep.mubr.f32.mxu0 %v10098_v55  ;;  %5926 = vmatprep.mubr.f32.mxu1 %v10098_v55 }
  0xab   :  { %5877 = vmatmul.mubr.f32.gmra.mxu0 %v10099_v30  ;;  %5927 = vmatmul.mubr.f32.gmra.mxu1 %v10099_v30 }
  0xac   :  { %5879 = vmatprep.mubr.f32.mxu0 %v10100_v11  ;;  %5929 = vmatprep.mubr.f32.mxu1 %v10100_v11 }
  0xaf   :  { %5880 = vmatmul.mubr.f32.gmra.mxu0 %v10101_v0  ;;  %5930 = vmatmul.mubr.f32.gmra.mxu1 %v10101_v0 }
  0xb0   :  { %5882 = vmatprep.mubr.f32.mxu0 %v10102_v36  ;;  %5932 = vmatprep.mubr.f32.mxu1 %v10102_v36 }
  0xb3   :  { %5883 = vmatmul.mubr.f32.gmra.mxu0 %v10103_v46  ;;  %5933 = vmatmul.mubr.f32.gmra.mxu1 %v10103_v46 }
  0xb4   :  { %5885 = vmatprep.mubr.f32.mxu0 %v10104_v15  ;;  %5935 = vmatprep.mubr.f32.mxu1 %v10104_v15 }
  0xb7   :  { %5886 = vmatmul.mubr.f32.gmra.mxu0 %v6590_v47  ;;  %5936 = vmatmul.mubr.f32.gmra.mxu1 %v6590_v47 }
  0xb8   :  { %5888 = vmatprep.mubr.f32.mxu0 %v6592_v17  ;;  %5938 = vmatprep.mubr.f32.mxu1 %v6592_v17  ;;  %v6960_v17 = vld [vmem:[%s9907_s1 + $0x3] ss:$0 sm:$0xff] }
  0xbb   :  { %5889 = vmatmul.mubr.f32.gmra.mxu0 %v6638_v3  ;;  %5939 = vmatmul.mubr.f32.gmra.mxu1 %v6638_v3 }
  0xbc   :  { %5891 = vmatprep.mubr.f32.mxu0 %v6640_v52  ;;  %5941 = vmatprep.mubr.f32.mxu1 %v6640_v52 }
  0xbf   :  { %5892 = vmatmul.mubr.f32.gmra.mxu0 %v6659_v31  ;;  %5942 = vmatmul.mubr.f32.gmra.mxu1 %v6659_v31 }
  0xc0   :  { %5894 = vmatprep.mubr.f32.mxu0 %v6679_v59  ;;  %5944 = vmatprep.mubr.f32.mxu1 %v6679_v59 }
  0xc3   :  { %5895 = vmatmul.mubr.f32.gmra.mxu0 %v6707_v63  ;;  %5945 = vmatmul.mubr.f32.gmra.mxu1 %v6707_v63 }
  0xc4   :  { %5897 = vmatprep.mubr.f32.mxu0 %v6713_v38  ;;  %5947 = vmatprep.mubr.f32.mxu1 %v6713_v38 }
  0xc7   :  { %5898 = vmatmul.mubr.f32.gmra.mxu0 %v6735_v2  ;;  %5948 = vmatmul.mubr.f32.gmra.mxu1 %v6735_v2 }
  0xc8   :  { %5900 = vmatprep.mubr.f32.mxu0 %v6742_v19  ;;  %5950 = vmatprep.mubr.f32.mxu1 %v6742_v19 }
  0xcb   :  { %5901 = vmatmul.mubr.f32.gmra.mxu0 %v6754_v43  ;;  %5951 = vmatmul.mubr.f32.gmra.mxu1 %v6754_v43 }
  0xcf   :  { %v5657_v63 = vpop.f32.mrf.mxu0  ;;  %v5707_v47 = vpop.f32.mrf.mxu1 }
  0xd0   :  { %v233_v3 = vadd.f32 %v5657_v63, %v6960_v17 }
  0xd1   :  { %v222_v52 = vpop.f32.mrf.mxu0  ;;  %v608_v59 = vpop.f32.mrf.mxu1 }
  0xd2   :  { %v6963_v31 = vadd.f32 %v5707_v47, %v233_v3  ;;  %v223_v2 = vadd.f32 %v6960_v17, %v222_v52 }
  0xd3   :  { %v5660_v38 = vpop.f32.mrf.mxu0  ;;  %v5710_v12 = vpop.f32.mrf.mxu1 }
  0xd4   :  { %v6966_v19 = vadd.f32 %v608_v59, %v223_v2  ;;  %v253_v43 = vadd.f32 %v5660_v38, %v6960_v17 }
  0xd5   :  { %v242_v35 = vpop.f32.mrf.mxu0  ;;  %v620_v9 = vpop.f32.mrf.mxu1 }
  0xd6   :  { %v6969_v49 = vadd.f32 %v5710_v12, %v253_v43  ;;  %v243_v10 = vadd.f32 %v6960_v17, %v242_v35 }
  0xd7   :  { %v5663_v54 = vpop.f32.mrf.mxu0  ;;  %v5713_v34 = vpop.f32.mrf.mxu1 }
  0xd8   :  { %v6972_v26 = vadd.f32 %v620_v9, %v243_v10  ;;  %v273_v62 = vadd.f32 %v5663_v54, %v6960_v17 }
  0xd9   :  { %v262_v42 = vpop.f32.mrf.mxu0  ;;  %v632_v61 = vpop.f32.mrf.mxu1 }
  0xda   :  { %v6975_v4 = vadd.f32 %v5713_v34, %v273_v62  ;;  %v263_v33 = vadd.f32 %v6960_v17, %v262_v42 }
  0xdb   :  { %v5666_v1 = vpop.f32.mrf.mxu0  ;;  %v5716_v7 = vpop.f32.mrf.mxu1 }
  0xdc   :  { %v6978_v18 = vadd.f32 %v632_v61, %v263_v33  ;;  %v293_v22 = vadd.f32 %v5666_v1, %v6960_v17 }
  0xdd   :  { %v282_v23 = vpop.f32.mrf.mxu0  ;;  %v644_v29 = vpop.f32.mrf.mxu1 }
  0xde   :  { %v6981_v27 = vadd.f32 %v5716_v7, %v293_v22  ;;  %v283_v28 = vadd.f32 %v6960_v17, %v282_v23 }
  0xdf   :  { %v5669_v40 = vpop.f32.mrf.mxu0  ;;  %v5719_v25 = vpop.f32.mrf.mxu1 }
  0xe0   :  { %v6984_v41 = vadd.f32 %v644_v29, %v283_v28  ;;  %v313_v24 = vadd.f32 %v5669_v40, %v6960_v17 }
  0xe1   :  { %v302_v50 = vpop.f32.mrf.mxu0  ;;  %v656_v37 = vpop.f32.mrf.mxu1 }
  0xe2   :  { %v6987_v51 = vadd.f32 %v5719_v25, %v313_v24  ;;  %v303_v53 = vadd.f32 %v6960_v17, %v302_v50 }
  0xe3   :  { %v5672_v56 = vpop.f32.mrf.mxu0  ;;  %v5722_v45 = vpop.f32.mrf.mxu1 }
  0xe4   :  { %v6990_v60 = vadd.f32 %v656_v37, %v303_v53  ;;  %v333_v48 = vadd.f32 %v5672_v56, %v6960_v17 }
  0xe5   :  { %v322_v57 = vpop.f32.mrf.mxu0  ;;  %v668_v58 = vpop.f32.mrf.mxu1 }
  0xe6   :  { %v6993_v6 = vadd.f32 %v5722_v45, %v333_v48  ;;  %v323_v5 = vadd.f32 %v6960_v17, %v322_v57 }
  0xe7   :  { %v5675_v44 = vpop.f32.mrf.mxu0  ;;  %v5725_v14 = vpop.f32.mrf.mxu1 }
  0xe8   :  { %v6996_v8 = vadd.f32 %v668_v58, %v323_v5  ;;  %v353_v13 = vadd.f32 %v5675_v44, %v6960_v17 }
  0xe9   :  { %v342_v20 = vpop.f32.mrf.mxu0  ;;  %v680_v39 = vpop.f32.mrf.mxu1 }
  0xea   :  { %v6999_v21 = vadd.f32 %v5725_v14, %v353_v13  ;;  %v343_v32 = vadd.f32 %v6960_v17, %v342_v20 }
  0xeb   :  { %v5678_v16 = vpop.f32.mrf.mxu0  ;;  %v5728_v11 = vpop.f32.mrf.mxu1 }
  0xec   :  { %v7002_v55 = vadd.f32 %v680_v39, %v343_v32  ;;  %v373_v30 = vadd.f32 %v5678_v16, %v6960_v17 }
  0xed   :  { %v362_v0 = vpop.f32.mrf.mxu0  ;;  %v692_v15 = vpop.f32.mrf.mxu1 }
  0xee   :  { %v7005_v36 = vadd.f32 %v5728_v11, %v373_v30  ;;  %v363_v46 = vadd.f32 %v6960_v17, %v362_v0 }
  0xef   :  { %v5681_v63 = vpop.f32.mrf.mxu0  ;;  %v5731_v52 = vpop.f32.mrf.mxu1 }
  0xf0   :  { %v7008_v3 = vadd.f32 %v692_v15, %v363_v46  ;;  %v393_v47 = vadd.f32 %v5681_v63, %v6960_v17 }
  0xf1   :  { %v382_v2 = vpop.f32.mrf.mxu0  ;;  %v704_v43 = vpop.f32.mrf.mxu1 }
  0xf2   :  { %v7011_v59 = vadd.f32 %v5731_v52, %v393_v47  ;;  %v383_v38 = vadd.f32 %v6960_v17, %v382_v2 }
  0xf3   :  { %v5684_v12 = vpop.f32.mrf.mxu0  ;;  %v5734_v9 = vpop.f32.mrf.mxu1 }
  0xf4   :  { %v7014_v35 = vadd.f32 %v704_v43, %v383_v38  ;;  %v413_v10 = vadd.f32 %v5684_v12, %v6960_v17 }
  0xf5   :  { %v402_v54 = vpop.f32.mrf.mxu0  ;;  %v716_v42 = vpop.f32.mrf.mxu1 }
  0xf6   :  { %v7017_v62 = vadd.f32 %v5734_v9, %v413_v10  ;;  %v403_v34 = vadd.f32 %v6960_v17, %v402_v54 }
  0xf7   :  { %v5687_v33 = vpop.f32.mrf.mxu0  ;;  %v5737_v22 = vpop.f32.mrf.mxu1 }
  0xf8   :  { %v7020_v61 = vadd.f32 %v716_v42, %v403_v34  ;;  %v433_v1 = vadd.f32 %v5687_v33, %v6960_v17 }
  0xf9   :  { %v422_v7 = vpop.f32.mrf.mxu0  ;;  %v728_v29 = vpop.f32.mrf.mxu1 }
  0xfa   :  { %v7023_v23 = vadd.f32 %v5737_v22, %v433_v1  ;;  %v423_v28 = vadd.f32 %v6960_v17, %v422_v7 }
  0xfb   :  { %v5690_v40 = vpop.f32.mrf.mxu0  ;;  %v5740_v50 = vpop.f32.mrf.mxu1 }
  0xfc   :  { %v7026_v24 = vadd.f32 %v728_v29, %v423_v28  ;;  %v453_v25 = vadd.f32 %v5690_v40, %v6960_v17 }
  0xfd   :  { %v442_v53 = vpop.f32.mrf.mxu0  ;;  %v740_v48 = vpop.f32.mrf.mxu1 }
  0xfe   :  { %v7029_v37 = vadd.f32 %v5740_v50, %v453_v25  ;;  %v443_v56 = vadd.f32 %v6960_v17, %v442_v53 }
  0xff   :  { %v5693_v45 = vpop.f32.mrf.mxu0  ;;  %v5743_v58 = vpop.f32.mrf.mxu1 }
 0x100   :  { %v7032_v57 = vadd.f32 %v740_v48, %v443_v56  ;;  %v473_v5 = vadd.f32 %v5693_v45, %v6960_v17 }
 0x101   :  { %v462_v44 = vpop.f32.mrf.mxu0  ;;  %v752_v20 = vpop.f32.mrf.mxu1 }
 0x102   :  { %v7035_v13 = vadd.f32 %v5743_v58, %v473_v5  ;;  %v463_v14 = vadd.f32 %v6960_v17, %v462_v44 }
 0x103   :  { %v5696_v32 = vpop.f32.mrf.mxu0  ;;  %v5746_v30 = vpop.f32.mrf.mxu1 }
 0x104   :  { %v7038_v39 = vadd.f32 %v752_v20, %v463_v14  ;;  %v493_v16 = vadd.f32 %v5696_v32, %v6960_v17 }
 0x105   :  { %v482_v11 = vpop.f32.mrf.mxu0  ;;  %v764_v15 = vpop.f32.mrf.mxu1 }
 0x106   :  { %v7041_v0 = vadd.f32 %v5746_v30, %v493_v16  ;;  %v483_v46 = vadd.f32 %v6960_v17, %v482_v11 }
 0x107   :  { %v5699_v63 = vpop.f32.mrf.mxu0  ;;  %v5749_v2 = vpop.f32.mrf.mxu1 }
 0x108   :  { %v7044_v47 = vadd.f32 %v764_v15, %v483_v46  ;;  %v513_v52 = vadd.f32 %v5699_v63, %v6960_v17 }
 0x109   :  { %v502_v38 = vpop.f32.mrf.mxu0  ;;  %v776_v10 = vpop.f32.mrf.mxu1 }
 0x10a   :  { %v7047_v43 = vadd.f32 %v5749_v2, %v513_v52  ;;  %v503_v12 = vadd.f32 %v6960_v17, %v502_v38 }
 0x10b   :  { %v5702_v9 = vpop.f32.mrf.mxu0  ;;  %v5752_v42 = vpop.f32.mrf.mxu1 }
 0x10c   :  { %v7050_v54 = vadd.f32 %v776_v10, %v503_v12  ;;  %v533_v34 = vadd.f32 %v5702_v9, %v6960_v17 }
 0x10d   :  { %v522_v33 = vpop.f32.mrf.mxu0  ;;  %v788_v7 = vpop.f32.mrf.mxu1 }
 0x10e   :  { %v7053_v1 = vadd.f32 %v5752_v42, %v533_v34  ;;  %v523_v22 = vadd.f32 %v6960_v17, %v522_v33 }
 0x10f   :  { %v7056_v28 = vpop.f32.mrf.mxu0  ;;  %v7060_v40 = vpop.f32.mrf.mxu1 }
 0x110   :  { %v7058_v29 = vadd.f32 %v788_v7, %v523_v22 }
 0x111   :  { %v868_v25 = vpop.f32.mrf.mxu0  ;;  %v1159_v53 = vpop.f32.mrf.mxu1 }
 0x112   :  { %v869_v50 = vadd.f32 %v868_v25, %v6966_v19 }
 0x113   :  { %v5760_v56 = vpop.f32.mrf.mxu0  ;;  %v5810_v5 = vpop.f32.mrf.mxu1 }
 0x114   :  { %v7063_v48 = vadd.f32 %v1159_v53, %v869_v50  ;;  %v890_v45 = vadd.f32 %v5760_v56, %v6969_v49 }
 0x115   :  { %v882_v58 = vpop.f32.mrf.mxu0  ;;  %v1175_v14 = vpop.f32.mrf.mxu1 }
 0x116   :  { %v7066_v44 = vadd.f32 %v5810_v5, %v890_v45  ;;  %v883_v17 = vadd.f32 %v882_v58, %v6972_v26 }
 0x117   :  { %v5763_v20 = vpop.f32.mrf.mxu0  ;;  %v5813_v30 = vpop.f32.mrf.mxu1 }
 0x118   :  { %v7069_v32 = vadd.f32 %v1175_v14, %v883_v17  ;;  %v904_v16 = vadd.f32 %v5763_v20, %v6975_v4 }
 0x119   :  { %v896_v19 = vpop.f32.mrf.mxu0  ;;  %v1191_v15 = vpop.f32.mrf.mxu1 }
 0x11a   :  { %v7072_v11 = vadd.f32 %v5813_v30, %v904_v16  ;;  %v897_v46 = vadd.f32 %v896_v19, %v6978_v18 }
 0x11b   :  { %v5766_v49 = vpop.f32.mrf.mxu0  ;;  %v5816_v2 = vpop.f32.mrf.mxu1 }
 0x11c   :  { %v7075_v63 = vadd.f32 %v1191_v15, %v897_v46  ;;  %v918_v52 = vadd.f32 %v5766_v49, %v6981_v27 }
 0x11d   :  { %v910_v26 = vpop.f32.mrf.mxu0  ;;  %v1207_v10 = vpop.f32.mrf.mxu1 }
 0x11e   :  { %v7078_v38 = vadd.f32 %v5816_v2, %v918_v52  ;;  %v911_v12 = vadd.f32 %v910_v26, %v6984_v41 }
 0x11f   :  { %v5769_v4 = vpop.f32.mrf.mxu0  ;;  %v5819_v42 = vpop.f32.mrf.mxu1 }
 0x120   :  { %v7081_v9 = vadd.f32 %v1207_v10, %v911_v12  ;;  %v932_v34 = vadd.f32 %v5769_v4, %v6987_v51 }
 0x121   :  { %v924_v18 = vpop.f32.mrf.mxu0  ;;  %v1223_v7 = vpop.f32.mrf.mxu1 }
 0x122   :  { %v7084_v33 = vadd.f32 %v5819_v42, %v932_v34  ;;  %v925_v22 = vadd.f32 %v924_v18, %v6990_v60 }
 0x123   :  { %v5772_v27 = vpop.f32.mrf.mxu0  ;;  %v5822_v53 = vpop.f32.mrf.mxu1 }
 0x124   :  { %v7087_v25 = vadd.f32 %v1223_v7, %v925_v22  ;;  %v946_v50 = vadd.f32 %v5772_v27, %v6993_v6 }
 0x125   :  { %v938_v41 = vpop.f32.mrf.mxu0  ;;  %v1239_v5 = vpop.f32.mrf.mxu1 }
 0x126   :  { %v7090_v56 = vadd.f32 %v5822_v53, %v946_v50  ;;  %v939_v45 = vadd.f32 %v938_v41, %v6996_v8 }
 0x127   :  { %v5775_v51 = vpop.f32.mrf.mxu0  ;;  %v5825_v14 = vpop.f32.mrf.mxu1 }
 0x128   :  { %v7093_v58 = vadd.f32 %v1239_v5, %v939_v45  ;;  %v960_v17 = vadd.f32 %v5775_v51, %v6999_v21 }
 0x129   :  { %v952_v60 = vpop.f32.mrf.mxu0  ;;  %v1255_v30 = vpop.f32.mrf.mxu1 }
 0x12a   :  { %v7096_v20 = vadd.f32 %v5825_v14, %v960_v17  ;;  %v953_v16 = vadd.f32 %v952_v60, %v7002_v55 }
 0x12b   :  { %v5778_v6 = vpop.f32.mrf.mxu0  ;;  %v5828_v15 = vpop.f32.mrf.mxu1 }
 0x12c   :  { %v7099_v19 = vadd.f32 %v1255_v30, %v953_v16  ;;  %v974_v46 = vadd.f32 %v5778_v6, %v7005_v36 }
 0x12d   :  { %v966_v8 = vpop.f32.mrf.mxu0  ;;  %v1271_v2 = vpop.f32.mrf.mxu1 }
 0x12e   :  { %v7102_v49 = vadd.f32 %v5828_v15, %v974_v46  ;;  %v967_v52 = vadd.f32 %v966_v8, %v7008_v3 }
 0x12f   :  { %v5781_v21 = vpop.f32.mrf.mxu0  ;;  %v5831_v10 = vpop.f32.mrf.mxu1 }
 0x130   :  { %v7105_v26 = vadd.f32 %v1271_v2, %v967_v52  ;;  %v988_v12 = vadd.f32 %v5781_v21, %v7011_v59 }
 0x131   :  { %v980_v55 = vpop.f32.mrf.mxu0  ;;  %v1287_v42 = vpop.f32.mrf.mxu1 }
 0x132   :  { %v7108_v4 = vadd.f32 %v5831_v10, %v988_v12  ;;  %v981_v34 = vadd.f32 %v980_v55, %v7014_v35 }
 0x133   :  { %v5784_v36 = vpop.f32.mrf.mxu0  ;;  %v5834_v7 = vpop.f32.mrf.mxu1 }
 0x134   :  { %v7111_v18 = vadd.f32 %v1287_v42, %v981_v34  ;;  %v1002_v22 = vadd.f32 %v5784_v36, %v7017_v62 }
 0x135   :  { %v994_v3 = vpop.f32.mrf.mxu0  ;;  %v1303_v53 = vpop.f32.mrf.mxu1 }
 0x136   :  { %v7114_v27 = vadd.f32 %v5834_v7, %v1002_v22  ;;  %v995_v50 = vadd.f32 %v994_v3, %v7020_v61 }
 0x137   :  { %v5787_v59 = vpop.f32.mrf.mxu0  ;;  %v5837_v5 = vpop.f32.mrf.mxu1 }
 0x138   :  { %v7117_v41 = vadd.f32 %v1303_v53, %v995_v50  ;;  %v1016_v45 = vadd.f32 %v5787_v59, %v7023_v23  ;;  %v876_v59 = vadd.f32 %v7056_v28, %v6963_v31 }
 0x139   :  { %v1008_v35 = vpop.f32.mrf.mxu0  ;;  %v1319_v14 = vpop.f32.mrf.mxu1 }
 0x13a   :  { %v7120_v51 = vadd.f32 %v5837_v5, %v1016_v45  ;;  %v1009_v17 = vadd.f32 %v1008_v35, %v7026_v24 }
 0x13b   :  { %v5790_v62 = vpop.f32.mrf.mxu0  ;;  %v5840_v30 = vpop.f32.mrf.mxu1 }
 0x13c   :  { %v7123_v60 = vadd.f32 %v1319_v14, %v1009_v17  ;;  %v1030_v16 = vadd.f32 %v5790_v62, %v7029_v37 }
 0x13d   :  { %v1022_v61 = vpop.f32.mrf.mxu0  ;;  %v1335_v15 = vpop.f32.mrf.mxu1 }
 0x13e   :  { %v7126_v6 = vadd.f32 %v5840_v30, %v1030_v16  ;;  %v1023_v46 = vadd.f32 %v1022_v61, %v7032_v57  ;;  %v1168_v16 = vadd.f32 %v7060_v40, %v876_v59 }
 0x13f   :  { %v5793_v23 = vpop.f32.mrf.mxu0  ;;  %v5843_v2 = vpop.f32.mrf.mxu1 }
 0x140   :  { %v7129_v8 = vadd.f32 %v1335_v15, %v1023_v46  ;;  %v1044_v52 = vadd.f32 %v5793_v23, %v7035_v13 }
 0x141   :  { %v1036_v24 = vpop.f32.mrf.mxu0  ;;  %v1351_v10 = vpop.f32.mrf.mxu1 }
 0x142   :  { %v7132_v21 = vadd.f32 %v5843_v2, %v1044_v52  ;;  %v1037_v12 = vadd.f32 %v1036_v24, %v7038_v39 }
 0x143   :  { %v5796_v37 = vpop.f32.mrf.mxu0  ;;  %v5846_v42 = vpop.f32.mrf.mxu1 }
 0x144   :  { %10105 = vst [vmem:[#allocation9_spill] sm:$0xff] %v7132_v21  ;;  %v7135_v55 = vadd.f32 %v1351_v10, %v1037_v12  ;;  %v1058_v34 = vadd.f32 %v5796_v37, %v7041_v0 }
 0x145   :  { %v1050_v57 = vpop.f32.mrf.mxu0  ;;  %v1367_v7 = vpop.f32.mrf.mxu1 }
 0x146   :  { %10106 = vst [vmem:[#allocation16_spill] sm:$0xff] %v7135_v55  ;;  %v7138_v36 = vadd.f32 %v5846_v42, %v1058_v34  ;;  %v1051_v22 = vadd.f32 %v1050_v57, %v7044_v47 }
 0x147   :  { %v5799_v13 = vpop.f32.mrf.mxu0  ;;  %v5849_v53 = vpop.f32.mrf.mxu1 }
 0x148   :  { %10107 = vst [vmem:[#allocation17_spill] sm:$0xff] %v7138_v36  ;;  %v7141_v3 = vadd.f32 %v1367_v7, %v1051_v22  ;;  %v1072_v50 = vadd.f32 %v5799_v13, %v7047_v43 }
 0x149   :  { %v1064_v39 = vpop.f32.mrf.mxu0  ;;  %v1383_v5 = vpop.f32.mrf.mxu1 }
 0x14a   :  { %10108 = vst [vmem:[#allocation20_spill] sm:$0xff] %v7141_v3  ;;  %v7146_v45 = vadd.f32 %v5849_v53, %v1072_v50  ;;  %v1065_v0 = vadd.f32 %v1064_v39, %v7050_v54 }
 0x14b   :  { %v5802_v35 = vpop.f32.mrf.mxu0  ;;  %v5852_v14 = vpop.f32.mrf.mxu1 }
 0x14c   :  { %10109 = vst [vmem:[#allocation21_spill] sm:$0xff] %v7146_v45  ;;  %v7149_v17 = vadd.f32 %v1383_v5, %v1065_v0  ;;  %v1086_v47 = vadd.f32 %v5802_v35, %v7053_v1 }
 0x14d   :  { %v1078_v62 = vpop.f32.mrf.mxu0  ;;  %v1399_v61 = vpop.f32.mrf.mxu1 }
 0x14e   :  { %10110 = vst [vmem:[#allocation22_spill] sm:$0xff] %v7149_v17  ;;  %v7153_v43 = vadd.f32 %v5852_v14, %v1086_v47  ;;  %v1079_v30 = vadd.f32 %v1078_v62, %v7058_v29 }
 0x14f   :  { %v5857_v31 = vpop.f32.mrf.mxu0  ;;  %v5907_v54 = vpop.f32.mrf.mxu1 }
 0x150   :  { %10111 = vst [vmem:[#allocation23_spill] sm:$0xff] %v7153_v43  ;;  %v7156_v28 = vadd.f32 %v1399_v61, %v1079_v30  ;;  %v1488_v46 = vadd.f32 %v5857_v31, %v1168_v16 }
 0x151   :  { %v1481_v15 = vpop.f32.mrf.mxu0  ;;  %v1739_v1 = vpop.f32.mrf.mxu1 }
 0x152   :  { %10112 = vst [vmem:[#allocation24_spill] sm:$0xff] %v7156_v28  ;;  %v7158_v23 = vadd.f32 %v5907_v54, %v1488_v46  ;;  %v1482_v52 = vadd.f32 %v1481_v15, %v7063_v48 }
 0x153   :  { %v5860_v2 = vpop.f32.mrf.mxu0  ;;  %v5910_v10 = vpop.f32.mrf.mxu1 }
 0x154   :  { %v9990_v24 = vand.u32 2147483647, %v7158_v23  ;;  %v2036_v40 = vand.u32 2139095040, %v7158_v23  ;;  %v7163_v12 = vadd.f32 %v1739_v1, %v1482_v52  ;;  %v1500_v29 = vadd.f32 %v5860_v2, %v7066_v44 }
 0x155   :  { %v1493_v48 = vpop.f32.mrf.mxu0  ;;  %v1751_v35 = vpop.f32.mrf.mxu1  ;;  %v9999_v52 = vmov 2475754826   ;;  %v9995_v2 = vmov 2131351028   ;;  %vm2035_vm15 = vcmp.lt.s32.totalorder %v7158_v23, 0 }
 0x156   :  { %v2037_v37 = vshrl.u32 %v2036_v40, 23  ;;  %v2040_v34 = vand.u32 8388607, %v9990_v24  ;;  %v9989_v42 = vand.u32 2147483647, %v7163_v12  ;;  %v1932_v57 = vand.u32 2139095040, %v7163_v12 }
 0x157   :  { %v7170_v7 = vadd.f32 %v5910_v10, %v1500_v29  ;;  %v1494_v44 = vadd.f32 %v1493_v48, %v7069_v32  ;;  %v10002_v32 = vmov 683565275   ;;  %v9991_v29 = vmov 2102212464  }
 0x158   :  { %v5331_v22 = vadd.s32 4294967169, %v2037_v37  ;;  %v1933_v13 = vshrl.u32 %v1932_v57, 23  ;;  %v1936_v50 = vand.u32 8388607, %v9989_v42  ;;  %v2041_v39 = vor.u32 8388608, %v2040_v34 }
 0x159   :  { %v2244_v5 = vand.u32 2139095040, %v7170_v7  ;;  %v7180_v46 = vadd.f32 %v1751_v35, %v1494_v44  ;;  %v9993_v37 = vmov 920167782  }
 0x15a   :  { %v2043_v53 = vadd.s32 1, %v5331_v22  ;;  %v5327_v59 = vadd.s32 4294967169, %v1933_v13  ;;  %v1937_v0 = vor.u32 8388608, %v1936_v50  ;;  %v7176_v30 = vshll.u32 %v2041_v39, 8 }
 0x15b   :  { %v2245_v31 = vshrl.u32 %v2244_v5, 23 }
 0x15c   :  { %vm2044_vm2 = vcmp.gt.s32.totalorder %v2043_v53, 0  ;;  %v1939_v14 = vadd.s32 1, %v5327_v59  ;;  %v7178_v61 = vshll.u32 %v1937_v0, 8 }
 0x15d   :  { %v2045_v47 = vsel %vm2044_vm2, %v2043_v53, 0  ;;  %v9997_v53 = vmov 1326507024  }
 0x15e   :  { %v2046_v62 = vshrl.u32 %v2045_v47, 5  ;;  %v2047_v16 = vand.u32 31, %v2045_v47  ;;  %vm1940_vm3 = vcmp.gt.s32.totalorder %v1939_v14, 0 }
 0x15f   :  { %v1941_v5 = vsel %vm1940_vm3, %v1939_v14, 0 }
 0x160   :  { %v2048_v54 = vsub.s32 32, %v2047_v16  ;;  %v2050_v15 = vshll.u32 %v10002_v32, %v2047_v16  ;;  %v2053_v1 = vshll.u32 %v9999_v52, %v2047_v16  ;;  %v2056_v40 = vshll.u32 %v9995_v2, %v2047_v16 }
 0x161   :  { %v2059_v10 = vshll.u32 %v9991_v29, %v2047_v16  ;;  %v2062_v34 = vshll.u32 %v9993_v37, %v2047_v16  ;;  %vm2065_vm4 = vcmp.lt.s32.totalorder %v2046_v62, 1  ;;  %vm2066_vm5 = vcmp.lt.s32.totalorder %v2046_v62, 2 }
 0x162   :  { %v2051_v57 = vshrl.u32 %v9999_v52, %v2048_v54  ;;  %v2054_v48 = vshrl.u32 %v9995_v2, %v2048_v54  ;;  %v2057_v22 = vshrl.u32 %v9991_v29, %v2048_v54  ;;  %v2049_v13 = vshrl.u32 %v10002_v32, %v2048_v54 }
 0x163   :  { %v2060_v50 = vshrl.u32 %v9993_v37, %v2048_v54  ;;  %v2063_v44 = vshrl.u32 %v9997_v53, %v2048_v54  ;;  %vm2067_vm6 = vcmp.lt.s32.totalorder %v2046_v62, 3  ;;  %vm2068_vm7 = vcmp.lt.s32.totalorder %v2046_v62, 4 }
 0x164   :  { %v2052_v39 = vor.u32 %v2051_v57, %v2050_v15  ;;  %v2055_v59 = vor.u32 %v2054_v48, %v2053_v1  ;;  %v2058_v0 = vor.u32 %v2057_v22, %v2056_v40  ;;  %v1943_v16 = vand.u32 31, %v1941_v5 }
 0x165   :  { %v2061_v35 = vor.u32 %v2060_v50, %v2059_v10  ;;  %v2064_v47 = vor.u32 %v2063_v44, %v2062_v34  ;;  %v5339_v10 = vadd.s32 4294967169, %v2245_v31  ;;  %v1942_v48 = vshrl.u32 %v1941_v5, 5 }
 0x166   :  { %v2069_v42 = vsel %vm2065_vm4, %v2049_v13, %v2052_v39  ;;  %v2070_v24 = vsel %vm2068_vm7, %v2058_v0, 2102212464  ;;  %v2073_v29 = vsel %vm2065_vm4, %v2052_v39, %v2055_v59  ;;  %v2077_v37 = vsel %vm2065_vm4, %v2055_v59, %v2058_v0 }
 0x167   :  { %v2071_v2 = vsel %vm2067_vm6, %v2055_v59, %v2070_v24  ;;  %v2074_v54 = vsel %vm2068_vm7, %v2061_v35, 920167782  ;;  %v2078_v53 = vsel %vm2068_vm7, %v2064_v47, 1326507024  ;;  %v1944_v15 = vsub.s32 32, %v1943_v16 }
 0x168   :  { %v2072_v1 = vsel %vm2066_vm5, %v2069_v42, %v2071_v2  ;;  %v2075_v14 = vsel %vm2067_vm6, %v2058_v0, %v2074_v54  ;;  %v2079_v40 = vsel %vm2067_vm6, %v2061_v35, %v2078_v53  ;;  %v1946_v22 = vshll.u32 %v10002_v32, %v1943_v16 }
 0x169   :  { %v2076_v34 = vsel %vm2066_vm5, %v2073_v29, %v2075_v14  ;;  %v2080_v57 = vsel %vm2066_vm5, %v2077_v37, %v2079_v40  ;;  %v2088_v42 = vmul.u32 %v7176_v30, %v2072_v1  ;;  %v1947_v31 = vshrl.u32 %v9999_v52, %v1944_v15 }
 0x16a   :  { %v7205_v13 = vmul.u32.u64.low %v7176_v30, %v2080_v57  ;;  %v7206_v24 = vmul.u32.u64.high %v7176_v30, %v2080_v57, %v7205_v13  ;;  %v7209_v50 = vmul.u32.u64.low %v7176_v30, %v2076_v34  ;;  %v7210_v44 = vmul.u32.u64.high %v7176_v30, %v2076_v34, %v7209_v50 }
 0x16b   :  { %v1949_v2 = vshll.u32 %v9999_v52, %v1943_v16  ;;  %v10113_v62 = vmov 2131351028   ;;  %v10114_v53 = vmov 2102212464   ;;  %v10115_v0 = vmov 920167782  }
 0x16c   :  { %v1950_v29 = vshrl.u32 %v10113_v62, %v1944_v15  ;;  %v1952_v37 = vshll.u32 %v10113_v62, %v1943_v16  ;;  %v1953_v39 = vshrl.u32 %v10114_v53, %v1944_v15  ;;  %v1955_v59 = vshll.u32 %v10114_v53, %v1943_v16 }
 0x16d   :  { %v1956_v5 = vshrl.u32 %v10115_v0, %v1944_v15  ;;  %v1948_v35 = vor.u32 %v1947_v31, %v1946_v22  ;;  %v1958_v54 = vshll.u32 %v10115_v0, %v1943_v16  ;;  %v10116_v14 = vmov 1326507024  }
 0x16e   :  { %v1951_v47 = vor.u32 %v1950_v29, %v1949_v2  ;;  %v1959_v30 = vshrl.u32 %v10116_v14, %v1944_v15  ;;  %vm2090_vm8 = vc.u32 %v7206_v24, %v7209_v50  ;;  %v2091_v1 = vadd.s32 1, %v7210_v44 }
 0x16f   :  { %v1945_v40 = vshrl.u32 %v10002_v32, %v1944_v15  ;;  %v1954_v34 = vor.u32 %v1953_v39, %v1952_v37  ;;  %v1957_v57 = vor.u32 %v1956_v5, %v1955_v59  ;;  %vm1961_vm9 = vcmp.lt.s32.totalorder %v1942_v48, 1 }
 0x170   :  { %v1960_v13 = vor.u32 %v1959_v30, %v1958_v54  ;;  %vm1962_vm10 = vcmp.lt.s32.totalorder %v1942_v48, 2  ;;  %v2092_v52 = vsel %vm2090_vm8, %v2091_v1, %v7210_v44  ;;  %vm1963_vm11 = vcmp.lt.s32.totalorder %v1942_v48, 3 }
 0x171   :  { %vm1964_vm12 = vcmp.lt.s32.totalorder %v1942_v48, 4  ;;  %v1969_v22 = vsel %vm1961_vm9, %v1948_v35, %v1951_v47  ;;  %v2093_v16 = vadd.s32 %v2092_v52, %v2088_v42  ;;  %v1973_v29 = vsel %vm1961_vm9, %v1951_v47, %v1954_v34  ;;  %v5863_v48 = vpop.f32.mrf.mxu0 }
 0x172   :  { %v1966_v31 = vsel %vm1964_vm12, %v1954_v34, 2102212464  ;;  %v1970_v2 = vsel %vm1964_vm12, %v1957_v57, 920167782  ;;  %v1965_v28 = vsel %vm1961_vm9, %v1945_v40, %v1948_v35  ;;  %v1974_v17 = vsel %vm1964_vm12, %v1960_v13, 1326507024 }
 0x173   :  { %v1971_v43 = vsel %vm1963_vm11, %v1954_v34, %v1970_v2  ;;  %v2251_v45 = vadd.s32 1, %v5339_v10  ;;  %v2094_v3 = vadd.s32 536870912, %v2093_v16  ;;  %v1967_v15 = vsel %vm1963_vm11, %v1951_v47, %v1966_v31 }
 0x174   :  { %v1972_v37 = vsel %vm1962_vm10, %v1969_v22, %v1971_v43  ;;  %v1975_v39 = vsel %vm1963_vm11, %v1957_v57, %v1974_v17  ;;  %v10001_v52 = vand.u32 2147483647, %v7170_v7  ;;  %v1968_v10 = vsel %vm1962_vm10, %v1965_v28, %v1967_v15 }
 0x175   :  { %v1976_v59 = vsel %vm1962_vm10, %v1973_v29, %v1975_v39  ;;  %v7231_v44 = vmul.u32.u64.low %v7178_v61, %v1972_v37  ;;  %v7232_v5 = vmul.u32.u64.high %v7178_v61, %v1972_v37, %v7231_v44  ;;  %v2095_v42 = vshrl.u32 %v2094_v3, 30 }
 0x176   :  { %v7237_v35 = vmul.u32.u64.low %v7178_v61, %v1976_v59  ;;  %v7238_v54 = vmul.u32.u64.high %v7178_v61, %v1976_v59, %v7237_v35  ;;  %vm2252_vm13 = vcmp.gt.s32.totalorder %v2251_v45, 0  ;;  %v7244_v1 = vand.u32 8388607, %v10001_v52 }
 0x177   :  { %v2253_v47 = vsel %vm2252_vm13, %v2251_v45, 0  ;;  %v2096_v43 = vshll.u32 %v2095_v42, 30  ;;  %v1987_v30 = vadd.s32 1, %v7232_v5  ;;  %v2140_v40 = vand.u32 2139095040, %v7180_v46 }
 0x178   :  { %v2255_v17 = vand.u32 31, %v2253_v47  ;;  %v1984_v3 = vmul.u32 %v7178_v61, %v1968_v10  ;;  %vm1986_vm14 = vc.u32 %v7238_v54, %v7231_v44  ;;  %v7258_v2 = vadd.f32 %v5863_v48, %v7072_v11 }
 0x179   :  { %v7247_v34 = vsub.s32 %v2093_v16, %v2096_v43  ;;  %v1988_v45 = vsel %vm1986_vm14, %v1987_v30, %v7232_v5  ;;  %v2141_v16 = vshrl.u32 %v2140_v40, 23  ;;  %v10117_v15 = vmov 2475754826  }
 0x17a   :  { %v2256_v28 = vsub.s32 32, %v2255_v17  ;;  %v1989_v13 = vadd.s32 %v1988_v45, %v1984_v3  ;;  %v2089_v59 = vadd.s32 %v7209_v50, %v7206_v24  ;;  %v2254_v5 = vshrl.u32 %v2253_v47, 5 }
 0x17b   :  { %v2099_v57 = vsub.s32 0, %v7247_v34  ;;  %v2264_v10 = vshll.u32 %v10113_v62, %v2255_v17  ;;  %v2119_v30 = vsub.s32 4, %v2095_v42  ;;  %v2258_v11 = vshll.u32 %v10002_v32, %v2255_v17 }
 0x17c   :  { %v1990_v29 = vadd.s32 536870912, %v1989_v13  ;;  %v2259_v37 = vshrl.u32 %v10117_v15, %v2256_v28  ;;  %v2265_v39 = vshrl.u32 %v10114_v53, %v2256_v28  ;;  %v2262_v35 = vshrl.u32 %v10113_v62, %v2256_v28 }
 0x17d   :  { %v5332_v61 = vmin.u32 %v2099_v57, %v7247_v34  ;;  %v2268_v40 = vshrl.u32 %v10115_v0, %v2256_v28  ;;  %v2261_v48 = vshll.u32 %v10117_v15, %v2255_v17  ;;  %v5335_v57 = vadd.s32 4294967169, %v2141_v16 }
 0x17e   :  { %v7269_v3 = vshrl.u32 %v1990_v29, 30  ;;  %v2266_v45 = vor.u32 %v2265_v39, %v2264_v10  ;;  %v10118_v52 = vand.u32 2147483647, %v7158_v23  ;;  %v2260_v47 = vor.u32 %v2259_v37, %v2258_v11 }
 0x17f   :  { %v2101_v43 = vclz %v5332_v61  ;;  %v2267_v61 = vshll.u32 %v10114_v53, %v2255_v17  ;;  %v2271_v31 = vshrl.u32 %v10116_v14, %v2256_v28  ;;  %v2263_v29 = vor.u32 %v2262_v35, %v2261_v48 }
 0x180   :  { %vm7274_vm0 = vcmp.le.f32.partialorder %v10118_v52, 0.7853982  ;;  %v1992_v22 = vshll.u32 %v7269_v3, 30  ;;  %v2270_v32 = vshll.u32 %v10115_v0, %v2255_v17  ;;  %vm2276_vm2 = vcmp.lt.s32.totalorder %v2254_v5, 4 }
 0x181   :  { %v5333_v50 = vadd.s32 4294967294, %v2101_v43  ;;  %v2120_v16 = vsel %vm2035_vm15, %v2119_v30, %v2095_v42  ;;  %v2269_v52 = vor.u32 %v2268_v40, %v2267_v61  ;;  %v2278_v39 = vsel %vm2276_vm2, %v2266_v45, 2102212464 }
 0x182   :  { %v7285_v43 = vsub.s32 %v1989_v13, %v1992_v22  ;;  %v10121_v37 = vmov 683565275   ;;  %v2272_v36 = vor.u32 %v2271_v31, %v2270_v32  ;;  %vm2273_vm4 = vcmp.lt.s32.totalorder %v2254_v5, 1 }
 0x183   :  { %vm5334_vm3 = vcmp.lt.s32.totalorder %v5333_v50, 0  ;;  %v2257_v11 = vshrl.u32 %v10121_v37, %v2256_v28  ;;  %vm2275_vm5 = vcmp.lt.s32.totalorder %v2254_v5, 3  ;;  %vm1931_vm6 = vcmp.lt.s32.totalorder %v7163_v12, 0 }
 0x184   :  { %v2104_v10 = vsel %vm5334_vm3, 0, %v5333_v50  ;;  %v1995_v35 = vsub.s32 0, %v7285_v43  ;;  %v2279_v42 = vsel %vm2275_vm5, %v2263_v29, %v2278_v39  ;;  %v2281_v13 = vsel %vm2273_vm4, %v2260_v47, %v2263_v29 }
 0x185   :  { %v2105_v55 = vsub.s32 32, %v2104_v10  ;;  %v2109_v21 = vsub.s32 4294967266, %v2104_v10  ;;  %v2106_v17 = vshll.u32 %v7247_v34, %v2104_v10  ;;  %v2277_v48 = vsel %vm2273_vm4, %v2257_v11, %v2260_v47 }
 0x186   :  { %v2282_v22 = vsel %vm2276_vm2, %v2269_v52, 920167782  ;;  %v5328_v32 = vmin.u32 %v1995_v35, %v7285_v43  ;;  %v2285_v31 = vsel %vm2273_vm4, %v2263_v29, %v2266_v45  ;;  %v2286_v50 = vsel %vm2276_vm2, %v2272_v36, 1326507024 }
 0x187   :  { %v2107_v30 = vshrl.u32 %v2089_v59, %v2105_v55  ;;  %v2110_v40 = vadd.s32 127, %v2109_v21  ;;  %v2283_v28 = vsel %vm2275_vm5, %v2266_v45, %v2282_v22  ;;  %vm2274_vm7 = vcmp.lt.s32.totalorder %v2254_v5, 2 }
 0x188   :  { %v2287_v10 = vsel %vm2275_vm5, %v2269_v52, %v2286_v50  ;;  %v2122_v21 = vsel %vm7274_vm0, 0, %v2120_v16  ;;  %v10122_v55 = vand.u32 2147483647, %v7163_v12  ;;  %v1997_v47 = vclz %v5328_v32  ;;  %v5913_v52 = vpop.f32.mrf.mxu1 }
 0x189   :  { %v2108_v34 = vor.u32 %v2107_v30, %v2106_v17  ;;  %v2111_v61 = vshll.u32 %v2110_v40, 23  ;;  %v2284_v39 = vsel %vm2274_vm7, %v2281_v13, %v2283_v28  ;;  %v10125_v45 = vor.u32 8388608, %v7244_v1 }
 0x18a   :  { %vm7301_vm8 = vcmp.le.f32.partialorder %v10122_v55, 0.7853982  ;;  %v2015_v11 = vsub.s32 4, %v7269_v3  ;;  %v2280_v17 = vsel %vm2274_vm7, %v2277_v48, %v2279_v42  ;;  %v2288_v5 = vsel %vm2274_vm7, %v2285_v31, %v2287_v10 }
 0x18b   :  { %v2289_v29 = vshll.u32 %v10125_v45, 8  ;;  %v2112_v36 = vor.u32 4788187, %v2111_v61  ;;  %v2115_v35 = vcvt.s32.f32 %v2108_v34  ;;  %v5329_v30 = vadd.s32 4294967294, %v1997_v47 }
 0x18c   :  { %v2147_v13 = vadd.s32 1, %v5335_v57  ;;  %v1985_v1 = vadd.s32 %v7231_v44, %v7238_v54  ;;  %v10126_v32 = vand.u32 2147483647, %v7180_v46  ;;  %v7320_v42 = vadd.f32 %v5913_v52, %v7258_v2 }
 0x18d   :  { %v7308_v16 = vmul.u32.u64.low %v2289_v29, %v2288_v5  ;;  %v7309_v40 = vmul.u32.u64.high %v2289_v29, %v2288_v5, %v7308_v16  ;;  %v2113_v22 = vand.u32 2147483647, %v2112_v36  ;;  %vm5330_vm9 = vcmp.lt.s32.totalorder %v5329_v30, 0 }
 0x18e   :  { %v7311_v50 = vmul.u32.u64.low %v2289_v29, %v2284_v39  ;;  %v7312_v55 = vmul.u32.u64.high %v2289_v29, %v2284_v39, %v7311_v50  ;;  %v2144_v48 = vand.u32 8388607, %v10126_v32  ;;  %v2126_v31 = vadd.s32 3, %v2122_v21 }
 0x18f   :  { %v2116_v28 = vmul.f32 %v2115_v35, %v2113_v22  ;;  %v2000_v34 = vsel %vm5330_vm9, 0, %v5329_v30  ;;  %vm2148_vm10 = vcmp.gt.s32.totalorder %v2147_v13, 0  ;;  %v2016_v57 = vsel %vm1931_vm6, %v2015_v11, %v7269_v3 }
 0x190   :  { %v2001_v61 = vsub.s32 32, %v2000_v34  ;;  %v2005_v10 = vsub.s32 4294967266, %v2000_v34  ;;  %v2296_v47 = vmul.u32 %v2289_v29, %v2280_v17  ;;  %vm2298_vm11 = vc.u32 %v7309_v40, %v7311_v50 }
 0x191   :  { %v2117_v39 = vxor.u32 2147483648, %v2116_v28  ;;  %v2299_v44 = vadd.s32 1, %v7312_v55  ;;  %v2149_v54 = vsel %vm2148_vm10, %v2147_v13, 0  ;;  %v2002_v2 = vshll.u32 %v7285_v43, %v2000_v34 }
 0x192   :  { %v2003_v45 = vshrl.u32 %v1985_v1, %v2001_v61  ;;  %v2006_v21 = vadd.s32 127, %v2005_v10  ;;  %v2151_v36 = vand.u32 31, %v2149_v54  ;;  %v2018_v52 = vsel %vm7301_vm8, 0, %v2016_v57 }
 0x193   :  { %v2118_v5 = vsel %vm2035_vm15, %v2117_v39, %v2116_v28  ;;  %v2300_v3 = vsel %vm2298_vm11, %v2299_v44, %v7312_v55  ;;  %v2145_v29 = vor.u32 8388608, %v2144_v48  ;;  %v7337_v16 = vand.u32 3, %v2126_v31 }
 0x194   :  { %v2121_v11 = vsel %vm7274_vm0, %v7158_v23, %v2118_v5  ;;  %v2004_v17 = vor.u32 %v2003_v45, %v2002_v2  ;;  %v2007_v35 = vshll.u32 %v2006_v21, 23  ;;  %v2301_v30 = vadd.s32 %v2300_v3, %v2296_v47 }
 0x195   :  { %6087 = vcosq.f32 %v2121_v11  ;;  %v2152_v43 = vsub.s32 32, %v2151_v36  ;;  %v7339_v32 = vadd.s32 3, %v2018_v52  ;;  %v7341_v28 = vshll.u32 %v2145_v29, 8 }
 0x196   :  { %6089 = vsinq.f32 %v2121_v11  ;;  %v2008_v22 = vor.u32 4788187, %v2007_v35  ;;  %v2302_v13 = vadd.s32 536870912, %v2301_v30  ;;  %v2011_v1 = vcvt.s32.f32 %v2004_v17 }
 0x197   :  { %v2452_v55 = vand.u32 2139095040, %v7320_v42  ;;  %v2155_v34 = vshrl.u32 %v10117_v15, %v2152_v43  ;;  %v2158_v61 = vshrl.u32 %v10113_v62, %v2152_v43  ;;  %v7348_v10 = vshrl.u32 %v2149_v54, 5 }
 0x198   :  { %v2009_v48 = vand.u32 2147483647, %v2008_v22  ;;  %v7344_v24 = vshrl.u32 %v2302_v13, 30  ;;  %v2161_v31 = vshrl.u32 %v10114_v53, %v2152_v43  ;;  %v2163_v57 = vshll.u32 %v10114_v53, %v2151_v36 }
 0x199   :  { %v2164_v47 = vshrl.u32 %v10115_v0, %v2152_v43  ;;  %v2154_v2 = vshll.u32 %v10121_v37, %v2151_v36  ;;  %v2157_v45 = vshll.u32 %v10117_v15, %v2151_v36  ;;  %v2160_v21 = vshll.u32 %v10113_v62, %v2151_v36 }
 0x19a   :  { %v2012_v39 = vmul.f32 %v2011_v1, %v2009_v48  ;;  %v2304_v44 = vshll.u32 %v7344_v24, 30  ;;  %v2166_v52 = vshll.u32 %v10115_v0, %v2151_v36  ;;  %v2167_v54 = vshrl.u32 %v10116_v14, %v2152_v43 }
 0x19b   :  { %v2165_v5 = vor.u32 %v2164_v47, %v2163_v57  ;;  %vm2132_vm12 = vcmp.eq.s32.totalorder %v7337_v16, 2  ;;  %v2156_v11 = vor.u32 %v2155_v34, %v2154_v2  ;;  %v2159_v17 = vor.u32 %v2158_v61, %v2157_v45 }
 0x19c   :  { %v2013_v3 = vxor.u32 2147483648, %v2012_v39  ;;  %v7360_v29 = vsub.s32 %v2301_v30, %v2304_v44  ;;  %vm2129_vm13 = vcmp.eq.s32.totalorder %v7337_v16, 0  ;;  %v2297_v35 = vadd.s32 %v7311_v50, %v7309_v40 }
 0x19d   :  { %v2162_v22 = vor.u32 %v2161_v31, %v2160_v21  ;;  %v2168_v13 = vor.u32 %v2167_v54, %v2166_v52  ;;  %v2449_v1 = vand.u32 2147483647, %v7320_v42  ;;  %vm2128_vm14 = vcmp.lt.s32.totalorder %v7337_v16, 2 }
 0x19e   :  { %vm5257_vm15 = vcmask 515072   ;;  %v2014_v36 = vsel %vm1931_vm6, %v2013_v3, %v2012_v39  ;;  %vm2243_vm0 = vcmp.lt.s32.totalorder %v7170_v7, 0  ;;  %v2307_v30 = vsub.s32 0, %v7360_v29  ;;  %v1763_v39 = vpop.f32.mrf.mxu1 }
 0x19f   :  { %vm2172_vm2 = vcmp.lt.s32.totalorder %v7348_v10, 4  ;;  %v2453_v48 = vshrl.u32 %v2452_v55, 23  ;;  %vm2125_vm3 = vweird.f32 %v7158_v23  ;;  %v2017_v40 = vsel %vm7301_vm8, %v7163_v12, %v2014_v36  ;;  %v10130_v23 = vld [vmem:[#allocation3_spill] sm:$0xff] }
 0x1a0   :  { %v2153_v50 = vshrl.u32 %v10121_v37, %v2152_v43  ;;  %vm2169_vm4 = vcmp.lt.s32.totalorder %v7348_v10, 1  ;;  %v2178_v34 = vsel %vm2172_vm2, %v2165_v5, 920167782  ;;  %6091 = vcosq.f32 %v2017_v40 }
 0x1a1   :  { %v5340_v61 = vmin.u32 %v2307_v30, %v7360_v29  ;;  %vm2171_vm5 = vcmp.lt.s32.totalorder %v7348_v10, 3  ;;  %v2177_v55 = vsel %vm2169_vm4, %v2156_v11, %v2159_v17  ;;  %6093 = vsinq.f32 %v2017_v40 }
 0x1a2   :  { %v2179_v59 = vsel %vm2171_vm5, %v2162_v22, %v2178_v34  ;;  %v2181_v43 = vsel %vm2169_vm4, %v2159_v17, %v2162_v22  ;;  %v2182_v31 = vsel %vm2172_vm2, %v2168_v13, 1326507024  ;;  %v6088_v57 = vpop.eup %6087  ;;  %v10127_v47 = vand.u32 2147483647, %v7170_v7 }
 0x1a3   :  { %v2309_v44 = vclz %v5340_v61  ;;  %v2327_v2 = vsub.s32 4, %v7344_v24  ;;  %vm2170_vm7 = vcmp.lt.s32.totalorder %v7348_v10, 2  ;;  %v2174_v45 = vsel %vm2172_vm2, %v2162_v22, 2102212464  ;;  %v6090_v21 = vpop.eup %6089 }
 0x1a4   :  { %vm7392_vm6 = vcmp.le.f32.partialorder %v10127_v47, 0.7853982  ;;  %v2133_v52 = vxor.u32 2147483648, %v6088_v57  ;;  %v2173_v54 = vsel %vm2169_vm4, %v2153_v50, %v2156_v11  ;;  %v2180_v3 = vsel %vm2170_vm7, %v2177_v55, %v2179_v59 }
 0x1a5   :  { %v2183_v13 = vsel %vm2171_vm5, %v2165_v5, %v2182_v31  ;;  %v2130_v36 = vxor.u32 2147483648, %v6090_v21  ;;  %v5341_v30 = vadd.s32 4294967294, %v2309_v44  ;;  %v5347_v34 = vadd.s32 4294967169, %v2453_v48 }
 0x1a6   :  { %v2184_v40 = vsel %vm2170_vm7, %v2181_v43, %v2183_v13  ;;  %v2134_v22 = vsel %vm2132_vm12, %v2133_v52, %v6090_v21  ;;  %v2175_v61 = vsel %vm2171_vm5, %v2159_v17, %v2174_v45  ;;  %v2328_v17 = vsel %vm2243_vm0, %v2327_v2, %v7344_v24 }
 0x1a7   :  { %v7413_v11 = vmul.u32.u64.low %v7341_v28, %v2184_v40  ;;  %v7414_v50 = vmul.u32.u64.high %v7341_v28, %v2184_v40, %v7413_v11  ;;  %v2131_v55 = vsel %vm2129_vm13, %v6088_v57, %v2130_v36  ;;  %vm5342_vm8 = vcmp.lt.s32.totalorder %v5341_v30, 0 }
 0x1a8   :  { %v7419_v5 = vmul.u32.u64.low %v7341_v28, %v2180_v3  ;;  %v7420_v59 = vmul.u32.u64.high %v7341_v28, %v2180_v3, %v7419_v5  ;;  %v2135_v48 = vsel %vm2128_vm14, %v2131_v55, %v2134_v22  ;;  %v2312_v43 = vsel %vm5342_vm8, 0, %v5341_v30 }
 0x1a9   :  { %v2459_v31 = vadd.s32 1, %v5347_v34  ;;  %v2136_v47 = vsel %vm2125_vm3, nan, %v2135_v48  ;;  %v2313_v44 = vsub.s32 32, %v2312_v43  ;;  %v2317_v57 = vsub.s32 4294967266, %v2312_v43 }
 0x1aa   :  { %v2176_v45 = vsel %vm2170_vm7, %v2173_v54, %v2175_v61  ;;  %5259 = vst.msk [vmem:[%s9909_s2 + $0x8] sm:$0xff] %vm5257_vm15, %v2136_v47  ;;  %v2023_v16 = vand.u32 3, %v7339_v32  ;;  %v2314_v21 = vshll.u32 %v7360_v29, %v2312_v43  ;;  %vm2194_vm9 = vc.u32 %v7414_v50, %v7419_v5 }
 0x1ab   :  { %vm2460_vm10 = vcmp.gt.s32.totalorder %v2459_v31, 0  ;;  %5291 = vst.msk [vmem:[%s9909_s2 + $0x8] sm:$0xff] %vm49_vm1, %v10130_v23  ;;  %v2315_v24 = vshrl.u32 %v2297_v35, %v2313_v44  ;;  %v2318_v10 = vadd.s32 127, %v2317_v57  ;;  %v2195_v2 = vadd.s32 1, %v7420_v59  ;;  %v1505_v57 = vpop.f32.mrf.mxu0 }
 0x1ac   :  { %v2461_v52 = vsel %vm2460_vm10, %v2459_v31, 0  ;;  %v2330_v32 = vsel %vm7392_vm6, 0, %v2328_v17  ;;  %v2192_v29 = vmul.u32 %v7341_v28, %v2176_v45  ;;  %v2456_v54 = vand.u32 8388607, %v2449_v1 }
 0x1ad   :  { %v2463_v3 = vand.u32 31, %v2461_v52  ;;  %vm2021_vm11 = vweird.f32 %v7163_v12  ;;  %v2316_v13 = vor.u32 %v2315_v24, %v2314_v21  ;;  %v2319_v36 = vshll.u32 %v2318_v10, 23  ;;  %v6092_v35 = vpop.eup %6091 }
 0x1ae   :  { %v2196_v30 = vsel %vm2194_vm9, %v2195_v2, %v7420_v59  ;;  %vm2024_vm12 = vcmp.lt.s32.totalorder %v2023_v16, 2  ;;  %vm2025_vm13 = vcmp.eq.s32.totalorder %v2023_v16, 0  ;;  %v6094_v22 = vpop.eup %6093  ;;  %vm2028_vm14 = vcmp.eq.s32.totalorder %v2023_v16, 2 }
 0x1af   :  { %v2197_v40 = vadd.s32 %v2196_v30, %v2192_v29  ;;  %v2464_v34 = vsub.s32 32, %v2463_v3  ;;  %v2029_v61 = vxor.u32 2147483648, %v6092_v35  ;;  %v2320_v11 = vor.u32 4788187, %v2319_v36 }
 0x1b0   :  { %v7453_v28 = vadd.s32 3, %v2330_v32  ;;  %v2026_v55 = vxor.u32 2147483648, %v6094_v22  ;;  %v2457_v43 = vor.u32 8388608, %v2456_v54  ;;  %v7455_v17 = vshrl.u32 %v2461_v52, 5 }
 0x1b1   :  { %v2198_v48 = vadd.s32 536870912, %v2197_v40  ;;  %v2030_v31 = vsel %vm2028_vm14, %v2029_v61, %v6094_v22  ;;  %v2321_v47 = vand.u32 2147483647, %v2320_v11  ;;  %v2323_v44 = vcvt.s32.f32 %v2316_v13  ;;  %v5866_v22 = vpop.f32.mrf.mxu0  ;;  %v10131_v61 = vld [vmem:[#allocation2_spill] sm:$0xff] }
 0x1b2   :  { %v2466_v59 = vshll.u32 %v10121_v37, %v2463_v3  ;;  %v2027_v45 = vsel %vm2025_vm13, %v6092_v35, %v2026_v55  ;;  %v2467_v23 = vshrl.u32 %v10117_v15, %v2464_v34  ;;  %v2473_v24 = vshrl.u32 %v10114_v53, %v2464_v34 }
 0x1b3   :  { %v2199_v21 = vshrl.u32 %v2198_v48, 30  ;;  %v2031_v10 = vsel %vm2024_vm12, %v2027_v45, %v2030_v31  ;;  %v2324_v2 = vmul.f32 %v2323_v44, %v2321_v47  ;;  %v2469_v32 = vshll.u32 %v10117_v15, %v2463_v3 }
 0x1b4   :  { %v2470_v52 = vshrl.u32 %v10113_v62, %v2464_v34  ;;  %v2032_v29 = vsel %vm2021_vm11, nan, %v2031_v10  ;;  %v2472_v13 = vshll.u32 %v10113_v62, %v2463_v3  ;;  %v2476_v36 = vshrl.u32 %v10115_v0, %v2464_v34 }
 0x1b5   :  { %v2200_v54 = vshll.u32 %v2199_v21, 30  ;;  %5258 = vst.msk [vmem:[%s9909_s2] sm:$0xff] %vm5257_vm15, %v2032_v29  ;;  %v2325_v16 = vxor.u32 2147483648, %v2324_v2  ;;  %vm2139_vm2 = vcmp.lt.s32.totalorder %v7180_v46, 0  ;;  %v2475_v30 = vshll.u32 %v10114_v53, %v2463_v3 }
 0x1b6   :  { %v2478_v35 = vshll.u32 %v10115_v0, %v2463_v3  ;;  %v2479_v12 = vshrl.u32 %v10116_v14, %v2464_v34  ;;  %5290 = vst.msk [vmem:[%s9909_s2] sm:$0xff] %vm49_vm1, %v10131_v61  ;;  %v2468_v55 = vor.u32 %v2467_v23, %v2466_v59  ;;  %v2474_v48 = vor.u32 %v2473_v24, %v2472_v13 }
 0x1b7   :  { %v7481_v11 = vsub.s32 %v2197_v40, %v2200_v54  ;;  %v7483_v31 = vshll.u32 %v2457_v43, 8  ;;  %v2326_v47 = vsel %vm2243_vm0, %v2325_v16, %v2324_v2  ;;  %v2471_v44 = vor.u32 %v2470_v52, %v2469_v32 }
 0x1b8   :  { %v2477_v3 = vor.u32 %v2476_v36, %v2475_v30  ;;  %v2480_v45 = vor.u32 %v2479_v12, %v2478_v35  ;;  %v2329_v10 = vsel %vm7392_vm6, %v7170_v7, %v2326_v47  ;;  %v1506_v61 = vadd.f32 %v1505_v57, %v7075_v63 }
 0x1b9   :  { %v2203_v29 = vsub.s32 0, %v7481_v11  ;;  %v1524_v40 = vadd.f32 %v5866_v22, %v7078_v38  ;;  %6095 = vcosq.f32 %v2329_v10  ;;  %v2223_v59 = vsub.s32 4, %v2199_v21  ;;  %v5916_v22 = vpop.f32.mrf.mxu1 }
 0x1ba   :  { %v2465_v43 = vshrl.u32 %v10121_v37, %v2464_v34  ;;  %vm2484_vm3 = vcmp.lt.s32.totalorder %v7455_v17, 4  ;;  %6097 = vsinq.f32 %v2329_v10  ;;  %vm2481_vm0 = vcmp.lt.s32.totalorder %v7455_v17, 1 }
 0x1bb   :  { %v5336_v23 = vmin.u32 %v2203_v29, %v7481_v11  ;;  %v2486_v24 = vsel %vm2484_vm3, %v2474_v48, 2102212464  ;;  %v2489_v2 = vsel %vm2481_vm0, %v2468_v55, %v2471_v44  ;;  %v2490_v32 = vsel %vm2484_vm3, %v2477_v3, 920167782 }
 0x1bc   :  { %v2493_v52 = vsel %vm2481_vm0, %v2471_v44, %v2474_v48  ;;  %v2494_v54 = vsel %vm2484_vm3, %v2480_v45, 1326507024  ;;  %vm2482_vm4 = vcmp.lt.s32.totalorder %v7455_v17, 2  ;;  %vm2483_vm5 = vcmp.lt.s32.totalorder %v7455_v17, 3 }
 0x1bd   :  { %v2205_v63 = vclz %v5336_v23  ;;  %v2485_v38 = vsel %vm2481_vm0, %v2465_v43, %v2468_v55  ;;  %v2487_v34 = vsel %vm2483_vm5, %v2471_v44, %v2486_v24  ;;  %v2491_v57 = vsel %vm2483_vm5, %v2474_v48, %v2490_v32 }
 0x1be   :  { %v2495_v13 = vsel %vm2483_vm5, %v2477_v3, %v2494_v54  ;;  %v7499_v36 = vadd.f32 %v1763_v39, %v1506_v61  ;;  %v2224_v30 = vsel %vm2139_vm2, %v2223_v59, %v2199_v21  ;;  %v2492_v35 = vsel %vm2482_vm4, %v2489_v2, %v2491_v57 }
 0x1bf   :  { %v5337_v16 = vadd.s32 4294967294, %v2205_v63  ;;  %v2496_v12 = vsel %vm2482_vm4, %v2493_v52, %v2495_v13  ;;  %v7508_v10 = vmul.u32.u64.low %v7483_v31, %v2492_v35  ;;  %v7509_v17 = vmul.u32.u64.high %v7483_v31, %v2492_v35, %v7508_v10 }
 0x1c0   :  { %v7504_v47 = vmul.u32.u64.low %v7483_v31, %v2496_v12  ;;  %v7505_v45 = vmul.u32.u64.high %v7483_v31, %v2496_v12, %v7504_v47  ;;  %v2488_v55 = vsel %vm2482_vm4, %v2485_v38, %v2487_v34  ;;  %v2348_v48 = vand.u32 2139095040, %v7499_v36 }
 0x1c1   :  { %vm5338_vm6 = vcmp.lt.s32.totalorder %v5337_v16, 0  ;;  %v2335_v44 = vand.u32 3, %v7453_v28  ;;  %v10132_v3 = vand.u32 2147483647, %v7180_v46  ;;  %v7519_v61 = vadd.f32 %v5916_v22, %v1524_v40 }
 0x1c2   :  { %v2208_v29 = vsel %vm5338_vm6, 0, %v5337_v16  ;;  %v2193_v59 = vadd.s32 %v7419_v5, %v7414_v50  ;;  %v2504_v39 = vmul.u32 %v7483_v31, %v2488_v55  ;;  %vm2506_vm8 = vc.u32 %v7505_v45, %v7508_v10 }
 0x1c3   :  { %vm7515_vm7 = vcmp.le.f32.partialorder %v10132_v3, 0.7853982  ;;  %v2209_v43 = vsub.s32 32, %v2208_v29  ;;  %v2213_v23 = vsub.s32 4294967266, %v2208_v29  ;;  %v2507_v28 = vadd.s32 1, %v7509_v17 }
 0x1c4   :  { %v2226_v24 = vsel %vm7515_vm7, 0, %v2224_v30  ;;  %v2349_v2 = vshrl.u32 %v2348_v48, 23  ;;  %v2210_v32 = vshll.u32 %v7481_v11, %v2208_v29  ;;  %v2345_v54 = vand.u32 2147483647, %v7499_v36 }
 0x1c5   :  { %v2211_v52 = vshrl.u32 %v2193_v59, %v2209_v43  ;;  %v2214_v40 = vadd.s32 127, %v2213_v23  ;;  %vm2336_vm9 = vcmp.lt.s32.totalorder %v2335_v44, 2  ;;  %v2508_v50 = vsel %vm2506_vm8, %v2507_v28, %v7509_v17 }
 0x1c6   :  { %v5343_v5 = vadd.s32 4294967169, %v2349_v2  ;;  %v2660_v63 = vand.u32 2139095040, %v7519_v61  ;;  %v6096_v38 = vpop.eup %6095  ;;  %vm2337_vm10 = vcmp.eq.s32.totalorder %v2335_v44, 0  ;;  %v2509_v57 = vadd.s32 %v2508_v50, %v2504_v39 }
 0x1c7   :  { %v2212_v31 = vor.u32 %v2211_v52, %v2210_v32  ;;  %v2215_v34 = vshll.u32 %v2214_v40, 23  ;;  %v6098_v13 = vpop.eup %6097  ;;  %vm2340_vm11 = vcmp.eq.s32.totalorder %v2335_v44, 2  ;;  %v2341_v16 = vxor.u32 2147483648, %v6096_v38  ;;  %v10135_v44 = vld [vmem:[#allocation5_spill] sm:$0xff] }
 0x1c8   :  { %v2230_v30 = vadd.s32 3, %v2226_v24  ;;  %v2355_v11 = vadd.s32 1, %v5343_v5  ;;  %v2338_v35 = vxor.u32 2147483648, %v6098_v13  ;;  %v2510_v22 = vadd.s32 536870912, %v2509_v57 }
 0x1c9   :  { %v2216_v12 = vor.u32 4788187, %v2215_v34  ;;  %v2352_v47 = vand.u32 8388607, %v2345_v54  ;;  %v2342_v17 = vsel %vm2340_vm11, %v2341_v16, %v6098_v13  ;;  %v2219_v55 = vcvt.s32.f32 %v2212_v31 }
 0x1ca   :  { %vm2356_vm12 = vcmp.gt.s32.totalorder %v2355_v11, 0  ;;  %v2661_v48 = vshrl.u32 %v2660_v63, 23  ;;  %v2339_v3 = vsel %vm2337_vm10, %v6096_v38, %v2338_v35  ;;  %v7535_v59 = vshrl.u32 %v2510_v22, 30 }
 0x1cb   :  { %v2217_v29 = vand.u32 2147483647, %v2216_v12  ;;  %v2357_v43 = vsel %vm2356_vm12, %v2355_v11, 0  ;;  %vm2333_vm13 = vweird.f32 %v7170_v7  ;;  %v2343_v23 = vsel %vm2336_vm9, %v2339_v3, %v2342_v17 }
 0x1cc   :  { %v2359_v24 = vand.u32 31, %v2357_v43  ;;  %v2344_v39 = vsel %vm2333_vm13, nan, %v2343_v23  ;;  %v7539_v2 = vand.u32 3, %v2230_v30  ;;  %v2512_v32 = vshll.u32 %v7535_v59, 30 }
 0x1cd   :  { %v2220_v28 = vmul.f32 %v2219_v55, %v2217_v29  ;;  %5261 = vst.msk [vmem:[%s9909_s2 + $0x18] sm:$0xff] %vm5257_vm15, %v2344_v39  ;;  %v7547_v52 = vadd.s32 %v7508_v10, %v7505_v45  ;;  %v2353_v40 = vor.u32 8388608, %v2352_v47  ;;  %v2657_v7 = vand.u32 2147483647, %v7519_v61 }
 0x1ce   :  { %v2360_v50 = vsub.s32 32, %v2359_v24  ;;  %5293 = vst.msk [vmem:[%s9909_s2 + $0x18] sm:$0xff] %vm49_vm1, %v10135_v44  ;;  %v7555_v63 = vsub.s32 %v2509_v57, %v2512_v32  ;;  %v7557_v38 = vshrl.u32 %v2357_v43, 5  ;;  %v5355_v31 = vadd.s32 4294967169, %v2661_v48 }
 0x1cf   :  { %v2221_v5 = vxor.u32 2147483648, %v2220_v28  ;;  %v2362_v34 = vshll.u32 %v10121_v37, %v2359_v24  ;;  %v2365_v10 = vshll.u32 %v10117_v15, %v2359_v24  ;;  %vm2451_vm14 = vcmp.lt.s32.totalorder %v7320_v42, 0 }
 0x1d0   :  { %v2363_v45 = vshrl.u32 %v10117_v15, %v2360_v50  ;;  %v2366_v13 = vshrl.u32 %v10113_v62, %v2360_v50  ;;  %v2515_v30 = vsub.s32 0, %v7555_v63  ;;  %v2368_v57 = vshll.u32 %v10113_v62, %v2359_v24 }
 0x1d1   :  { %v2222_v16 = vsel %vm2139_vm2, %v2221_v5, %v2220_v28  ;;  %v2369_v11 = vshrl.u32 %v10114_v53, %v2360_v50  ;;  %v2371_v22 = vshll.u32 %v10114_v53, %v2359_v24  ;;  %v2372_v47 = vshrl.u32 %v10115_v0, %v2360_v50 }
 0x1d2   :  { %v2225_v35 = vsel %vm7515_vm7, %v7180_v46, %v2222_v16  ;;  %v2364_v12 = vor.u32 %v2363_v45, %v2362_v34  ;;  %v5348_v17 = vmin.u32 %v2515_v30, %v7555_v63  ;;  %v2367_v55 = vor.u32 %v2366_v13, %v2365_v10 }
 0x1d3   :  { %6099 = vcosq.f32 %v2225_v35  ;;  %v2370_v48 = vor.u32 %v2369_v11, %v2368_v57  ;;  %v2373_v3 = vor.u32 %v2372_v47, %v2371_v22  ;;  %v2374_v29 = vshll.u32 %v10115_v0, %v2359_v24 }
 0x1d4   :  { %6101 = vsinq.f32 %v2225_v35  ;;  %v2375_v43 = vshrl.u32 %v10116_v14, %v2360_v50  ;;  %v2517_v23 = vclz %v5348_v17  ;;  %v7577_v39 = vshll.u32 %v2353_v40, 8 }
 0x1d5   :  { %v7581_v21 = vand.u32 8388607, %v2657_v7  ;;  %v2667_v28 = vadd.s32 1, %v5355_v31  ;;  %vm7585_vm2 = vcmp.le.f32.partialorder %v2449_v1, 0.7853982  ;;  %v2535_v44 = vsub.s32 4, %v7535_v59 }
 0x1d6   :  { %v2361_v24 = vshrl.u32 %v10121_v37, %v2360_v50  ;;  %v2376_v5 = vor.u32 %v2375_v43, %v2374_v29  ;;  %vm2377_vm3 = vcmp.lt.s32.totalorder %v7557_v38, 1  ;;  %v5349_v40 = vadd.s32 4294967294, %v2517_v23 }
 0x1d7   :  { %vm2379_vm0 = vcmp.lt.s32.totalorder %v7557_v38, 3  ;;  %vm2380_vm4 = vcmp.lt.s32.totalorder %v7557_v38, 4  ;;  %v2385_v31 = vsel %vm2377_vm3, %v2364_v12, %v2367_v55  ;;  %v2389_v45 = vsel %vm2377_vm3, %v2367_v55, %v2370_v48 }
 0x1d8   :  { %v2382_v34 = vsel %vm2380_vm4, %v2370_v48, 2102212464  ;;  %v2386_v1 = vsel %vm2380_vm4, %v2373_v3, 920167782  ;;  %v2390_v10 = vsel %vm2380_vm4, %v2376_v5, 1326507024  ;;  %v2536_v30 = vsel %vm2451_vm14, %v2535_v44, %v7535_v59 }
 0x1d9   :  { %vm5350_vm5 = vcmp.lt.s32.totalorder %v5349_v40, 0  ;;  %vm2378_vm6 = vcmp.lt.s32.totalorder %v7557_v38, 2  ;;  %v2387_v50 = vsel %vm2379_vm0, %v2370_v48, %v2386_v1  ;;  %v2391_v13 = vsel %vm2379_vm0, %v2373_v3, %v2390_v10 }
 0x1da   :  { %v2520_v16 = vsel %vm5350_vm5, 0, %v5349_v40  ;;  %v2388_v57 = vsel %vm2378_vm6, %v2385_v31, %v2387_v50  ;;  %v2392_v11 = vsel %vm2378_vm6, %v2389_v45, %v2391_v13  ;;  %v2381_v47 = vsel %vm2377_vm3, %v2361_v24, %v2364_v12 }
 0x1db   :  { %v2521_v35 = vsub.s32 32, %v2520_v16  ;;  %v2525_v22 = vsub.s32 4294967266, %v2520_v16  ;;  %v2383_v17 = vsel %vm2379_vm0, %v2367_v55, %v2382_v34  ;;  %vm2229_vm7 = vweird.f32 %v7180_v46  ;;  %v1517_v34 = vpop.f32.mrf.mxu0  ;;  %v10138_v46 = vld [vmem:[#allocation4_spill] sm:$0xff] }
 0x1dc   :  { %v7615_v48 = vmul.u32.u64.low %v7577_v39, %v2392_v11  ;;  %v7616_v3 = vmul.u32.u64.high %v7577_v39, %v2392_v11, %v7615_v48  ;;  %v7619_v59 = vmul.u32.u64.low %v7577_v39, %v2388_v57  ;;  %v7620_v29 = vmul.u32.u64.high %v7577_v39, %v2388_v57, %v7619_v59 }
 0x1dd   :  { %v2522_v43 = vshll.u32 %v7555_v63, %v2520_v16  ;;  %v2523_v23 = vshrl.u32 %v7547_v52, %v2521_v35  ;;  %v2526_v44 = vadd.s32 127, %v2525_v22  ;;  %vm2668_vm8 = vcmp.gt.s32.totalorder %v2667_v28, 0 }
 0x1de   :  { %vm2232_vm9 = vcmp.lt.s32.totalorder %v7539_v2, 2  ;;  %vm2233_vm10 = vcmp.eq.s32.totalorder %v7539_v2, 0  ;;  %v2384_v12 = vsel %vm2378_vm6, %v2381_v47, %v2383_v17  ;;  %v2669_v55 = vsel %vm2668_vm8, %v2667_v28, 0 }
 0x1df   :  { %v2524_v24 = vor.u32 %v2523_v23, %v2522_v43  ;;  %v2527_v5 = vshll.u32 %v2526_v44, 23  ;;  %v2538_v40 = vsel %vm7585_vm2, 0, %v2536_v30  ;;  %v2671_v31 = vand.u32 31, %v2669_v55 }
 0x1e0   :  { %v6100_v63 = vpop.eup %6099  ;;  %vm2236_vm11 = vcmp.eq.s32.totalorder %v7539_v2, 2  ;;  %vm2402_vm12 = vc.u32 %v7616_v3, %v7619_v59  ;;  %v2403_v52 = vadd.s32 1, %v7620_v29  ;;  %v2665_v1 = vor.u32 8388608, %v7581_v21 }
 0x1e1   :  { %v6102_v38 = vpop.eup %6101  ;;  %v2237_v45 = vxor.u32 2147483648, %v6100_v63  ;;  %v2528_v28 = vor.u32 4788187, %v2527_v5  ;;  %v2400_v10 = vmul.u32 %v7577_v39, %v2384_v12  ;;  %v2672_v50 = vsub.s32 32, %v2671_v31 }
 0x1e2   :  { %v2234_v13 = vxor.u32 2147483648, %v6102_v38  ;;  %v2542_v16 = vadd.s32 3, %v2538_v40  ;;  %v2404_v30 = vsel %vm2402_vm12, %v2403_v52, %v7620_v29  ;;  %v1518_v57 = vadd.f32 %v1517_v34, %v7081_v9 }
 0x1e3   :  { %v2238_v11 = vsel %vm2236_vm11, %v2237_v45, %v6102_v38  ;;  %v2529_v35 = vand.u32 2147483647, %v2528_v28  ;;  %v2531_v22 = vcvt.s32.f32 %v2524_v24  ;;  %v2405_v47 = vadd.s32 %v2404_v30, %v2400_v10 }
 0x1e4   :  { %v2235_v17 = vsel %vm2233_vm10, %v6100_v63, %v2234_v13  ;;  %v7642_v21 = vshrl.u32 %v2669_v55, 5  ;;  %v2675_v48 = vshrl.u32 %v10117_v15, %v2672_v50  ;;  %v2678_v39 = vshrl.u32 %v10113_v62, %v2672_v50  ;;  %v1775_v63 = vpop.f32.mrf.mxu1 }
 0x1e5   :  { %v2239_v43 = vsel %vm2232_vm9, %v2235_v17, %v2238_v11  ;;  %v2532_v23 = vmul.f32 %v2531_v22, %v2529_v35  ;;  %v2406_v29 = vadd.s32 536870912, %v2405_v47  ;;  %v2681_v9 = vshrl.u32 %v10114_v53, %v2672_v50 }
 0x1e6   :  { %v2240_v44 = vsel %vm2229_vm7, nan, %v2239_v43  ;;  %v2674_v12 = vshll.u32 %v10121_v37, %v2671_v31  ;;  %v2677_v24 = vshll.u32 %v10117_v15, %v2671_v31  ;;  %v2680_v55 = vshll.u32 %v10113_v62, %v2671_v31 }
 0x1e7   :  { %5260 = vst.msk [vmem:[%s9909_s2 + $0x10] sm:$0xff] %vm5257_vm15, %v2240_v44  ;;  %v2533_v2 = vxor.u32 2147483648, %v2532_v23  ;;  %v2407_v5 = vshrl.u32 %v2406_v29, 30  ;;  %v2683_v40 = vshll.u32 %v10114_v53, %v2671_v31  ;;  %v2684_v34 = vshrl.u32 %v10115_v0, %v2672_v50 }
 0x1e8   :  { %5292 = vst.msk [vmem:[%s9909_s2 + $0x10] sm:$0xff] %vm49_vm1, %v10138_v46  ;;  %v2676_v52 = vor.u32 %v2675_v48, %v2674_v12  ;;  %v2679_v38 = vor.u32 %v2678_v39, %v2677_v24  ;;  %v2686_v45 = vshll.u32 %v10115_v0, %v2671_v31  ;;  %v2687_v28 = vshrl.u32 %v10116_v14, %v2672_v50 }
 0x1e9   :  { %v2534_v10 = vsel %vm2451_vm14, %v2533_v2, %v2532_v23  ;;  %v2408_v13 = vshll.u32 %v2407_v5, 30  ;;  %v2682_v30 = vor.u32 %v2681_v9, %v2680_v55  ;;  %v2685_v11 = vor.u32 %v2684_v34, %v2683_v40 }
 0x1ea   :  { %v2537_v35 = vsel %vm7585_vm2, %v7320_v42, %v2534_v10  ;;  %v2688_v22 = vor.u32 %v2687_v28, %v2686_v45  ;;  %v2705_v17 = vshll.u32 %v2665_v1, 8  ;;  %v7672_v43 = vadd.f32 %v1775_v63, %v1518_v57  ;;  %v5869_v45 = vpop.f32.mrf.mxu0 }
 0x1eb   :  { %6103 = vcosq.f32 %v2537_v35  ;;  %v7674_v48 = vsub.s32 %v2405_v47, %v2408_v13  ;;  %v2673_v31 = vshrl.u32 %v10121_v37, %v2672_v50  ;;  %vm2689_vm13 = vcmp.lt.s32.totalorder %v7642_v21, 1 }
 0x1ec   :  { %6105 = vsinq.f32 %v2537_v35  ;;  %vm2690_vm14 = vcmp.lt.s32.totalorder %v7642_v21, 2  ;;  %vm2692_vm3 = vcmp.lt.s32.totalorder %v7642_v21, 4  ;;  %v2697_v39 = vsel %vm2689_vm13, %v2676_v52, %v2679_v38 }
 0x1ed   :  { %v2411_v32 = vsub.s32 0, %v7674_v48  ;;  %vm2691_vm2 = vcmp.lt.s32.totalorder %v7642_v21, 3  ;;  %v2694_v1 = vsel %vm2692_vm3, %v2682_v30, 2102212464  ;;  %v2698_v57 = vsel %vm2692_vm3, %v2685_v11, 920167782 }
 0x1ee   :  { %v2431_v23 = vsub.s32 4, %v2407_v5  ;;  %v2699_v29 = vsel %vm2691_vm2, %v2682_v30, %v2698_v57  ;;  %v2701_v47 = vsel %vm2689_vm13, %v2679_v38, %v2682_v30  ;;  %v2702_v9 = vsel %vm2692_vm3, %v2688_v22, 1326507024 }
 0x1ef   :  { %v5344_v50 = vmin.u32 %v2411_v32, %v7674_v48  ;;  %v2693_v44 = vsel %vm2689_vm13, %v2673_v31, %v2676_v52  ;;  %v2700_v12 = vsel %vm2690_vm14, %v2697_v39, %v2699_v29  ;;  %v2703_v24 = vsel %vm2691_vm2, %v2685_v11, %v2702_v9  ;;  %v5919_v31 = vpop.f32.mrf.mxu1 }
 0x1f0   :  { %v2695_v55 = vsel %vm2691_vm2, %v2679_v38, %v2694_v1  ;;  %v2704_v2 = vsel %vm2690_vm14, %v2701_v47, %v2703_v24  ;;  %v7687_v40 = vmul.u32.u64.low %v2705_v17, %v2700_v12  ;;  %v7688_v34 = vmul.u32.u64.high %v2705_v17, %v2700_v12, %v7687_v40 }
 0x1f1   :  { %v2543_v63 = vand.u32 3, %v2542_v16  ;;  %v2413_v46 = vclz %v5344_v50  ;;  %vm2347_vm0 = vcmp.lt.s32.totalorder %v7499_v36, 0  ;;  %vm7697_vm4 = vcmp.le.f32.partialorder %v2345_v54, 0.7853982 }
 0x1f2   :  { %v7692_v28 = vmul.u32.u64.low %v2705_v17, %v2704_v2  ;;  %v7693_v10 = vmul.u32.u64.high %v2705_v17, %v2704_v2, %v7692_v28  ;;  %v2696_v13 = vsel %vm2690_vm14, %v2693_v44, %v2695_v55  ;;  %v2556_v30 = vand.u32 2139095040, %v7672_v43 }
 0x1f3   :  { %v5345_v38 = vadd.s32 4294967294, %v2413_v46  ;;  %v2432_v16 = vsel %vm2347_vm0, %v2431_v23, %v2407_v5  ;;  %v2715_v11 = vadd.s32 1, %v7688_v34  ;;  %v2553_v35 = vand.u32 2147483647, %v7672_v43 }
 0x1f4   :  { %v1536_v22 = vadd.f32 %v5869_v45, %v7084_v33  ;;  %vm2541_vm5 = vweird.f32 %v7320_v42  ;;  %vm2544_vm6 = vcmp.lt.s32.totalorder %v2543_v63, 2  ;;  %vm2545_vm7 = vcmp.eq.s32.totalorder %v2543_v63, 0 }
 0x1f5   :  { %vm5346_vm8 = vcmp.lt.s32.totalorder %v5345_v38, 0  ;;  %v2557_v54 = vshrl.u32 %v2556_v30, 23  ;;  %v2401_v21 = vadd.s32 %v7619_v59, %v7616_v3  ;;  %v2712_v32 = vmul.u32 %v2705_v17, %v2696_v13 }
 0x1f6   :  { %v2416_v39 = vsel %vm5346_vm8, 0, %v5345_v38  ;;  %vm2714_vm9 = vc.u32 %v7693_v10, %v7687_v40  ;;  %v2434_v33 = vsel %vm7697_vm4, 0, %v2432_v16  ;;  %v2560_v9 = vand.u32 8388607, %v2553_v35 }
 0x1f7   :  { %v2417_v5 = vsub.s32 32, %v2416_v39  ;;  %v2421_v1 = vsub.s32 4294967266, %v2416_v39  ;;  %v2716_v57 = vsel %vm2714_vm9, %v2715_v11, %v7688_v34  ;;  %v5351_v47 = vadd.s32 4294967169, %v2557_v54 }
 0x1f8   :  { %v6104_v23 = vpop.eup %6103  ;;  %v2717_v29 = vadd.s32 %v2716_v57, %v2712_v32  ;;  %v7719_v50 = vadd.f32 %v5919_v31, %v1536_v22  ;;  %v2418_v17 = vshll.u32 %v7674_v48, %v2416_v39  ;;  %vm2548_vm10 = vcmp.eq.s32.totalorder %v2543_v63, 2  ;;  %v10141_v63 = vld [vmem:[#allocation7_spill] sm:$0xff] }
 0x1f9   :  { %v6106_v3 = vpop.eup %6105  ;;  %v2549_v59 = vxor.u32 2147483648, %v6104_v23  ;;  %v2419_v44 = vshrl.u32 %v2401_v21, %v2417_v5  ;;  %v2422_v12 = vadd.s32 127, %v2421_v1  ;;  %v2563_v2 = vadd.s32 1, %v5351_v47 }
 0x1fa   :  { %v2546_v24 = vxor.u32 2147483648, %v6106_v3  ;;  %v2718_v55 = vadd.s32 536870912, %v2717_v29  ;;  %v2438_v28 = vadd.s32 3, %v2434_v33  ;;  %v2865_v30 = vand.u32 2147483647, %v7719_v50 }
 0x1fb   :  { %v2550_v46 = vsel %vm2548_vm10, %v2549_v59, %v6106_v3  ;;  %v2420_v34 = vor.u32 %v2419_v44, %v2418_v17  ;;  %v2423_v45 = vshll.u32 %v2422_v12, 23  ;;  %vm2564_vm11 = vcmp.gt.s32.totalorder %v2563_v2, 0 }
 0x1fc   :  { %v2547_v38 = vsel %vm2545_vm7, %v6104_v23, %v2546_v24  ;;  %v7723_v13 = vshrl.u32 %v2718_v55, 30  ;;  %v2561_v11 = vor.u32 8388608, %v2560_v9  ;;  %v2565_v22 = vsel %vm2564_vm11, %v2563_v2, 0 }
 0x1fd   :  { %v2551_v16 = vsel %vm2544_vm6, %v2547_v38, %v2550_v46  ;;  %v2424_v48 = vor.u32 4788187, %v2423_v45  ;;  %v2868_v21 = vand.u32 2139095040, %v7719_v50  ;;  %v2427_v32 = vcvt.s32.f32 %v2420_v34 }
 0x1fe   :  { %v2552_v54 = vsel %vm2541_vm5, nan, %v2551_v16  ;;  %v2720_v31 = vshll.u32 %v7723_v13, 30  ;;  %v2567_v5 = vand.u32 31, %v2565_v22  ;;  %v7740_v42 = vand.u32 3, %v2438_v28 }
 0x1ff   :  { %5263 = vst.msk [vmem:[%s9909_s2 + $0x28] sm:$0xff] %vm5257_vm15, %v2552_v54  ;;  %v2425_v39 = vand.u32 2147483647, %v2424_v48  ;;  %v2713_v1 = vadd.s32 %v7687_v40, %v7693_v10  ;;  %v7744_v47 = vshll.u32 %v2561_v11, 8  ;;  %v7748_v9 = vand.u32 8388607, %v2865_v30 }
 0x200   :  { %5295 = vst.msk [vmem:[%s9909_s2 + $0x28] sm:$0xff] %vm49_vm1, %v10141_v63  ;;  %v2721_v33 = vsub.s32 %v2717_v29, %v2720_v31  ;;  %v2568_v23 = vsub.s32 32, %v2567_v5  ;;  %v2566_v59 = vshrl.u32 %v2565_v22, 5  ;;  %v2570_v17 = vshll.u32 %v10121_v37, %v2567_v5 }
 0x201   :  { %v2428_v57 = vmul.f32 %v2427_v32, %v2425_v39  ;;  %v2869_v44 = vshrl.u32 %v2868_v21, 23  ;;  %v2573_v55 = vshll.u32 %v10117_v15, %v2567_v5  ;;  %v2576_v29 = vshll.u32 %v10113_v62, %v2567_v5 }
 0x202   :  { %v2723_v3 = vsub.s32 0, %v2721_v33  ;;  %v2571_v24 = vshrl.u32 %v10117_v15, %v2568_v23  ;;  %v2574_v40 = vshrl.u32 %v10113_v62, %v2568_v23  ;;  %v2577_v2 = vshrl.u32 %v10114_v53, %v2568_v23 }
 0x203   :  { %v2429_v12 = vxor.u32 2147483648, %v2428_v57  ;;  %v2579_v46 = vshll.u32 %v10114_v53, %v2567_v5  ;;  %v2580_v38 = vshrl.u32 %v10115_v0, %v2568_v23  ;;  %v2743_v11 = vsub.s32 4, %v7723_v13 }
 0x204   :  { %v5356_v10 = vmin.u32 %v2723_v3, %v2721_v33  ;;  %v2572_v45 = vor.u32 %v2571_v24, %v2570_v17  ;;  %v2575_v28 = vor.u32 %v2574_v40, %v2573_v55  ;;  %v5363_v22 = vadd.s32 4294967169, %v2869_v44 }
 0x205   :  { %v2430_v34 = vsel %vm2347_vm0, %v2429_v12, %v2428_v57  ;;  %v2578_v54 = vor.u32 %v2577_v2, %v2576_v29  ;;  %v2581_v31 = vor.u32 %v2580_v38, %v2579_v46  ;;  %vm2585_vm12 = vcmp.lt.s32.totalorder %v2566_v59, 1 }
 0x206   :  { %v2433_v16 = vsel %vm7697_vm4, %v7499_v36, %v2430_v34  ;;  %v2725_v48 = vclz %v5356_v10  ;;  %v2582_v39 = vshll.u32 %v10115_v0, %v2567_v5  ;;  %v2583_v32 = vshrl.u32 %v10116_v14, %v2568_v23 }
 0x207   :  { %6107 = vcosq.f32 %v2433_v16  ;;  %v2569_v63 = vshrl.u32 %v10121_v37, %v2568_v23  ;;  %vm2587_vm13 = vcmp.lt.s32.totalorder %v2566_v59, 3  ;;  %vm2588_vm14 = vcmp.lt.s32.totalorder %v2566_v59, 4 }
 0x208   :  { %6109 = vsinq.f32 %v2433_v16  ;;  %v5357_v21 = vadd.s32 4294967294, %v2725_v48  ;;  %v2593_v52 = vsel %vm2585_vm12, %v2572_v45, %v2575_v28  ;;  %v2584_v57 = vor.u32 %v2583_v32, %v2582_v39 }
 0x209   :  { %v2590_v3 = vsel %vm2588_vm14, %v2578_v54, 2102212464  ;;  %v2594_v17 = vsel %vm2588_vm14, %v2581_v31, 920167782  ;;  %v2589_v12 = vsel %vm2585_vm12, %v2569_v63, %v2572_v45  ;;  %vm2586_vm2 = vcmp.lt.s32.totalorder %v2566_v59, 2  ;;  %v1529_v45 = vpop.f32.mrf.mxu0 }
 0x20a   :  { %vm5358_vm3 = vcmp.lt.s32.totalorder %v5357_v21, 0  ;;  %v2591_v24 = vsel %vm2587_vm13, %v2575_v28, %v2590_v3  ;;  %v2595_v5 = vsel %vm2587_vm13, %v2578_v54, %v2594_v17  ;;  %v2597_v23 = vsel %vm2585_vm12, %v2575_v28, %v2578_v54 }
 0x20b   :  { %v2728_v44 = vsel %vm5358_vm3, 0, %v5357_v21  ;;  %v2596_v29 = vsel %vm2586_vm2, %v2593_v52, %v2595_v5  ;;  %v2598_v2 = vsel %vm2588_vm14, %v2584_v57, 1326507024  ;;  %v2875_v46 = vadd.s32 1, %v5363_v22  ;;  %v1787_v57 = vpop.f32.mrf.mxu1 }
 0x20c   :  { %v2729_v55 = vsub.s32 32, %v2728_v44  ;;  %v2733_v40 = vsub.s32 4294967266, %v2728_v44  ;;  %v2730_v10 = vshll.u32 %v2721_v33, %v2728_v44  ;;  %v2592_v16 = vsel %vm2586_vm2, %v2589_v12, %v2591_v24 }
 0x20d   :  { %v2599_v48 = vsel %vm2587_vm13, %v2581_v31, %v2598_v2  ;;  %v7777_v39 = vmul.u32.u64.low %v7744_v47, %v2596_v29  ;;  %v7778_v32 = vmul.u32.u64.high %v7744_v47, %v2596_v29, %v7777_v39  ;;  %vm2876_vm0 = vcmp.gt.s32.totalorder %v2875_v46, 0 }
 0x20e   :  { %v2731_v34 = vshrl.u32 %v2713_v1, %v2729_v55  ;;  %v2734_v38 = vadd.s32 127, %v2733_v40  ;;  %v2600_v21 = vsel %vm2586_vm2, %v2597_v23, %v2599_v48  ;;  %vm2437_vm4 = vweird.f32 %v7499_v36 }
 0x20f   :  { %v7782_v33 = vmul.u32.u64.low %v7744_v47, %v2600_v21  ;;  %v7783_v54 = vmul.u32.u64.high %v7744_v47, %v2600_v21, %v7782_v33  ;;  %vm2440_vm5 = vcmp.lt.s32.totalorder %v7740_v42, 2  ;;  %vm2659_vm6 = vcmp.lt.s32.totalorder %v7519_v61, 0 }
 0x210   :  { %v2732_v63 = vor.u32 %v2731_v34, %v2730_v10  ;;  %v2735_v28 = vshll.u32 %v2734_v38, 23  ;;  %v2877_v1 = vsel %vm2876_vm0, %v2875_v46, 0  ;;  %v1530_v59 = vadd.f32 %v1529_v45, %v7087_v25 }
 0x211   :  { %vm2441_vm7 = vcmp.eq.s32.totalorder %v7740_v42, 0  ;;  %vm2444_vm8 = vcmp.eq.s32.totalorder %v7740_v42, 2  ;;  %vm7793_vm9 = vcmp.le.f32.partialorder %v2657_v7, 0.7853982  ;;  %v2879_v52 = vand.u32 31, %v2877_v1 }
 0x212   :  { %v2736_v31 = vor.u32 4788187, %v2735_v28  ;;  %v2744_v3 = vsel %vm2659_vm6, %v2743_v11, %v7723_v13  ;;  %v2608_v17 = vmul.u32 %v7744_v47, %v2592_v16  ;;  %v2611_v25 = vadd.s32 1, %v7778_v32 }
 0x213   :  { %v2873_v44 = vor.u32 8388608, %v7748_v9  ;;  %v2739_v5 = vcvt.s32.f32 %v2732_v63  ;;  %vm2610_vm10 = vc.u32 %v7783_v54, %v7777_v39  ;;  %v2880_v7 = vsub.s32 32, %v2879_v52 }
 0x214   :  { %v6108_v12 = vpop.eup %6107  ;;  %v2737_v24 = vand.u32 2147483647, %v2736_v31  ;;  %v2612_v23 = vsel %vm2610_vm10, %v2611_v25, %v7778_v32  ;;  %v7806_v10 = vshrl.u32 %v2877_v1, 5  ;;  %v7808_v13 = vadd.f32 %v1787_v57, %v1530_v59 }
 0x215   :  { %v6110_v55 = vpop.eup %6109  ;;  %v2445_v40 = vxor.u32 2147483648, %v6108_v12  ;;  %v2613_v29 = vadd.s32 %v2612_v23, %v2608_v17  ;;  %v2882_v9 = vshll.u32 %v10121_v37, %v2879_v52  ;;  %v2883_v46 = vshrl.u32 %v10117_v15, %v2880_v7 }
 0x216   :  { %v2442_v47 = vxor.u32 2147483648, %v6110_v55  ;;  %v2740_v11 = vmul.f32 %v2739_v5, %v2737_v24  ;;  %v2885_v34 = vshll.u32 %v10117_v15, %v2879_v52  ;;  %v2886_v38 = vshrl.u32 %v10113_v62, %v2880_v7 }
 0x217   :  { %v2446_v2 = vsel %vm2444_vm8, %v2445_v40, %v6110_v55  ;;  %v2614_v45 = vadd.s32 536870912, %v2613_v29  ;;  %v2888_v21 = vshll.u32 %v10113_v62, %v2879_v52  ;;  %v2884_v63 = vor.u32 %v2883_v46, %v2882_v9 }
 0x218   :  { %v2443_v16 = vsel %vm2441_vm7, %v6108_v12, %v2442_v47  ;;  %v2741_v48 = vxor.u32 2147483648, %v2740_v11  ;;  %v2887_v28 = vor.u32 %v2886_v38, %v2885_v34  ;;  %v2889_v33 = vshrl.u32 %v10114_v53, %v2880_v7  ;;  %v10144_v12 = vld [vmem:[#allocation6_spill] sm:$0xff] }
 0x219   :  { %v2447_v32 = vsel %vm2440_vm5, %v2443_v16, %v2446_v2  ;;  %v2615_v31 = vshrl.u32 %v2614_v45, 30  ;;  %v2891_v57 = vshll.u32 %v10114_v53, %v2879_v52  ;;  %v2892_v17 = vshrl.u32 %v10115_v0, %v2880_v7 }
 0x21a   :  { %v2448_v1 = vsel %vm2437_vm4, nan, %v2447_v32  ;;  %v2742_v59 = vsel %vm2659_vm6, %v2741_v48, %v2740_v11  ;;  %v2894_v36 = vshll.u32 %v10115_v0, %v2879_v52  ;;  %v2895_v25 = vshrl.u32 %v10116_v14, %v2880_v7 }
 0x21b   :  { %5262 = vst.msk [vmem:[%s9909_s2 + $0x20] sm:$0xff] %vm5257_vm15, %v2448_v1  ;;  %v2745_v42 = vsel %vm7793_vm9, %v7519_v61, %v2742_v59  ;;  %v2746_v24 = vsel %vm7793_vm9, 0, %v2744_v3  ;;  %v2616_v5 = vshll.u32 %v2615_v31, 30  ;;  %v2890_v55 = vor.u32 %v2889_v33, %v2888_v21 }
 0x21c   :  { %5294 = vst.msk [vmem:[%s9909_s2 + $0x20] sm:$0xff] %vm49_vm1, %v10144_v12  ;;  %6111 = vcosq.f32 %v2745_v42  ;;  %v2893_v40 = vor.u32 %v2892_v17, %v2891_v57  ;;  %v2896_v23 = vor.u32 %v2895_v25, %v2894_v36  ;;  %vm2897_vm11 = vcmp.lt.s32.totalorder %v7806_v10, 1 }
 0x21d   :  { %6113 = vsinq.f32 %v2745_v42  ;;  %v7844_v47 = vsub.s32 %v2613_v29, %v2616_v5  ;;  %v2913_v52 = vshll.u32 %v2873_v44, 8  ;;  %v2750_v11 = vadd.s32 3, %v2746_v24 }
 0x21e   :  { %vm2900_vm12 = vcmp.lt.s32.totalorder %v7806_v10, 4  ;;  %v2905_v9 = vsel %vm2897_vm11, %v2884_v63, %v2887_v28  ;;  %v2764_v22 = vand.u32 2139095040, %v7808_v13  ;;  %vm2898_vm13 = vcmp.lt.s32.totalorder %v7806_v10, 2 }
 0x21f   :  { %v2619_v3 = vsub.s32 0, %v7844_v47  ;;  %vm2899_vm14 = vcmp.lt.s32.totalorder %v7806_v10, 3  ;;  %v2906_v2 = vsel %vm2900_vm12, %v2893_v40, 920167782  ;;  %v2902_v29 = vsel %vm2900_vm12, %v2890_v55, 2102212464 }
 0x220   :  { %v2907_v46 = vsel %vm2899_vm14, %v2890_v55, %v2906_v2  ;;  %v2909_v44 = vsel %vm2897_vm11, %v2887_v28, %v2890_v55  ;;  %v2910_v34 = vsel %vm2900_vm12, %v2896_v23, 1326507024  ;;  %v2881_v16 = vshrl.u32 %v10121_v37, %v2880_v7 }
 0x221   :  { %v5352_v38 = vmin.u32 %v2619_v3, %v7844_v47  ;;  %v2908_v48 = vsel %vm2898_vm13, %v2905_v9, %v2907_v46  ;;  %v2911_v45 = vsel %vm2899_vm14, %v2893_v40, %v2910_v34  ;;  %v2751_v21 = vand.u32 3, %v2750_v11  ;;  %v5872_v46 = vpop.f32.mrf.mxu0 }
 0x222   :  { %v2912_v32 = vsel %vm2898_vm13, %v2909_v44, %v2911_v45  ;;  %v7862_v33 = vmul.u32.u64.low %v2913_v52, %v2908_v48  ;;  %v7863_v1 = vmul.u32.u64.high %v2913_v52, %v2908_v48, %v7862_v33  ;;  %v2901_v57 = vsel %vm2897_vm11, %v2881_v16, %v2884_v63 }
 0x223   :  { %v2621_v59 = vclz %v5352_v38  ;;  %v2903_v42 = vsel %vm2899_vm14, %v2887_v28, %v2902_v29  ;;  %v2639_v17 = vsub.s32 4, %v2615_v31  ;;  %v2765_v25 = vshrl.u32 %v2764_v22, 23 }
 0x224   :  { %v7868_v36 = vmul.u32.u64.low %v2913_v52, %v2912_v32  ;;  %v7869_v7 = vmul.u32.u64.high %v2913_v52, %v2912_v32, %v7868_v36  ;;  %vm2749_vm3 = vweird.f32 %v7519_v61  ;;  %vm7874_vm2 = vcmp.le.f32.partialorder %v2553_v35, 0.7853982 }
 0x225   :  { %vm2555_vm0 = vcmp.lt.s32.totalorder %v7672_v43, 0  ;;  %v5353_v24 = vadd.s32 4294967294, %v2621_v59  ;;  %vm2753_vm4 = vcmp.eq.s32.totalorder %v2751_v21, 0  ;;  %v2904_v63 = vsel %vm2898_vm13, %v2901_v57, %v2903_v42 }
 0x226   :  { %v2923_v28 = vadd.s32 1, %v7863_v1  ;;  %v5359_v5 = vadd.s32 4294967169, %v2765_v25  ;;  %vm2756_vm5 = vcmp.eq.s32.totalorder %v2751_v21, 2  ;;  %v2609_v55 = vadd.s32 %v7777_v39, %v7783_v54 }
 0x227   :  { %vm5354_vm6 = vcmp.lt.s32.totalorder %v5353_v24, 0  ;;  %v2761_v35 = vand.u32 2147483647, %v7808_v13  ;;  %v2640_v11 = vsel %vm2555_vm0, %v2639_v17, %v2615_v31  ;;  %vm2922_vm7 = vc.u32 %v7869_v7, %v7862_v33  ;;  %v5922_v17 = vpop.f32.mrf.mxu1 }
 0x228   :  { %v2624_v23 = vsel %vm5354_vm6, 0, %v5353_v24  ;;  %v2771_v10 = vadd.s32 1, %v5359_v5  ;;  %v2920_v29 = vmul.u32 %v2913_v52, %v2904_v63  ;;  %v2924_v54 = vsel %vm2922_vm7, %v2923_v28, %v7863_v1  ;;  %v10147_v63 = vld [vmem:[#allocation10_spill] sm:$0xff] }
 0x229   :  { %v6112_v40 = vpop.eup %6111  ;;  %v2625_v3 = vsub.s32 32, %v2624_v23  ;;  %v2629_v2 = vsub.s32 4294967266, %v2624_v23  ;;  %v2626_v39 = vshll.u32 %v7844_v47, %v2624_v23  ;;  %vm2752_vm9 = vcmp.lt.s32.totalorder %v2751_v21, 2  ;;  %v1541_v47 = vpop.f32.mrf.mxu0 }
 0x22a   :  { %v6114_v9 = vpop.eup %6113  ;;  %v2757_v22 = vxor.u32 2147483648, %v6112_v40  ;;  %vm2772_vm8 = vcmp.gt.s32.totalorder %v2771_v10, 0  ;;  %v2925_v16 = vadd.s32 %v2924_v54, %v2920_v29  ;;  %v1548_v32 = vadd.f32 %v5872_v46, %v7090_v56 }
 0x22b   :  { %v2754_v44 = vxor.u32 2147483648, %v6114_v9  ;;  %v2627_v38 = vshrl.u32 %v2609_v55, %v2625_v3  ;;  %v2630_v31 = vadd.s32 127, %v2629_v2  ;;  %v2773_v45 = vsel %vm2772_vm8, %v2771_v10, 0 }
 0x22c   :  { %v2758_v34 = vsel %vm2756_vm5, %v2757_v22, %v6114_v9  ;;  %v2926_v42 = vadd.s32 536870912, %v2925_v16  ;;  %v2642_v36 = vsel %vm7874_vm2, 0, %v2640_v11  ;;  %v2768_v25 = vand.u32 8388607, %v2761_v35 }
 0x22d   :  { %v2755_v48 = vsel %vm2753_vm4, %v6112_v40, %v2754_v44  ;;  %v2628_v52 = vor.u32 %v2627_v38, %v2626_v39  ;;  %v2631_v57 = vshll.u32 %v2630_v31, 23  ;;  %v2775_v21 = vand.u32 31, %v2773_v45 }
 0x22e   :  { %v2759_v59 = vsel %vm2752_vm9, %v2755_v48, %v2758_v34  ;;  %v7904_v24 = vshrl.u32 %v2926_v42, 30  ;;  %v7911_v28 = vadd.f32 %v5922_v17, %v1548_v32  ;;  %v7914_v5 = vadd.f32 %v1541_v47, %v7093_v58 }
 0x22f   :  { %v2760_v1 = vsel %vm2749_vm3, nan, %v2759_v59  ;;  %v2632_v56 = vor.u32 4788187, %v2631_v57  ;;  %v2776_v61 = vsub.s32 32, %v2775_v21  ;;  %v2635_v40 = vcvt.s32.f32 %v2628_v52 }
 0x230   :  { %5265 = vst.msk [vmem:[%s9909_s2 + $0x38] sm:$0xff] %vm5257_vm15, %v2760_v1  ;;  %v2646_v23 = vadd.s32 3, %v2642_v36  ;;  %v2928_v11 = vshll.u32 %v7904_v24, 30  ;;  %v2769_v10 = vor.u32 8388608, %v2768_v25  ;;  %v2778_v46 = vshll.u32 %v10121_v37, %v2775_v21 }
 0x231   :  { %5297 = vst.msk [vmem:[%s9909_s2 + $0x38] sm:$0xff] %vm49_vm1, %v10147_v63  ;;  %v2633_v55 = vand.u32 2147483647, %v2632_v56  ;;  %v2779_v9 = vshrl.u32 %v10117_v15, %v2776_v61  ;;  %v2782_v22 = vshrl.u32 %v10113_v62, %v2776_v61  ;;  %v2785_v3 = vshrl.u32 %v10114_v53, %v2776_v61 }
 0x232   :  { %v7920_v29 = vsub.s32 %v2925_v16, %v2928_v11  ;;  %v2788_v58 = vshrl.u32 %v10115_v0, %v2776_v61  ;;  %v2774_v44 = vshrl.u32 %v2773_v45, 5  ;;  %v2781_v39 = vshll.u32 %v10117_v15, %v2775_v21 }
 0x233   :  { %v2636_v2 = vmul.f32 %v2635_v40, %v2633_v55  ;;  %v2784_v54 = vshll.u32 %v10113_v62, %v2775_v21  ;;  %v3076_v34 = vand.u32 2139095040, %v7911_v28  ;;  %v2780_v48 = vor.u32 %v2779_v9, %v2778_v46 }
 0x234   :  { %v2931_v31 = vsub.s32 0, %v7920_v29  ;;  %v2787_v32 = vshll.u32 %v10114_v53, %v2775_v21  ;;  %v2783_v59 = vor.u32 %v2782_v22, %v2781_v39  ;;  %v2790_v52 = vshll.u32 %v10115_v0, %v2775_v21 }
 0x235   :  { %v2637_v38 = vxor.u32 2147483648, %v2636_v2  ;;  %v2786_v16 = vor.u32 %v2785_v3, %v2784_v54  ;;  %v2791_v57 = vshrl.u32 %v10116_v14, %v2776_v61  ;;  %v7934_v47 = vshll.u32 %v2769_v10, 8 }
 0x236   :  { %v5364_v42 = vmin.u32 %v2931_v31, %v7920_v29  ;;  %v2789_v17 = vor.u32 %v2788_v58, %v2787_v32  ;;  %v2777_v36 = vshrl.u32 %v10121_v37, %v2776_v61  ;;  %v3077_v56 = vshrl.u32 %v3076_v34, 23 }
 0x237   :  { %v2638_v45 = vsel %vm2555_vm0, %v2637_v38, %v2636_v2  ;;  %v2792_v25 = vor.u32 %v2791_v57, %v2790_v52  ;;  %vm2793_vm10 = vcmp.lt.s32.totalorder %v2774_v44, 1  ;;  %vm2796_vm11 = vcmp.lt.s32.totalorder %v2774_v44, 4 }
 0x238   :  { %v2641_v1 = vsel %vm7874_vm2, %v7672_v43, %v2638_v45  ;;  %v2933_v21 = vclz %v5364_v42  ;;  %vm2794_vm12 = vcmp.lt.s32.totalorder %v2774_v44, 2  ;;  %v2798_v63 = vsel %vm2796_vm11, %v2786_v16, 2102212464 }
 0x239   :  { %6115 = vcosq.f32 %v2641_v1  ;;  %v2801_v55 = vsel %vm2793_vm10, %v2780_v48, %v2783_v59  ;;  %vm2795_vm13 = vcmp.lt.s32.totalorder %v2774_v44, 3  ;;  %v2802_v11 = vsel %vm2796_vm11, %v2789_v17, 920167782 }
 0x23a   :  { %6117 = vsinq.f32 %v2641_v1  ;;  %v5365_v40 = vadd.s32 4294967294, %v2933_v21  ;;  %v2805_v10 = vsel %vm2793_vm10, %v2783_v59, %v2786_v16  ;;  %v2797_v9 = vsel %vm2793_vm10, %v2777_v36, %v2780_v48 }
 0x23b   :  { %v2803_v22 = vsel %vm2795_vm13, %v2786_v16, %v2802_v11  ;;  %v2806_v12 = vsel %vm2796_vm11, %v2792_v25, 1326507024  ;;  %v5371_v3 = vadd.s32 4294967169, %v3077_v56  ;;  %vm2867_vm14 = vcmp.lt.s32.totalorder %v7719_v50, 0  ;;  %v1799_v16 = vpop.f32.mrf.mxu1 }
 0x23c   :  { %vm5366_vm3 = vcmp.lt.s32.totalorder %v5365_v40, 0  ;;  %v2799_v61 = vsel %vm2795_vm13, %v2783_v59, %v2798_v63  ;;  %v2804_v2 = vsel %vm2794_vm12, %v2801_v55, %v2803_v22  ;;  %v2807_v46 = vsel %vm2795_vm13, %v2789_v17, %v2806_v12 }
 0x23d   :  { %v2936_v58 = vsel %vm5366_vm3, 0, %v5365_v40  ;;  %v2808_v39 = vsel %vm2794_vm12, %v2805_v10, %v2807_v46  ;;  %v7944_v54 = vmul.u32.u64.low %v7934_v47, %v2804_v2  ;;  %v7945_v34 = vmul.u32.u64.high %v7934_v47, %v2804_v2, %v7944_v54 }
 0x23e   :  { %v2647_v38 = vand.u32 3, %v2646_v23  ;;  %v2921_v31 = vadd.s32 %v7862_v33, %v7869_v7  ;;  %v2937_v48 = vsub.s32 32, %v2936_v58  ;;  %v2941_v32 = vsub.s32 4294967266, %v2936_v58 }
 0x23f   :  { %v7951_v59 = vmul.u32.u64.low %v7934_v47, %v2808_v39  ;;  %v7952_v52 = vmul.u32.u64.high %v7934_v47, %v2808_v39, %v7951_v59  ;;  %v3073_v57 = vand.u32 2147483647, %v7911_v28  ;;  %v3083_v45 = vadd.s32 1, %v5371_v3 }
 0x240   :  { %v2938_v42 = vshll.u32 %v7920_v29, %v2936_v58  ;;  %v2939_v17 = vshrl.u32 %v2921_v31, %v2937_v48  ;;  %v2942_v1 = vadd.s32 127, %v2941_v32  ;;  %v2800_v36 = vsel %vm2794_vm12, %v2797_v9, %v2799_v61 }
 0x241   :  { %v2951_v23 = vsub.s32 4, %v7904_v24  ;;  %v2819_v33 = vadd.s32 1, %v7945_v34  ;;  %vm3084_vm2 = vcmp.gt.s32.totalorder %v3083_v45, 0  ;;  %v7960_v7 = vadd.f32 %v1799_v16, %v7914_v5 }
 0x242   :  { %vm2645_vm0 = vweird.f32 %v7672_v43  ;;  %vm2648_vm4 = vcmp.lt.s32.totalorder %v2647_v38, 2  ;;  %v2940_v25 = vor.u32 %v2939_v17, %v2938_v42  ;;  %v2943_v56 = vshll.u32 %v2942_v1, 23 }
 0x243   :  { %v3085_v21 = vsel %vm3084_vm2, %v3083_v45, 0  ;;  %vm2649_vm5 = vcmp.eq.s32.totalorder %v2647_v38, 0  ;;  %v2816_v29 = vmul.u32 %v7934_v47, %v2800_v36  ;;  %vm2818_vm6 = vc.u32 %v7952_v52, %v7944_v54 }
 0x244   :  { %v3087_v44 = vand.u32 31, %v3085_v21  ;;  %vm2652_vm7 = vcmp.eq.s32.totalorder %v2647_v38, 2  ;;  %vm7968_vm8 = vcmp.le.f32.partialorder %v2865_v30, 0.7853982  ;;  %v2944_v5 = vor.u32 4788187, %v2943_v56 }
 0x245   :  { %v2820_v55 = vsel %vm2818_vm6, %v2819_v33, %v7945_v34  ;;  %v3080_v40 = vand.u32 8388607, %v3073_v57  ;;  %v2952_v47 = vsel %vm2867_vm14, %v2951_v23, %v7904_v24  ;;  %v2972_v22 = vand.u32 2139095040, %v7960_v7 }
 0x246   :  { %v6116_v11 = vpop.eup %6115  ;;  %v2821_v10 = vadd.s32 %v2820_v55, %v2816_v29  ;;  %v3088_v9 = vsub.s32 32, %v3087_v44  ;;  %v2945_v3 = vand.u32 2147483647, %v2944_v5  ;;  %v2947_v61 = vcvt.s32.f32 %v2940_v25 }
 0x247   :  { %v6118_v12 = vpop.eup %6117  ;;  %v2653_v30 = vxor.u32 2147483648, %v6116_v11  ;;  %v7979_v2 = vshrl.u32 %v3085_v21, 5  ;;  %v3090_v39 = vshll.u32 %v10121_v37, %v3087_v44  ;;  %v3093_v24 = vshll.u32 %v10117_v15, %v3087_v44 }
 0x248   :  { %v2650_v46 = vxor.u32 2147483648, %v6118_v12  ;;  %v2822_v58 = vadd.s32 536870912, %v2821_v10  ;;  %v3091_v34 = vshrl.u32 %v10117_v15, %v3088_v9  ;;  %v2948_v48 = vmul.f32 %v2947_v61, %v2945_v3 }
 0x249   :  { %v2654_v31 = vsel %vm2652_vm7, %v2653_v30, %v6118_v12  ;;  %v3094_v32 = vshrl.u32 %v10113_v62, %v3088_v9  ;;  %v3097_v45 = vshrl.u32 %v10114_v53, %v3088_v9  ;;  %v3100_v42 = vshrl.u32 %v10115_v0, %v3088_v9 }
 0x24a   :  { %v2651_v16 = vsel %vm2649_vm5, %v6116_v11, %v2650_v46  ;;  %v7987_v59 = vshrl.u32 %v2822_v58, 30  ;;  %v2949_v1 = vxor.u32 2147483648, %v2948_v48  ;;  %v3096_v36 = vshll.u32 %v10113_v62, %v3087_v44  ;;  %v10150_v11 = vld [vmem:[#allocation8_spill] sm:$0xff] }
 0x24b   :  { %v2655_v17 = vsel %vm2648_vm4, %v2651_v16, %v2654_v31  ;;  %v3099_v23 = vshll.u32 %v10114_v53, %v3087_v44  ;;  %v3092_v56 = vor.u32 %v3091_v34, %v3090_v39  ;;  %v3095_v21 = vor.u32 %v3094_v32, %v3093_v24 }
 0x24c   :  { %v2656_v33 = vsel %vm2645_vm0, nan, %v2655_v17  ;;  %v2824_v25 = vshll.u32 %v7987_v59, 30  ;;  %v2950_v38 = vsel %vm2867_vm14, %v2949_v1, %v2948_v48  ;;  %v3102_v5 = vshll.u32 %v10115_v0, %v3087_v44 }
 0x24d   :  { %5264 = vst.msk [vmem:[%s9909_s2 + $0x30] sm:$0xff] %vm5257_vm15, %v2656_v33  ;;  %v3101_v29 = vor.u32 %v3100_v42, %v3099_v23  ;;  %v3103_v55 = vshrl.u32 %v10116_v14, %v3088_v9  ;;  %v2953_v43 = vsel %vm7968_vm8, %v7719_v50, %v2950_v38  ;;  %v2954_v12 = vsel %vm7968_vm8, 0, %v2952_v47 }
 0x24e   :  { %5296 = vst.msk [vmem:[%s9909_s2 + $0x30] sm:$0xff] %vm49_vm1, %v10150_v11  ;;  %v8015_v30 = vsub.s32 %v2821_v10, %v2824_v25  ;;  %v3098_v3 = vor.u32 %v3097_v45, %v3096_v36  ;;  %6119 = vcosq.f32 %v2953_v43  ;;  %v3081_v44 = vor.u32 8388608, %v3080_v40  ;;  %v5875_v36 = vpop.f32.mrf.mxu0 }
 0x24f   :  { %v3104_v61 = vor.u32 %v3103_v55, %v3102_v5  ;;  %v2973_v46 = vshrl.u32 %v2972_v22, 23  ;;  %6121 = vsinq.f32 %v2953_v43  ;;  %vm3105_vm9 = vcmp.lt.s32.totalorder %v7979_v2, 1 }
 0x250   :  { %v2827_v58 = vsub.s32 0, %v8015_v30  ;;  %vm3108_vm10 = vcmp.lt.s32.totalorder %v7979_v2, 4  ;;  %v3089_v39 = vshrl.u32 %v10121_v37, %v3088_v9  ;;  %vm3107_vm11 = vcmp.lt.s32.totalorder %v7979_v2, 3 }
 0x251   :  { %v3113_v63 = vsel %vm3105_vm9, %v3092_v56, %v3095_v21  ;;  %v3114_v47 = vsel %vm3108_vm10, %v3101_v29, 920167782  ;;  %vm3106_vm12 = vcmp.lt.s32.totalorder %v7979_v2, 2  ;;  %v3110_v40 = vsel %vm3108_vm10, %v3098_v3, 2102212464 }
 0x252   :  { %v5360_v10 = vmin.u32 %v2827_v58, %v8015_v30  ;;  %v3115_v22 = vsel %vm3107_vm11, %v3098_v3, %v3114_v47  ;;  %v3117_v31 = vsel %vm3105_vm9, %v3095_v21, %v3098_v3  ;;  %v3118_v48 = vsel %vm3108_vm10, %v3104_v61, 1326507024 }
 0x253   :  { %v3116_v34 = vsel %vm3106_vm12, %v3113_v63, %v3115_v22  ;;  %v3121_v9 = vshll.u32 %v3081_v44, 8  ;;  %v2958_v24 = vadd.s32 3, %v2954_v12  ;;  %v3109_v16 = vsel %vm3105_vm9, %v3089_v39, %v3092_v56 }
 0x254   :  { %v2829_v32 = vclz %v5360_v10  ;;  %v3111_v45 = vsel %vm3107_vm11, %v3095_v21, %v3110_v40  ;;  %v3119_v42 = vsel %vm3107_vm11, %v3101_v29, %v3118_v48  ;;  %v5367_v25 = vadd.s32 4294967169, %v2973_v46 }
 0x255   :  { %v8032_v17 = vmul.u32.u64.low %v3121_v9, %v3116_v34  ;;  %v8033_v1 = vmul.u32.u64.high %v3121_v9, %v3116_v34, %v8032_v17  ;;  %v3120_v33 = vsel %vm3106_vm12, %v3117_v31, %v3119_v42  ;;  %vm2763_vm13 = vcmp.lt.s32.totalorder %v7808_v13, 0 }
 0x256   :  { %v5361_v23 = vadd.s32 4294967294, %v2829_v32  ;;  %v8039_v38 = vmul.u32.u64.low %v3121_v9, %v3120_v33  ;;  %v8040_v5 = vmul.u32.u64.high %v3121_v9, %v3120_v33, %v8039_v38  ;;  %v3112_v56 = vsel %vm3106_vm12, %v3109_v16, %v3111_v45 }
 0x257   :  { %v2979_v21 = vadd.s32 1, %v5367_v25  ;;  %v8045_v29 = vadd.f32 %v5875_v36, %v7096_v20  ;;  %vm2957_vm3 = vweird.f32 %v7719_v50  ;;  %v2959_v55 = vand.u32 3, %v2958_v24 }
 0x258   :  { %vm5362_vm14 = vcmp.lt.s32.totalorder %v5361_v23, 0  ;;  %v3131_v43 = vadd.s32 1, %v8033_v1  ;;  %v2969_v12 = vand.u32 2147483647, %v7960_v7  ;;  %v2817_v3 = vadd.s32 %v7944_v54, %v7952_v52 }
 0x259   :  { %v2832_v11 = vsel %vm5362_vm14, 0, %v5361_v23  ;;  %vm2980_vm2 = vcmp.gt.s32.totalorder %v2979_v21, 0  ;;  %v2847_v2 = vsub.s32 4, %v7987_v59  ;;  %v3128_v46 = vmul.u32 %v3121_v9, %v3112_v56 }
 0x25a   :  { %v2833_v44 = vsub.s32 32, %v2832_v11  ;;  %v2837_v61 = vsub.s32 4294967266, %v2832_v11  ;;  %vm3130_vm0 = vc.u32 %v8040_v5, %v8032_v17  ;;  %v2981_v20 = vsel %vm2980_vm2, %v2979_v21, 0 }
 0x25b   :  { %v6120_v58 = vpop.eup %6119  ;;  %v2834_v39 = vshll.u32 %v8015_v30, %v2832_v11  ;;  %v3132_v10 = vsel %vm3130_vm0, %v3131_v43, %v8033_v1  ;;  %vm2960_vm4 = vcmp.lt.s32.totalorder %v2959_v55, 2  ;;  %v2983_v22 = vand.u32 31, %v2981_v20 }
 0x25c   :  { %v2835_v63 = vshrl.u32 %v2817_v3, %v2833_v44  ;;  %v2838_v47 = vadd.s32 127, %v2837_v61  ;;  %v6122_v40 = vpop.eup %6121  ;;  %v2965_v54 = vxor.u32 2147483648, %v6120_v58  ;;  %v3133_v52 = vadd.s32 %v3132_v10, %v3128_v46  ;;  %v10151_v3 = vld [vmem:[#allocation12_spill] sm:$0xff]  ;;  %v1553_v46 = vpop.f32.mrf.mxu0 }
 0x25d   :  { %v2962_v34 = vxor.u32 2147483648, %v6122_v40  ;;  %vm2964_vm5 = vcmp.eq.s32.totalorder %v2959_v55, 2  ;;  %vm2961_vm6 = vcmp.eq.s32.totalorder %v2959_v55, 0  ;;  %v2984_v32 = vsub.s32 32, %v2983_v22 }
 0x25e   :  { %v2836_v31 = vor.u32 %v2835_v63, %v2834_v39  ;;  %v2839_v48 = vshll.u32 %v2838_v47, 23  ;;  %v2966_v9 = vsel %vm2964_vm5, %v2965_v54, %v6122_v40  ;;  %v3134_v24 = vadd.s32 536870912, %v3133_v52  ;;  %v5925_v63 = vpop.f32.mrf.mxu1 }
 0x25f   :  { %v2963_v16 = vsel %vm2961_vm6, %v6120_v58, %v2962_v34  ;;  %v2848_v30 = vsel %vm2763_vm13, %v2847_v2, %v7987_v59  ;;  %v2976_v42 = vand.u32 8388607, %v2969_v12  ;;  %v8065_v23 = vshrl.u32 %v2981_v20, 5 }
 0x260   :  { %v2840_v45 = vor.u32 4788187, %v2839_v48  ;;  %v2967_v1 = vsel %vm2960_vm4, %v2963_v16, %v2966_v9  ;;  %v8063_v36 = vshrl.u32 %v3134_v24, 30  ;;  %v2987_v33 = vshrl.u32 %v10117_v15, %v2984_v32 }
 0x261   :  { %v2968_v25 = vsel %vm2957_vm3, nan, %v2967_v1  ;;  %v2843_v56 = vcvt.s32.f32 %v2836_v31  ;;  %v2990_v21 = vshrl.u32 %v10113_v62, %v2984_v32  ;;  %v2986_v55 = vshll.u32 %v10121_v37, %v2983_v22 }
 0x262   :  { %v2841_v38 = vand.u32 2147483647, %v2840_v45  ;;  %5267 = vst.msk [vmem:[%s9909_s2 + $0x48] sm:$0xff] %vm5257_vm15, %v2968_v25  ;;  %v3136_v59 = vshll.u32 %v8063_v36, 30  ;;  %v2989_v11 = vshll.u32 %v10117_v15, %v2983_v22  ;;  %v2993_v43 = vshrl.u32 %v10114_v53, %v2984_v32 }
 0x263   :  { %5299 = vst.msk [vmem:[%s9909_s2 + $0x48] sm:$0xff] %vm49_vm1, %v10151_v3  ;;  %v2992_v44 = vshll.u32 %v10113_v62, %v2983_v22  ;;  %v2995_v61 = vshll.u32 %v10114_v53, %v2983_v22  ;;  %v2996_v2 = vshrl.u32 %v10115_v0, %v2984_v32  ;;  %vm8089_vm7 = vcmp.le.f32.partialorder %v2761_v35, 0.7853982 }
 0x264   :  { %v2844_v50 = vmul.f32 %v2843_v56, %v2841_v38  ;;  %v8093_v20 = vsub.s32 %v3133_v52, %v3136_v59  ;;  %v2988_v58 = vor.u32 %v2987_v33, %v2986_v55  ;;  %v2991_v39 = vor.u32 %v2990_v21, %v2989_v11 }
 0x265   :  { %v2994_v10 = vor.u32 %v2993_v43, %v2992_v44  ;;  %v2997_v40 = vor.u32 %v2996_v2, %v2995_v61  ;;  %v2999_v54 = vshrl.u32 %v10116_v14, %v2984_v32  ;;  %v2850_v34 = vsel %vm8089_vm7, 0, %v2848_v30 }
 0x266   :  { %v2845_v47 = vxor.u32 2147483648, %v2844_v50  ;;  %v3139_v31 = vsub.s32 0, %v8093_v20  ;;  %v2977_v48 = vor.u32 8388608, %v2976_v42  ;;  %v2998_v35 = vshll.u32 %v10115_v0, %v2983_v22 }
 0x267   :  { %v2985_v9 = vshrl.u32 %v10121_v37, %v2984_v32  ;;  %vm3001_vm8 = vcmp.lt.s32.totalorder %v8065_v23, 1  ;;  %v8105_v24 = vadd.f32 %v5925_v63, %v8045_v29  ;;  %vm3004_vm9 = vcmp.lt.s32.totalorder %v8065_v23, 4 }
 0x268   :  { %v2846_v52 = vsel %vm2763_vm13, %v2845_v47, %v2844_v50  ;;  %v5372_v45 = vmin.u32 %v3139_v31, %v8093_v20  ;;  %v3000_v30 = vor.u32 %v2999_v54, %v2998_v35  ;;  %v3006_v22 = vsel %vm3004_vm9, %v2994_v10, 2102212464 }
 0x269   :  { %v2849_v16 = vsel %vm8089_vm7, %v7808_v13, %v2846_v52  ;;  %v3009_v32 = vsel %vm3001_vm8, %v2988_v58, %v2991_v39  ;;  %v3010_v29 = vsel %vm3004_vm9, %v2997_v40, 920167782  ;;  %vm3003_vm10 = vcmp.lt.s32.totalorder %v8065_v23, 3 }
 0x26a   :  { %6123 = vcosq.f32 %v2849_v16  ;;  %v3141_v42 = vclz %v5372_v45  ;;  %v3017_v1 = vshll.u32 %v2977_v48, 8  ;;  %vm3002_vm11 = vcmp.lt.s32.totalorder %v8065_v23, 2 }
 0x26b   :  { %6125 = vsinq.f32 %v2849_v16  ;;  %v3005_v33 = vsel %vm3001_vm8, %v2985_v9, %v2988_v58  ;;  %v3011_v25 = vsel %vm3003_vm10, %v2994_v10, %v3010_v29  ;;  %v3013_v38 = vsel %vm3001_vm8, %v2991_v39, %v2994_v10  ;;  %v1811_v29 = vpop.f32.mrf.mxu1 }
 0x26c   :  { %v5373_v56 = vadd.s32 4294967294, %v3141_v42  ;;  %v3007_v21 = vsel %vm3003_vm10, %v2991_v39, %v3006_v22  ;;  %v3012_v59 = vsel %vm3002_vm11, %v3009_v32, %v3011_v25  ;;  %v3014_v55 = vsel %vm3004_vm9, %v3000_v30, 1326507024 }
 0x26d   :  { %v3015_v11 = vsel %vm3003_vm10, %v2997_v40, %v3014_v55  ;;  %v8128_v43 = vmul.u32.u64.low %v3017_v1, %v3012_v59  ;;  %v8129_v3 = vmul.u32.u64.high %v3017_v1, %v3012_v59, %v8128_v43  ;;  %v3284_v50 = vand.u32 2139095040, %v8105_v24 }
 0x26e   :  { %v2854_v44 = vadd.s32 3, %v2850_v34  ;;  %vm5374_vm12 = vcmp.lt.s32.totalorder %v5373_v56, 0  ;;  %v3159_v61 = vsub.s32 4, %v8063_v36  ;;  %v3016_v2 = vsel %vm3002_vm11, %v3013_v38, %v3015_v11 }
 0x26f   :  { %v3144_v58 = vsel %vm5374_vm12, 0, %v5373_v56  ;;  %v8136_v39 = vmul.u32.u64.low %v3017_v1, %v3016_v2  ;;  %v8137_v63 = vmul.u32.u64.high %v3017_v1, %v3016_v2, %v8136_v39  ;;  %v3285_v47 = vshrl.u32 %v3284_v50, 23 }
 0x270   :  { %v3129_v10 = vadd.s32 %v8032_v17, %v8040_v5  ;;  %v3145_v40 = vsub.s32 32, %v3144_v58  ;;  %v3149_v54 = vsub.s32 4294967266, %v3144_v58  ;;  %v3008_v34 = vsel %vm3002_vm11, %v3005_v33, %v3007_v21 }
 0x271   :  { %vm3075_vm13 = vcmp.lt.s32.totalorder %v7911_v28, 0  ;;  %v3027_v31 = vadd.s32 1, %v8129_v3  ;;  %v5379_v48 = vadd.s32 4294967169, %v3285_v47  ;;  %v1554_v35 = vadd.f32 %v1553_v46, %v7099_v19 }
 0x272   :  { %v3146_v52 = vshll.u32 %v8093_v20, %v3144_v58  ;;  %v3147_v9 = vshrl.u32 %v3129_v10, %v3145_v40  ;;  %v3150_v16 = vadd.s32 127, %v3149_v54  ;;  %v3281_v45 = vand.u32 2147483647, %v8105_v24 }
 0x273   :  { %v3160_v17 = vsel %vm3075_vm13, %v3159_v61, %v8063_v36  ;;  %v3024_v5 = vmul.u32 %v3017_v1, %v3008_v34  ;;  %vm3026_vm14 = vc.u32 %v8137_v63, %v8128_v43  ;;  %v3291_v23 = vadd.s32 1, %v5379_v48 }
 0x274   :  { %v2855_v30 = vand.u32 3, %v2854_v44  ;;  %v3148_v22 = vor.u32 %v3147_v9, %v3146_v52  ;;  %v3151_v32 = vshll.u32 %v3150_v16, 23  ;;  %v3028_v19 = vsel %vm3026_vm14, %v3027_v31, %v8129_v3 }
 0x275   :  { %vm2853_vm3 = vweird.f32 %v7808_v13  ;;  %vm8157_vm2 = vcmp.le.f32.partialorder %v3073_v57, 0.7853982  ;;  %v3029_v36 = vadd.s32 %v3028_v19, %v3024_v5  ;;  %vm3292_vm0 = vcmp.gt.s32.totalorder %v3291_v23, 0  ;;  %v10156_v13 = vld [vmem:[#allocation11_spill] sm:$0xff] }
 0x276   :  { %v3152_v1 = vor.u32 4788187, %v3151_v32  ;;  %v3162_v33 = vsel %vm8157_vm2, 0, %v3160_v17  ;;  %v3288_v25 = vand.u32 8388607, %v3281_v45  ;;  %v3293_v38 = vsel %vm3292_vm0, %v3291_v23, 0 }
 0x277   :  { %v6124_v42 = vpop.eup %6123  ;;  %v3030_v59 = vadd.s32 536870912, %v3029_v36  ;;  %v3295_v55 = vand.u32 31, %v3293_v38  ;;  %v8165_v11 = vadd.f32 %v1811_v29, %v1554_v35  ;;  %vm2860_vm4 = vcmp.eq.s32.totalorder %v2855_v30, 2 }
 0x278   :  { %v6126_v56 = vpop.eup %6125  ;;  %v2861_v21 = vxor.u32 2147483648, %v6124_v42  ;;  %v3153_v3 = vand.u32 2147483647, %v3152_v1  ;;  %v3155_v50 = vcvt.s32.f32 %v3148_v22  ;;  %vm2857_vm5 = vcmp.eq.s32.totalorder %v2855_v30, 0 }
 0x279   :  { %v2858_v57 = vxor.u32 2147483648, %v6126_v56  ;;  %v8167_v61 = vshrl.u32 %v3030_v59, 30  ;;  %v3296_v2 = vsub.s32 32, %v3295_v55  ;;  %vm2856_vm6 = vcmp.lt.s32.totalorder %v2855_v30, 2 }
 0x27a   :  { %v2862_v44 = vsel %vm2860_vm4, %v2861_v21, %v6126_v56  ;;  %v3156_v58 = vmul.f32 %v3155_v50, %v3153_v3  ;;  %v3166_v39 = vadd.s32 3, %v3162_v33  ;;  %v3289_v40 = vor.u32 8388608, %v3288_v25 }
 0x27b   :  { %v2859_v46 = vsel %vm2857_vm5, %v6124_v42, %v2858_v57  ;;  %v3032_v10 = vshll.u32 %v8167_v61, 30  ;;  %v3180_v54 = vand.u32 2139095040, %v8165_v11  ;;  %v3299_v48 = vshrl.u32 %v10117_v15, %v3296_v2 }
 0x27c   :  { %v2863_v47 = vsel %vm2856_vm6, %v2859_v46, %v2862_v44  ;;  %v3157_v31 = vxor.u32 2147483648, %v3156_v58  ;;  %v3302_v35 = vshrl.u32 %v10113_v62, %v3296_v2  ;;  %v3298_v9 = vshll.u32 %v10121_v37, %v3295_v55 }
 0x27d   :  { %v2864_v34 = vsel %vm2853_vm3, nan, %v2863_v47  ;;  %v8179_v52 = vsub.s32 %v3029_v36, %v3032_v10  ;;  %v3301_v16 = vshll.u32 %v10117_v15, %v3295_v55  ;;  %v3305_v17 = vshrl.u32 %v10114_v53, %v3296_v2 }
 0x27e   :  { %5266 = vst.msk [vmem:[%s9909_s2 + $0x40] sm:$0xff] %vm5257_vm15, %v2864_v34  ;;  %v3158_v5 = vsel %vm3075_vm13, %v3157_v31, %v3156_v58  ;;  %v3294_v23 = vshrl.u32 %v3293_v38, 5  ;;  %v3304_v30 = vshll.u32 %v10113_v62, %v3295_v55  ;;  %v3307_v22 = vshll.u32 %v10114_v53, %v3295_v55 }
 0x27f   :  { %5298 = vst.msk [vmem:[%s9909_s2 + $0x40] sm:$0xff] %vm49_vm1, %v10156_v13  ;;  %v3161_v32 = vsel %vm8157_vm2, %v7911_v28, %v3158_v5  ;;  %v3035_v19 = vsub.s32 0, %v8179_v52  ;;  %v3300_v29 = vor.u32 %v3299_v48, %v3298_v9  ;;  %v3303_v36 = vor.u32 %v3302_v35, %v3301_v16 }
 0x280   :  { %6127 = vcosq.f32 %v3161_v32  ;;  %v3308_v42 = vshrl.u32 %v10115_v0, %v3296_v2  ;;  %v3310_v1 = vshll.u32 %v10115_v0, %v3295_v55  ;;  %v3311_v33 = vshrl.u32 %v10116_v14, %v3296_v2 }
 0x281   :  { %6129 = vsinq.f32 %v3161_v32  ;;  %v5368_v25 = vmin.u32 %v3035_v19, %v8179_v52  ;;  %v3306_v38 = vor.u32 %v3305_v17, %v3304_v30  ;;  %v8201_v56 = vand.u32 3, %v3166_v39 }
 0x282   :  { %v3309_v21 = vor.u32 %v3308_v42, %v3307_v22  ;;  %v3312_v20 = vor.u32 %v3311_v33, %v3310_v1  ;;  %v3181_v59 = vshrl.u32 %v3180_v54, 23  ;;  %v3297_v3 = vshrl.u32 %v10121_v37, %v3296_v2  ;;  %v5878_v1 = vpop.f32.mrf.mxu0 }
 0x283   :  { %v3037_v57 = vclz %v5368_v25  ;;  %vm3313_vm7 = vcmp.lt.s32.totalorder %v3294_v23, 1  ;;  %v3329_v50 = vshll.u32 %v3289_v40, 8  ;;  %vm3314_vm8 = vcmp.lt.s32.totalorder %v3294_v23, 2 }
 0x284   :  { %vm3315_vm9 = vcmp.lt.s32.totalorder %v3294_v23, 3  ;;  %vm3316_vm10 = vcmp.lt.s32.totalorder %v3294_v23, 4  ;;  %v3321_v55 = vsel %vm3313_vm7, %v3300_v29, %v3303_v36  ;;  %v3325_v47 = vsel %vm3313_vm7, %v3303_v36, %v3306_v38 }
 0x285   :  { %v5369_v44 = vadd.s32 4294967294, %v3037_v57  ;;  %v3318_v46 = vsel %vm3316_vm10, %v3306_v38, 2102212464  ;;  %v3322_v58 = vsel %vm3316_vm10, %v3309_v21, 920167782  ;;  %v3317_v10 = vsel %vm3313_vm7, %v3297_v3, %v3300_v29 }
 0x286   :  { %v3323_v34 = vsel %vm3315_vm9, %v3306_v38, %v3322_v58  ;;  %v3326_v39 = vsel %vm3316_vm10, %v3312_v20, 1326507024  ;;  %v5375_v31 = vadd.s32 4294967169, %v3181_v59  ;;  %v3319_v48 = vsel %vm3315_vm9, %v3303_v36, %v3318_v46 }
 0x287   :  { %vm5370_vm11 = vcmp.lt.s32.totalorder %v5369_v44, 0  ;;  %v3324_v54 = vsel %vm3314_vm8, %v3321_v55, %v3323_v34  ;;  %v3327_v35 = vsel %vm3315_vm9, %v3309_v21, %v3326_v39  ;;  %vm2971_vm12 = vcmp.lt.s32.totalorder %v7960_v7, 0 }
 0x288   :  { %v3040_v2 = vsel %vm5370_vm11, 0, %v5369_v44  ;;  %v3328_v40 = vsel %vm3314_vm8, %v3325_v47, %v3327_v35  ;;  %v8206_v9 = vmul.u32.u64.low %v3329_v50, %v3324_v54  ;;  %v8207_v16 = vmul.u32.u64.high %v3329_v50, %v3324_v54, %v8206_v9 }
 0x289   :  { %v3025_v17 = vadd.s32 %v8128_v43, %v8137_v63  ;;  %v3041_v13 = vsub.s32 32, %v3040_v2  ;;  %v3045_v5 = vsub.s32 4294967266, %v3040_v2  ;;  %vm3165_vm13 = vweird.f32 %v7911_v28  ;;  %v10159_v28 = vld [vmem:[#allocation14_spill] sm:$0xff] }
 0x28a   :  { %vm3168_vm14 = vcmp.lt.s32.totalorder %v8201_v56, 2  ;;  %v8215_v30 = vmul.u32.u64.low %v3329_v50, %v3328_v40  ;;  %v8216_v22 = vmul.u32.u64.high %v3329_v50, %v3328_v40, %v8215_v30  ;;  %v3187_v32 = vadd.s32 1, %v5375_v31 }
 0x28b   :  { %v3042_v19 = vshll.u32 %v8179_v52, %v3040_v2  ;;  %v3043_v29 = vshrl.u32 %v3025_v17, %v3041_v13  ;;  %v3046_v36 = vadd.s32 127, %v3045_v5  ;;  %v3320_v42 = vsel %vm3314_vm8, %v3317_v10, %v3319_v48 }
 0x28c   :  { %vm3169_vm3 = vcmp.eq.s32.totalorder %v8201_v56, 0  ;;  %v3339_v43 = vadd.s32 1, %v8207_v16  ;;  %v3177_v63 = vand.u32 2147483647, %v8165_v11  ;;  %vm3188_vm2 = vcmp.gt.s32.totalorder %v3187_v32, 0 }
 0x28d   :  { %v6128_v33 = vpop.eup %6127  ;;  %vm8225_vm0 = vcmp.le.f32.partialorder %v2969_v12, 0.7853982  ;;  %v3044_v52 = vor.u32 %v3043_v29, %v3042_v19  ;;  %v3047_v38 = vshll.u32 %v3046_v36, 23  ;;  %v3055_v23 = vsub.s32 4, %v8167_v61 }
 0x28e   :  { %v3189_v21 = vsel %vm3188_vm2, %v3187_v32, 0  ;;  %v6130_v20 = vpop.eup %6129  ;;  %vm3172_vm4 = vcmp.eq.s32.totalorder %v8201_v56, 2  ;;  %v3173_v59 = vxor.u32 2147483648, %v6128_v33  ;;  %v3336_v57 = vmul.u32 %v3329_v50, %v3320_v42 }
 0x28f   :  { %vm3338_vm5 = vc.u32 %v8216_v22, %v8206_v9  ;;  %v3170_v3 = vxor.u32 2147483648, %v6130_v20  ;;  %v3048_v55 = vor.u32 4788187, %v3047_v38  ;;  %v1572_v44 = vadd.f32 %v5878_v1, %v7102_v49 }
 0x290   :  { %v3340_v12 = vsel %vm3338_vm5, %v3339_v43, %v8207_v16  ;;  %v3174_v46 = vsel %vm3172_vm4, %v3173_v59, %v6130_v20  ;;  %v3184_v47 = vand.u32 8388607, %v3177_v63  ;;  %v3191_v10 = vand.u32 31, %v3189_v21 }
 0x291   :  { %v3341_v58 = vadd.s32 %v3340_v12, %v3336_v57  ;;  %v3171_v34 = vsel %vm3169_vm3, %v6128_v33, %v3170_v3  ;;  %v3049_v39 = vand.u32 2147483647, %v3048_v55  ;;  %v3051_v50 = vcvt.s32.f32 %v3044_v52  ;;  %v5928_v33 = vpop.f32.mrf.mxu1 }
 0x292   :  { %v3056_v31 = vsel %vm2971_vm12, %v3055_v23, %v8167_v61  ;;  %v3175_v48 = vsel %vm3168_vm14, %v3171_v34, %v3174_v46  ;;  %v8244_v49 = vshrl.u32 %v3189_v21, 5  ;;  %v3192_v35 = vsub.s32 32, %v3191_v10 }
 0x293   :  { %v3342_v54 = vadd.s32 536870912, %v3341_v58  ;;  %v3176_v2 = vsel %vm3165_vm13, nan, %v3175_v48  ;;  %v3052_v40 = vmul.f32 %v3051_v50, %v3049_v39  ;;  %v3194_v16 = vshll.u32 %v10121_v37, %v3191_v10 }
 0x294   :  { %v3197_v17 = vshll.u32 %v10117_v15, %v3191_v10  ;;  %5269 = vst.msk [vmem:[%s9909_s2 + $0x58] sm:$0xff] %vm5257_vm15, %v3176_v2  ;;  %v3195_v56 = vshrl.u32 %v10117_v15, %v3192_v35  ;;  %v3198_v13 = vshrl.u32 %v10113_v62, %v3192_v35  ;;  %v3200_v5 = vshll.u32 %v10113_v62, %v3191_v10 }
 0x295   :  { %v8254_v61 = vshrl.u32 %v3342_v54, 30  ;;  %5301 = vst.msk [vmem:[%s9909_s2 + $0x58] sm:$0xff] %vm49_vm1, %v10159_v28  ;;  %v3053_v30 = vxor.u32 2147483648, %v3052_v40  ;;  %v3201_v32 = vshrl.u32 %v10114_v53, %v3192_v35  ;;  %v3203_v19 = vshll.u32 %v10114_v53, %v3191_v10 }
 0x296   :  { %v3204_v29 = vshrl.u32 %v10115_v0, %v3192_v35  ;;  %v3058_v36 = vsel %vm8225_vm0, 0, %v3056_v31  ;;  %v3185_v43 = vor.u32 8388608, %v3184_v47  ;;  %v3196_v1 = vor.u32 %v3195_v56, %v3194_v16 }
 0x297   :  { %v3344_v42 = vshll.u32 %v8254_v61, 30  ;;  %v3054_v52 = vsel %vm2971_vm12, %v3053_v30, %v3052_v40  ;;  %v3199_v38 = vor.u32 %v3198_v13, %v3197_v17  ;;  %v3202_v23 = vor.u32 %v3201_v32, %v3200_v5 }
 0x298   :  { %v3205_v21 = vor.u32 %v3204_v29, %v3203_v19  ;;  %v3057_v20 = vsel %vm8225_vm0, %v7960_v7, %v3054_v52  ;;  %v3206_v57 = vshll.u32 %v10115_v0, %v3191_v10  ;;  %v3207_v3 = vshrl.u32 %v10116_v14, %v3192_v35  ;;  %v1565_v10 = vpop.f32.mrf.mxu0  ;;  %v1823_v29 = vpop.f32.mrf.mxu1 }
 0x299   :  { %v8275_v59 = vsub.s32 %v3341_v58, %v3344_v42  ;;  %6131 = vcosq.f32 %v3057_v20  ;;  %v3062_v55 = vadd.s32 3, %v3058_v36  ;;  %vm3209_vm6 = vcmp.lt.s32.totalorder %v8244_v49, 1 }
 0x29a   :  { %v8280_v12 = vadd.f32 %v5928_v33, %v1572_v44  ;;  %6133 = vsinq.f32 %v3057_v20  ;;  %v3208_v47 = vor.u32 %v3207_v3, %v3206_v57  ;;  %vm3212_vm7 = vcmp.lt.s32.totalorder %v8244_v49, 4 }
 0x29b   :  { %v3347_v46 = vsub.s32 0, %v8275_v59  ;;  %vm3210_vm8 = vcmp.lt.s32.totalorder %v8244_v49, 2  ;;  %vm3211_vm9 = vcmp.lt.s32.totalorder %v8244_v49, 3  ;;  %v3217_v25 = vsel %vm3209_vm6, %v3196_v1, %v3199_v38 }
 0x29c   :  { %v3218_v58 = vsel %vm3212_vm7, %v3205_v21, 920167782  ;;  %v3193_v44 = vshrl.u32 %v10121_v37, %v3192_v35  ;;  %v3214_v39 = vsel %vm3212_vm7, %v3202_v23, 2102212464  ;;  %v3221_v48 = vsel %vm3209_vm6, %v3199_v38, %v3202_v23 }
 0x29d   :  { %v5380_v34 = vmin.u32 %v3347_v46, %v8275_v59  ;;  %v3219_v50 = vsel %vm3211_vm9, %v3202_v23, %v3218_v58  ;;  %v3222_v54 = vsel %vm3212_vm7, %v3208_v47, 1326507024  ;;  %v3225_v2 = vshll.u32 %v3185_v43, 8 }
 0x29e   :  { %v3220_v31 = vsel %vm3210_vm8, %v3217_v25, %v3219_v50  ;;  %v3063_v40 = vand.u32 3, %v3062_v55  ;;  %v3213_v17 = vsel %vm3209_vm6, %v3193_v44, %v3196_v1  ;;  %v1566_v56 = vadd.f32 %v1565_v10, %v7105_v26 }
 0x29f   :  { %v3349_v16 = vclz %v5380_v34  ;;  %v3215_v35 = vsel %vm3211_vm9, %v3199_v38, %v3214_v39  ;;  %v3223_v13 = vsel %vm3211_vm9, %v3205_v21, %v3222_v54  ;;  %vm3283_vm10 = vcmp.lt.s32.totalorder %v8105_v24, 0 }
 0x2a0   :  { %v8303_v5 = vmul.u32.u64.low %v3225_v2, %v3220_v31  ;;  %v8304_v28 = vmul.u32.u64.high %v3225_v2, %v3220_v31, %v8303_v5  ;;  %v3224_v32 = vsel %vm3210_vm8, %v3221_v48, %v3223_v13  ;;  %v3492_v19 = vand.u32 2139095040, %v8280_v12 }
 0x2a1   :  { %v5381_v30 = vadd.s32 4294967294, %v3349_v16  ;;  %vm8313_vm11 = vcmp.le.f32.partialorder %v3281_v45, 0.7853982  ;;  %v3367_v36 = vsub.s32 4, %v8254_v61  ;;  %vm3064_vm12 = vcmp.lt.s32.totalorder %v3063_v40, 2 }
 0x2a2   :  { %v8318_v42 = vmul.u32.u64.low %v3225_v2, %v3224_v32  ;;  %v8319_v43 = vmul.u32.u64.high %v3225_v2, %v3224_v32, %v8318_v42  ;;  %v3216_v1 = vsel %vm3210_vm8, %v3213_v17, %v3215_v35  ;;  %v3493_v33 = vshrl.u32 %v3492_v19, 23  ;;  %v5881_v35 = vpop.f32.mrf.mxu0 }
 0x2a3   :  { %vm5382_vm13 = vcmp.lt.s32.totalorder %v5381_v30, 0  ;;  %v3235_v38 = vadd.s32 1, %v8304_v28  ;;  %v3489_v23 = vand.u32 2147483647, %v8280_v12  ;;  %v8325_v45 = vadd.f32 %v1823_v29, %v1566_v56 }
 0x2a4   :  { %v3352_v52 = vsel %vm5382_vm13, 0, %v5381_v30  ;;  %v3337_v21 = vadd.s32 %v8206_v9, %v8216_v22  ;;  %v5387_v3 = vadd.s32 4294967169, %v3493_v33  ;;  %v3368_v49 = vsel %vm3283_vm10, %v3367_v36, %v8254_v61 }
 0x2a5   :  { %v3353_v20 = vsub.s32 32, %v3352_v52  ;;  %v3357_v57 = vsub.s32 4294967266, %v3352_v52  ;;  %v3354_v55 = vshll.u32 %v8275_v59, %v3352_v52  ;;  %v3232_v46 = vmul.u32 %v3225_v2, %v3216_v1 }
 0x2a6   :  { %vm3234_vm14 = vc.u32 %v8319_v43, %v8303_v5  ;;  %v6132_v47 = vpop.eup %6131  ;;  %v3499_v34 = vadd.s32 1, %v5387_v3  ;;  %vm3065_vm3 = vcmp.eq.s32.totalorder %v3063_v40, 0  ;;  %vm3068_vm2 = vcmp.eq.s32.totalorder %v3063_v40, 2 }
 0x2a7   :  { %v3355_v25 = vshrl.u32 %v3337_v21, %v3353_v20  ;;  %v3358_v58 = vadd.s32 127, %v3357_v57  ;;  %v3236_v10 = vsel %vm3234_vm14, %v3235_v38, %v8304_v28  ;;  %v6134_v9 = vpop.eup %6133  ;;  %v3069_v22 = vxor.u32 2147483648, %v6132_v47 }
 0x2a8   :  { %v3237_v44 = vadd.s32 %v3236_v10, %v3232_v46  ;;  %v3066_v59 = vxor.u32 2147483648, %v6134_v9  ;;  %vm3500_vm0 = vcmp.gt.s32.totalorder %v3499_v34, 0  ;;  %v3370_v31 = vsel %vm8313_vm11, 0, %v3368_v49 }
 0x2a9   :  { %v3356_v39 = vor.u32 %v3355_v25, %v3354_v55  ;;  %v3359_v50 = vshll.u32 %v3358_v58, 23  ;;  %v3070_v61 = vsel %vm3068_vm2, %v3069_v22, %v6134_v9  ;;  %v3501_v54 = vsel %vm3500_vm0, %v3499_v34, 0 }
 0x2aa   :  { %v3238_v48 = vadd.s32 536870912, %v3237_v44  ;;  %v3067_v2 = vsel %vm3065_vm3, %v6132_v47, %v3066_v59  ;;  %v3496_v17 = vand.u32 8388607, %v3489_v23  ;;  %v3388_v56 = vand.u32 2139095040, %v8325_v45 }
 0x2ab   :  { %v3360_v16 = vor.u32 4788187, %v3359_v50  ;;  %vm3061_vm4 = vweird.f32 %v7960_v7  ;;  %v3071_v13 = vsel %vm3064_vm12, %v3067_v2, %v3070_v61  ;;  %v3503_v30 = vand.u32 31, %v3501_v54  ;;  %v10162_v7 = vld [vmem:[#allocation13_spill] sm:$0xff] }
 0x2ac   :  { %v8343_v28 = vshrl.u32 %v3238_v48, 30  ;;  %v3072_v32 = vsel %vm3061_vm4, nan, %v3071_v13  ;;  %v3363_v29 = vcvt.s32.f32 %v3356_v39  ;;  %v3374_v36 = vadd.s32 3, %v3370_v31 }
 0x2ad   :  { %v3361_v19 = vand.u32 2147483647, %v3360_v16  ;;  %5268 = vst.msk [vmem:[%s9909_s2 + $0x50] sm:$0xff] %vm5257_vm15, %v3072_v32  ;;  %v3504_v1 = vsub.s32 32, %v3503_v30  ;;  %v8351_v33 = vadd.f32 %v5881_v35, %v7108_v4  ;;  %v3233_v52 = vadd.s32 %v8303_v5, %v8319_v43 }
 0x2ae   :  { %v3240_v42 = vshll.u32 %v8343_v28, 30  ;;  %5300 = vst.msk [vmem:[%s9909_s2 + $0x50] sm:$0xff] %vm49_vm1, %v10162_v7  ;;  %v3497_v38 = vor.u32 8388608, %v3496_v17  ;;  %v3389_v21 = vshrl.u32 %v3388_v56, 23  ;;  %v3502_v57 = vshrl.u32 %v3501_v54, 5 }
 0x2af   :  { %v3364_v40 = vmul.f32 %v3363_v29, %v3361_v19  ;;  %v3506_v3 = vshll.u32 %v10121_v37, %v3503_v30  ;;  %v3507_v4 = vshrl.u32 %v10117_v15, %v3504_v1  ;;  %v3510_v49 = vshrl.u32 %v10113_v62, %v3504_v1 }
 0x2b0   :  { %v8360_v20 = vsub.s32 %v3237_v44, %v3240_v42  ;;  %v3512_v46 = vshll.u32 %v10113_v62, %v3503_v30  ;;  %v3513_v47 = vshrl.u32 %v10114_v53, %v3504_v1  ;;  %v3509_v5 = vshll.u32 %v10117_v15, %v3503_v30 }
 0x2b1   :  { %v3365_v55 = vxor.u32 2147483648, %v3364_v40  ;;  %v3515_v43 = vshll.u32 %v10114_v53, %v3503_v30  ;;  %v3516_v58 = vshrl.u32 %v10115_v0, %v3504_v1  ;;  %v3508_v34 = vor.u32 %v3507_v4, %v3506_v3 }
 0x2b2   :  { %v3243_v25 = vsub.s32 0, %v8360_v20  ;;  %v3514_v9 = vor.u32 %v3513_v47, %v3512_v46  ;;  %v8373_v22 = vshll.u32 %v3497_v38, 8  ;;  %v3511_v39 = vor.u32 %v3510_v49, %v3509_v5  ;;  %v1577_v46 = vpop.f32.mrf.mxu0 }
 0x2b3   :  { %v3366_v10 = vsel %vm3283_vm10, %v3365_v55, %v3364_v40  ;;  %v3517_v50 = vor.u32 %v3516_v58, %v3515_v43  ;;  %v3518_v61 = vshll.u32 %v10115_v0, %v3503_v30  ;;  %v3519_v31 = vshrl.u32 %v10116_v14, %v3504_v1 }
 0x2b4   :  { %v3369_v44 = vsel %vm8313_vm11, %v8105_v24, %v3366_v10  ;;  %v5376_v59 = vmin.u32 %v3243_v25, %v8360_v20  ;;  %v5383_v48 = vadd.s32 4294967169, %v3389_v21  ;;  %vm3521_vm5 = vcmp.lt.s32.totalorder %v3502_v57, 1 }
 0x2b5   :  { %6135 = vcosq.f32 %v3369_v44  ;;  %vm3524_vm6 = vcmp.lt.s32.totalorder %v3502_v57, 4  ;;  %vm3179_vm7 = vcmp.lt.s32.totalorder %v8165_v11, 0  ;;  %v3505_v2 = vshrl.u32 %v10121_v37, %v3504_v1 }
 0x2b6   :  { %6137 = vsinq.f32 %v3369_v44  ;;  %v3245_v54 = vclz %v5376_v59  ;;  %v3520_v26 = vor.u32 %v3519_v31, %v3518_v61  ;;  %vm3522_vm8 = vcmp.lt.s32.totalorder %v3502_v57, 2 }
 0x2b7   :  { %v3526_v16 = vsel %vm3524_vm6, %v3514_v9, 2102212464  ;;  %vm3523_vm9 = vcmp.lt.s32.totalorder %v3502_v57, 3  ;;  %v3529_v56 = vsel %vm3521_vm5, %v3508_v34, %v3511_v39  ;;  %v3530_v35 = vsel %vm3524_vm6, %v3517_v50, 920167782 }
 0x2b8   :  { %v5377_v17 = vadd.s32 4294967294, %v3245_v54  ;;  %v3525_v13 = vsel %vm3521_vm5, %v3505_v2, %v3508_v34  ;;  %v3531_v30 = vsel %vm3523_vm9, %v3514_v9, %v3530_v35  ;;  %v3533_v32 = vsel %vm3521_vm5, %v3511_v39, %v3514_v9 }
 0x2b9   :  { %v3534_v19 = vsel %vm3524_vm6, %v3520_v26, 1326507024  ;;  %vm8385_vm10 = vcmp.le.f32.partialorder %v3177_v63, 0.7853982  ;;  %v3527_v42 = vsel %vm3523_vm9, %v3511_v39, %v3526_v16  ;;  %v3532_v1 = vsel %vm3522_vm8, %v3529_v56, %v3531_v30 }
 0x2ba   :  { %vm5378_vm11 = vcmp.lt.s32.totalorder %v5377_v17, 0  ;;  %v3535_v7 = vsel %vm3523_vm9, %v3517_v50, %v3534_v19  ;;  %v8392_v21 = vmul.u32.u64.low %v8373_v22, %v3532_v1  ;;  %v8393_v3 = vmul.u32.u64.high %v8373_v22, %v3532_v1, %v8392_v21 }
 0x2bb   :  { %v3248_v40 = vsel %vm5378_vm11, 0, %v5377_v17  ;;  %v3536_v38 = vsel %vm3522_vm8, %v3533_v32, %v3535_v7  ;;  %v3263_v63 = vsub.s32 4, %v8343_v28  ;;  %v3395_v49 = vadd.s32 1, %v5383_v48 }
 0x2bc   :  { %v3249_v4 = vsub.s32 32, %v3248_v40  ;;  %v3253_v55 = vsub.s32 4294967266, %v3248_v40  ;;  %v3375_v47 = vand.u32 3, %v3374_v36  ;;  %v3528_v25 = vsel %vm3522_vm8, %v3525_v13, %v3527_v42 }
 0x2bd   :  { %v8399_v5 = vmul.u32.u64.low %v8373_v22, %v3536_v38  ;;  %v8400_v43 = vmul.u32.u64.high %v8373_v22, %v3536_v38, %v8399_v5  ;;  %v3250_v58 = vshll.u32 %v8360_v20, %v3248_v40  ;;  %vm3396_vm12 = vcmp.gt.s32.totalorder %v3395_v49, 0 }
 0x2be   :  { %v3251_v10 = vshrl.u32 %v3233_v52, %v3249_v4  ;;  %v3254_v34 = vadd.s32 127, %v3253_v55  ;;  %vm3373_vm13 = vweird.f32 %v8105_v24  ;;  %v3547_v9 = vadd.s32 1, %v8393_v3 }
 0x2bf   :  { %v3385_v44 = vand.u32 2147483647, %v8325_v45  ;;  %v3397_v59 = vsel %vm3396_vm12, %v3395_v49, 0  ;;  %v8407_v36 = vadd.f32 %v1577_v46, %v7111_v18  ;;  %v3264_v50 = vsel %vm3179_vm7, %v3263_v63, %v8343_v28 }
 0x2c0   :  { %v3252_v57 = vor.u32 %v3251_v10, %v3250_v58  ;;  %v3255_v39 = vshll.u32 %v3254_v34, 23  ;;  %v3399_v20 = vand.u32 31, %v3397_v59  ;;  %vm3376_vm14 = vcmp.lt.s32.totalorder %v3375_v47, 2  ;;  %v5931_v34 = vpop.f32.mrf.mxu1 }
 0x2c1   :  { %vm3377_vm3 = vcmp.eq.s32.totalorder %v3375_v47, 0  ;;  %v3544_v52 = vmul.u32 %v8373_v22, %v3528_v25  ;;  %vm3546_vm2 = vc.u32 %v8400_v43, %v8392_v21  ;;  %vm3380_vm0 = vcmp.eq.s32.totalorder %v3375_v47, 2 }
 0x2c2   :  { %v6136_v61 = vpop.eup %6135  ;;  %v3256_v31 = vor.u32 4788187, %v3255_v39  ;;  %v3548_v18 = vsel %vm3546_vm2, %v3547_v9, %v8393_v3  ;;  %v3400_v48 = vsub.s32 32, %v3399_v20  ;;  %v3266_v26 = vsel %vm8385_vm10, 0, %v3264_v50  ;;  %v10165_v9 = vld [vmem:[#allocation18_spill] sm:$0xff] }
 0x2c3   :  { %v6138_v54 = vpop.eup %6137  ;;  %v3381_v2 = vxor.u32 2147483648, %v6136_v61  ;;  %v3549_v28 = vadd.s32 %v3548_v18, %v3544_v52  ;;  %v3392_v16 = vand.u32 8388607, %v3385_v44  ;;  %v3259_v56 = vcvt.s32.f32 %v3252_v57 }
 0x2c4   :  { %v3378_v17 = vxor.u32 2147483648, %v6138_v54  ;;  %v3257_v22 = vand.u32 2147483647, %v3256_v31  ;;  %v8420_v35 = vshrl.u32 %v3397_v59, 5  ;;  %v3403_v32 = vshrl.u32 %v10117_v15, %v3400_v48 }
 0x2c5   :  { %v3382_v13 = vsel %vm3380_vm0, %v3381_v2, %v6138_v54  ;;  %v3550_v30 = vadd.s32 536870912, %v3549_v28  ;;  %v3406_v19 = vshrl.u32 %v10113_v62, %v3400_v48  ;;  %v3402_v7 = vshll.u32 %v10121_v37, %v3399_v20 }
 0x2c6   :  { %v3379_v42 = vsel %vm3377_vm3, %v6136_v61, %v3378_v17  ;;  %v3260_v1 = vmul.f32 %v3259_v56, %v3257_v22  ;;  %v3409_v40 = vshrl.u32 %v10114_v53, %v3400_v48  ;;  %v3405_v4 = vshll.u32 %v10117_v15, %v3399_v20 }
 0x2c7   :  { %v3383_v38 = vsel %vm3376_vm14, %v3379_v42, %v3382_v13  ;;  %v3551_v3 = vshrl.u32 %v3550_v30, 30  ;;  %v3408_v55 = vshll.u32 %v10113_v62, %v3399_v20  ;;  %v3411_v46 = vshll.u32 %v10114_v53, %v3399_v20 }
 0x2c8   :  { %v3384_v63 = vsel %vm3373_vm13, nan, %v3383_v38  ;;  %v3261_v49 = vxor.u32 2147483648, %v3260_v1  ;;  %v3412_v25 = vshrl.u32 %v10115_v0, %v3400_v48  ;;  %v3404_v5 = vor.u32 %v3403_v32, %v3402_v7 }
 0x2c9   :  { %5271 = vst.msk [vmem:[%s9909_s2 + $0x68] sm:$0xff] %vm5257_vm15, %v3384_v63  ;;  %v3552_v47 = vshll.u32 %v3551_v3, 30  ;;  %v3407_v58 = vor.u32 %v3406_v19, %v3405_v4  ;;  %v3415_v10 = vshrl.u32 %v10116_v14, %v3400_v48  ;;  %vm3491_vm4 = vcmp.lt.s32.totalorder %v8280_v12, 0 }
 0x2ca   :  { %5303 = vst.msk [vmem:[%s9909_s2 + $0x68] sm:$0xff] %vm49_vm1, %v10165_v9  ;;  %v3262_v24 = vsel %vm3179_vm7, %v3261_v49, %v3260_v1  ;;  %v3410_v59 = vor.u32 %v3409_v40, %v3408_v55  ;;  %v3413_v57 = vor.u32 %v3412_v25, %v3411_v46  ;;  %v3414_v39 = vshll.u32 %v10115_v0, %v3399_v20 }
 0x2cb   :  { %v3265_v50 = vsel %vm8385_vm10, %v8165_v11, %v3262_v24  ;;  %v3270_v52 = vadd.s32 3, %v3266_v26  ;;  %v8451_v61 = vsub.s32 %v3549_v28, %v3552_v47  ;;  %v3393_v31 = vor.u32 8388608, %v3392_v16  ;;  %v1835_v16 = vpop.f32.mrf.mxu1 }
 0x2cc   :  { %6139 = vcosq.f32 %v3265_v50  ;;  %v3401_v18 = vshrl.u32 %v10121_v37, %v3400_v48  ;;  %v3416_v54 = vor.u32 %v3415_v10, %v3414_v39  ;;  %v8455_v2 = vadd.f32 %v5931_v34, %v8351_v33 }
 0x2cd   :  { %6141 = vsinq.f32 %v3265_v50  ;;  %v3555_v17 = vsub.s32 0, %v8451_v61  ;;  %vm3417_vm5 = vcmp.lt.s32.totalorder %v8420_v35, 1  ;;  %vm3420_vm6 = vcmp.lt.s32.totalorder %v8420_v35, 4 }
 0x2ce   :  { %vm3419_vm7 = vcmp.lt.s32.totalorder %v8420_v35, 3  ;;  %v3422_v29 = vsel %vm3420_vm6, %v3410_v59, 2102212464  ;;  %v3425_v20 = vsel %vm3417_vm5, %v3404_v5, %v3407_v58  ;;  %v3426_v26 = vsel %vm3420_vm6, %v3413_v57, 920167782 }
 0x2cf   :  { %v5388_v48 = vmin.u32 %v3555_v17, %v8451_v61  ;;  %v3575_v28 = vsub.s32 4, %v3551_v3  ;;  %vm3418_vm8 = vcmp.lt.s32.totalorder %v8420_v35, 2  ;;  %v3427_v33 = vsel %vm3419_vm7, %v3410_v59, %v3426_v26 }
 0x2d0   :  { %v3428_v22 = vsel %vm3418_vm8, %v3425_v20, %v3427_v33  ;;  %v3429_v56 = vsel %vm3417_vm5, %v3407_v58, %v3410_v59  ;;  %v3430_v13 = vsel %vm3420_vm6, %v3416_v54, 1326507024  ;;  %v3433_v30 = vshll.u32 %v3393_v31, 8 }
 0x2d1   :  { %v3271_v32 = vand.u32 3, %v3270_v52  ;;  %v3557_v19 = vclz %v5388_v48  ;;  %v3421_v42 = vsel %vm3417_vm5, %v3401_v18, %v3404_v5  ;;  %v3423_v1 = vsel %vm3419_vm7, %v3407_v58, %v3422_v29 }
 0x2d2   :  { %v3431_v7 = vsel %vm3419_vm7, %v3413_v57, %v3430_v13  ;;  %v8477_v40 = vmul.u32.u64.low %v3433_v30, %v3428_v22  ;;  %v8478_v38 = vmul.u32.u64.high %v3433_v30, %v3428_v22, %v8477_v40  ;;  %v8482_v4 = vadd.f32 %v1835_v16, %v8407_v36 }
 0x2d3   :  { %v5389_v55 = vadd.s32 4294967294, %v3557_v19  ;;  %v3576_v63 = vsel %vm3491_vm4, %v3575_v28, %v3551_v3  ;;  %v3432_v49 = vsel %vm3418_vm8, %v3429_v56, %v3431_v7  ;;  %v3700_v46 = vand.u32 2139095040, %v8455_v2 }
 0x2d4   :  { %v3424_v25 = vsel %vm3418_vm8, %v3421_v42, %v3423_v1  ;;  %v8491_v47 = vmul.u32.u64.low %v3433_v30, %v3432_v49  ;;  %v8492_v5 = vmul.u32.u64.high %v3433_v30, %v3432_v49, %v8491_v47  ;;  %v3697_v58 = vand.u32 2147483647, %v8455_v2 }
 0x2d5   :  { %vm3272_vm9 = vcmp.lt.s32.totalorder %v3271_v32, 2  ;;  %vm8497_vm10 = vcmp.le.f32.partialorder %v3489_v23, 0.7853982  ;;  %vm5390_vm11 = vcmp.lt.s32.totalorder %v5389_v55, 0  ;;  %v3701_v3 = vshrl.u32 %v3700_v46, 23  ;;  %v10168_v47 = vld [vmem:[#allocation15_spill] sm:$0xff] }
 0x2d6   :  { %v3545_v10 = vadd.s32 %v8392_v21, %v8400_v43  ;;  %v3560_v34 = vsel %vm5390_vm11, 0, %v5389_v55  ;;  %v3578_v35 = vsel %vm8497_vm10, 0, %v3576_v63  ;;  %v3443_v9 = vadd.s32 1, %v8478_v38 }
 0x2d7   :  { %v3561_v24 = vsub.s32 32, %v3560_v34  ;;  %v3565_v59 = vsub.s32 4294967266, %v3560_v34  ;;  %v3440_v57 = vmul.u32 %v3433_v30, %v3424_v25  ;;  %v5395_v39 = vadd.s32 4294967169, %v3701_v3 }
 0x2d8   :  { %v3562_v23 = vshll.u32 %v8451_v61, %v3560_v34  ;;  %vm3442_vm12 = vc.u32 %v8492_v5, %v8477_v40  ;;  %v3704_v50 = vand.u32 8388607, %v3697_v58  ;;  %v3596_v21 = vand.u32 2139095040, %v8482_v4 }
 0x2d9   :  { %v6140_v43 = vpop.eup %6139  ;;  %v3563_v52 = vshrl.u32 %v3545_v10, %v3561_v24  ;;  %v3566_v31 = vadd.s32 127, %v3565_v59  ;;  %v3444_v18 = vsel %vm3442_vm12, %v3443_v9, %v8478_v38  ;;  %v3707_v54 = vadd.s32 1, %v5395_v39 }
 0x2da   :  { %v6142_v17 = vpop.eup %6141  ;;  %vm3273_vm13 = vcmp.eq.s32.totalorder %v3271_v32, 0  ;;  %vm3276_vm14 = vcmp.eq.s32.totalorder %v3271_v32, 2  ;;  %v3277_v29 = vxor.u32 2147483648, %v6140_v43  ;;  %v3445_v20 = vadd.s32 %v3444_v18, %v3440_v57 }
 0x2db   :  { %v3274_v61 = vxor.u32 2147483648, %v6142_v17  ;;  %v3564_v26 = vor.u32 %v3563_v52, %v3562_v23  ;;  %v3567_v48 = vshll.u32 %v3566_v31, 23  ;;  %vm3708_vm3 = vcmp.gt.s32.totalorder %v3707_v54, 0 }
 0x2dc   :  { %v3278_v28 = vsel %vm3276_vm14, %v3277_v29, %v6142_v17  ;;  %v3582_v33 = vadd.s32 3, %v3578_v35  ;;  %v3446_v16 = vadd.s32 536870912, %v3445_v20  ;;  %v3709_v22 = vsel %vm3708_vm3, %v3707_v54, 0 }
 0x2dd   :  { %v3275_v56 = vsel %vm3273_vm13, %v6140_v43, %v3274_v61  ;;  %v3568_v13 = vor.u32 4788187, %v3567_v48  ;;  %v3705_v30 = vor.u32 8388608, %v3704_v50  ;;  %v3597_v19 = vshrl.u32 %v3596_v21, 23 }
 0x2de   :  { %vm3269_vm2 = vweird.f32 %v8165_v11  ;;  %v3279_v42 = vsel %vm3272_vm9, %v3275_v56, %v3278_v28  ;;  %v8515_v1 = vshrl.u32 %v3446_v16, 30  ;;  %v3711_v7 = vand.u32 31, %v3709_v22 }
 0x2df   :  { %v3280_v38 = vsel %vm3269_vm2, nan, %v3279_v42  ;;  %v3569_v55 = vand.u32 2147483647, %v3568_v13  ;;  %v3571_v63 = vcvt.s32.f32 %v3564_v26  ;;  %v8521_v49 = vand.u32 3, %v3582_v33 }
 0x2e0   :  { %5270 = vst.msk [vmem:[%s9909_s2 + $0x60] sm:$0xff] %vm5257_vm15, %v3280_v38  ;;  %v3448_v46 = vshll.u32 %v8515_v1, 30  ;;  %v3712_v25 = vsub.s32 32, %v3711_v7  ;;  %v8529_v32 = vshll.u32 %v3705_v30, 8  ;;  %v3593_v3 = vand.u32 2147483647, %v8482_v4 }
 0x2e1   :  { %5302 = vst.msk [vmem:[%s9909_s2 + $0x60] sm:$0xff] %vm49_vm1, %v10168_v47  ;;  %v3572_v11 = vmul.f32 %v3571_v63, %v3569_v55  ;;  %v5391_v10 = vadd.s32 4294967169, %v3597_v19  ;;  %v3710_v35 = vshrl.u32 %v3709_v22, 5  ;;  %v3714_v9 = vshll.u32 %v10121_v37, %v3711_v7 }
 0x2e2   :  { %v8532_v34 = vsub.s32 %v3445_v20, %v3448_v46  ;;  %v3715_v24 = vshrl.u32 %v10117_v15, %v3712_v25  ;;  %v3718_v57 = vshrl.u32 %v10113_v62, %v3712_v25  ;;  %v3720_v39 = vshll.u32 %v10113_v62, %v3711_v7 }
 0x2e3   :  { %v3573_v59 = vxor.u32 2147483648, %v3572_v11  ;;  %v3721_v23 = vshrl.u32 %v10114_v53, %v3712_v25  ;;  %v3717_v21 = vshll.u32 %v10117_v15, %v3711_v7  ;;  %v3723_v43 = vshll.u32 %v10114_v53, %v3711_v7 }
 0x2e4   :  { %v3451_v50 = vsub.s32 0, %v8532_v34  ;;  %v3724_v52 = vshrl.u32 %v10115_v0, %v3712_v25  ;;  %v3716_v18 = vor.u32 %v3715_v24, %v3714_v9  ;;  %v3603_v17 = vadd.s32 1, %v5391_v10 }
 0x2e5   :  { %v3574_v31 = vsel %vm3491_vm4, %v3573_v59, %v3572_v11  ;;  %v3722_v54 = vor.u32 %v3721_v23, %v3720_v39  ;;  %v3719_v61 = vor.u32 %v3718_v57, %v3717_v21  ;;  %v3726_v48 = vshll.u32 %v10115_v0, %v3711_v7  ;;  %v5884_v39 = vpop.f32.mrf.mxu0 }
 0x2e6   :  { %v3577_v29 = vsel %vm8497_vm10, %v8280_v12, %v3574_v31  ;;  %v5384_v20 = vmin.u32 %v3451_v50, %v8532_v34  ;;  %v3725_v26 = vor.u32 %v3724_v52, %v3723_v43  ;;  %v3727_v28 = vshrl.u32 %v10116_v14, %v3712_v25 }
 0x2e7   :  { %6143 = vcosq.f32 %v3577_v29  ;;  %vm3729_vm0 = vcmp.lt.s32.totalorder %v3710_v35, 1  ;;  %vm3387_vm4 = vcmp.lt.s32.totalorder %v8325_v45, 0  ;;  %vm3730_vm5 = vcmp.lt.s32.totalorder %v3710_v35, 2 }
 0x2e8   :  { %6145 = vsinq.f32 %v3577_v29  ;;  %v3453_v33 = vclz %v5384_v20  ;;  %vm3732_vm6 = vcmp.lt.s32.totalorder %v3710_v35, 4  ;;  %v3471_v16 = vsub.s32 4, %v8515_v1 }
 0x2e9   :  { %v3713_v36 = vshrl.u32 %v10121_v37, %v3712_v25  ;;  %v3728_v22 = vor.u32 %v3727_v28, %v3726_v48  ;;  %v3734_v56 = vsel %vm3732_vm6, %v3722_v54, 2102212464  ;;  %vm3731_vm7 = vcmp.lt.s32.totalorder %v3710_v35, 3 }
 0x2ea   :  { %v5385_v13 = vadd.s32 4294967294, %v3453_v33  ;;  %v3737_v30 = vsel %vm3729_vm0, %v3716_v18, %v3719_v61  ;;  %v3738_v19 = vsel %vm3732_vm6, %v3725_v26, 920167782  ;;  %v3741_v38 = vsel %vm3729_vm0, %v3719_v61, %v3722_v54 }
 0x2eb   :  { %v3733_v42 = vsel %vm3729_vm0, %v3713_v36, %v3716_v18  ;;  %v3739_v7 = vsel %vm3731_vm7, %v3722_v54, %v3738_v19  ;;  %v3742_v55 = vsel %vm3732_vm6, %v3728_v22, 1326507024  ;;  %v3735_v63 = vsel %vm3731_vm7, %v3719_v61, %v3734_v56 }
 0x2ec   :  { %vm5386_vm8 = vcmp.lt.s32.totalorder %v5385_v13, 0  ;;  %v3740_v46 = vsel %vm3730_vm5, %v3737_v30, %v3739_v7  ;;  %v3743_v47 = vsel %vm3731_vm7, %v3725_v26, %v3742_v55  ;;  %v3441_v24 = vadd.s32 %v8477_v40, %v8492_v5 }
 0x2ed   :  { %v3456_v11 = vsel %vm5386_vm8, 0, %v5385_v13  ;;  %v3744_v25 = vsel %vm3730_vm5, %v3741_v38, %v3743_v47  ;;  %v8560_v10 = vmul.u32.u64.low %v8529_v32, %v3740_v46  ;;  %v8561_v9 = vmul.u32.u64.high %v8529_v32, %v3740_v46, %v8560_v10 }
 0x2ee   :  { %v3457_v59 = vsub.s32 32, %v3456_v11  ;;  %v3461_v57 = vsub.s32 4294967266, %v3456_v11  ;;  %vm3604_vm9 = vcmp.gt.s32.totalorder %v3603_v17, 0  ;;  %v3736_v23 = vsel %vm3730_vm5, %v3733_v42, %v3735_v63 }
 0x2ef   :  { %v8568_v50 = vmul.u32.u64.low %v8529_v32, %v3744_v25  ;;  %v8569_v21 = vmul.u32.u64.high %v8529_v32, %v3744_v25, %v8568_v50  ;;  %v3605_v43 = vsel %vm3604_vm9, %v3603_v17, 0  ;;  %v3458_v52 = vshll.u32 %v8532_v34, %v3456_v11 }
 0x2f0   :  { %v3459_v31 = vshrl.u32 %v3441_v24, %v3457_v59  ;;  %v3462_v18 = vadd.s32 127, %v3461_v57  ;;  %v3607_v54 = vand.u32 31, %v3605_v43  ;;  %vm3581_vm10 = vweird.f32 %v8280_v12  ;;  %v5934_v50 = vpop.f32.mrf.mxu1 }
 0x2f1   :  { %vm8575_vm11 = vcmp.le.f32.partialorder %v3385_v44, 0.7853982  ;;  %v3472_v5 = vsel %vm3387_vm4, %v3471_v16, %v8515_v1  ;;  %v3755_v35 = vadd.s32 1, %v8561_v9  ;;  %v1596_v17 = vadd.f32 %v5884_v39, %v7114_v27 }
 0x2f2   :  { %vm3584_vm12 = vcmp.lt.s32.totalorder %v8521_v49, 2  ;;  %vm3585_vm13 = vcmp.eq.s32.totalorder %v8521_v49, 0  ;;  %v3460_v34 = vor.u32 %v3459_v31, %v3458_v52  ;;  %v3463_v29 = vshll.u32 %v3462_v18, 23  ;;  %v10171_v18 = vld [vmem:[#allocation26_spill] sm:$0xff] }
 0x2f3   :  { %vm3588_vm14 = vcmp.eq.s32.totalorder %v8521_v49, 2  ;;  %v3752_v44 = vmul.u32 %v8529_v32, %v3736_v23  ;;  %vm3754_vm3 = vc.u32 %v8569_v21, %v8560_v10  ;;  %v3608_v20 = vsub.s32 32, %v3607_v54 }
 0x2f4   :  { %v6144_v61 = vpop.eup %6143  ;;  %v3464_v1 = vor.u32 4788187, %v3463_v29  ;;  %v3474_v26 = vsel %vm8575_vm11, 0, %v3472_v5  ;;  %v3756_v27 = vsel %vm3754_vm3, %v3755_v35, %v8561_v9  ;;  %v3600_v48 = vand.u32 8388607, %v3593_v3 }
 0x2f5   :  { %v6146_v28 = vpop.eup %6145  ;;  %v3589_v33 = vxor.u32 2147483648, %v6144_v61  ;;  %v3757_v16 = vadd.s32 %v3756_v27, %v3752_v44  ;;  %v8595_v36 = vshrl.u32 %v3605_v43, 5  ;;  %v3610_v32 = vshll.u32 %v10121_v37, %v3607_v54 }
 0x2f6   :  { %v3586_v22 = vxor.u32 2147483648, %v6146_v28  ;;  %v3465_v56 = vand.u32 2147483647, %v3464_v1  ;;  %v3467_v13 = vcvt.s32.f32 %v3460_v34  ;;  %v3613_v30 = vshll.u32 %v10117_v15, %v3607_v54 }
 0x2f7   :  { %v3590_v19 = vsel %vm3588_vm14, %v3589_v33, %v6146_v28  ;;  %v3758_v42 = vadd.s32 536870912, %v3757_v16  ;;  %v3611_v7 = vshrl.u32 %v10117_v15, %v3608_v20  ;;  %v3614_v38 = vshrl.u32 %v10113_v62, %v3608_v20 }
 0x2f8   :  { %v3587_v55 = vsel %vm3585_vm13, %v6144_v61, %v3586_v22  ;;  %v3468_v63 = vmul.f32 %v3467_v13, %v3465_v56  ;;  %v3617_v46 = vshrl.u32 %v10114_v53, %v3608_v20  ;;  %v3620_v47 = vshrl.u32 %v10115_v0, %v3608_v20 }
 0x2f9   :  { %v3591_v11 = vsel %vm3584_vm12, %v3587_v55, %v3590_v19  ;;  %v3759_v25 = vshrl.u32 %v3758_v42, 30  ;;  %v3616_v9 = vshll.u32 %v10113_v62, %v3607_v54  ;;  %v3623_v24 = vshrl.u32 %v10116_v14, %v3608_v20 }
 0x2fa   :  { %v3592_v59 = vsel %vm3581_vm10, nan, %v3591_v11  ;;  %v3469_v57 = vxor.u32 2147483648, %v3468_v63  ;;  %v3619_v39 = vshll.u32 %v10114_v53, %v3607_v54  ;;  %v3622_v23 = vshll.u32 %v10115_v0, %v3607_v54 }
 0x2fb   :  { %5273 = vst.msk [vmem:[%s9909_s2 + $0x78] sm:$0xff] %vm5257_vm15, %v3592_v59  ;;  %v3760_v49 = vshll.u32 %v3759_v25, 30  ;;  %v3601_v43 = vor.u32 8388608, %v3600_v48  ;;  %v3612_v52 = vor.u32 %v3611_v7, %v3610_v32  ;;  %v3615_v31 = vor.u32 %v3614_v38, %v3613_v30 }
 0x2fc   :  { %5305 = vst.msk [vmem:[%s9909_s2 + $0x78] sm:$0xff] %vm49_vm1, %v10171_v18  ;;  %v3470_v12 = vsel %vm3387_vm4, %v3469_v57, %v3468_v63  ;;  %v3618_v54 = vor.u32 %v3617_v46, %v3616_v9  ;;  %v3621_v5 = vor.u32 %v3620_v47, %v3619_v39  ;;  %v3624_v35 = vor.u32 %v3623_v24, %v3622_v23  ;;  %v1847_v9 = vpop.f32.mrf.mxu1 }
 0x2fd   :  { %v3473_v34 = vsel %vm8575_vm11, %v8325_v45, %v3470_v12  ;;  %v3478_v29 = vadd.s32 3, %v3474_v26  ;;  %v8629_v44 = vsub.s32 %v3757_v16, %v3760_v49  ;;  %v8631_v61 = vadd.f32 %v5934_v50, %v1596_v17  ;;  %v1589_v26 = vpop.f32.mrf.mxu0 }
 0x2fe   :  { %6147 = vcosq.f32 %v3473_v34  ;;  %v3609_v1 = vshrl.u32 %v10121_v37, %v3608_v20  ;;  %vm3625_vm2 = vcmp.lt.s32.totalorder %v8595_v36, 1  ;;  %vm3627_vm0 = vcmp.lt.s32.totalorder %v8595_v36, 3 }
 0x2ff   :  { %6149 = vsinq.f32 %v3473_v34  ;;  %v3763_v27 = vsub.s32 0, %v8629_v44  ;;  %vm3628_vm4 = vcmp.lt.s32.totalorder %v8595_v36, 4  ;;  %v3633_v40 = vsel %vm3625_vm2, %v3612_v52, %v3615_v31 }
 0x300   :  { %v3630_v48 = vsel %vm3628_vm4, %v3618_v54, 2102212464  ;;  %v3634_v28 = vsel %vm3628_vm4, %v3621_v5, 920167782  ;;  %v3637_v17 = vsel %vm3625_vm2, %v3615_v31, %v3618_v54  ;;  %v3638_v33 = vsel %vm3628_vm4, %v3624_v35, 1326507024 }
 0x301   :  { %v5396_v20 = vmin.u32 %v3763_v27, %v8629_v44  ;;  %vm3626_vm5 = vcmp.lt.s32.totalorder %v8595_v36, 2  ;;  %v3635_v16 = vsel %vm3627_vm0, %v3618_v54, %v3634_v28  ;;  %v3639_v32 = vsel %vm3627_vm0, %v3621_v5, %v3638_v33 }
 0x302   :  { %v3636_v22 = vsel %vm3626_vm5, %v3633_v40, %v3635_v16  ;;  %v3640_v56 = vsel %vm3626_vm5, %v3637_v17, %v3639_v32  ;;  %v3641_v13 = vshll.u32 %v3601_v43, 8  ;;  %v1590_v30 = vadd.f32 %v1589_v26, %v7117_v41 }
 0x303   :  { %v3765_v19 = vclz %v5396_v20  ;;  %v3783_v42 = vsub.s32 4, %v3759_v25  ;;  %v3629_v7 = vsel %vm3625_vm2, %v3609_v1, %v3612_v52  ;;  %v3631_v38 = vsel %vm3627_vm0, %v3615_v31, %v3630_v48 }
 0x304   :  { %v8657_v55 = vmul.u32.u64.low %v3641_v13, %v3640_v56  ;;  %v8658_v63 = vmul.u32.u64.high %v3641_v13, %v3640_v56, %v8657_v55  ;;  %v8660_v46 = vmul.u32.u64.low %v3641_v13, %v3636_v22  ;;  %v8661_v47 = vmul.u32.u64.high %v3641_v13, %v3636_v22, %v8660_v46 }
 0x305   :  { %vm3699_vm6 = vcmp.lt.s32.totalorder %v8455_v2, 0  ;;  %v5397_v11 = vadd.s32 4294967294, %v3765_v19  ;;  %v3908_v41 = vand.u32 2139095040, %v8631_v61  ;;  %v3479_v24 = vand.u32 3, %v3478_v29 }
 0x306   :  { %vm8668_vm7 = vcmp.le.f32.partialorder %v3697_v58, 0.7853982  ;;  %v3753_v57 = vadd.s32 %v8560_v10, %v8569_v21  ;;  %v3632_v39 = vsel %vm3626_vm5, %v3629_v7, %v3631_v38  ;;  %v3784_v23 = vsel %vm3699_vm6, %v3783_v42, %v3759_v25  ;;  %v5887_v42 = vpop.f32.mrf.mxu0 }
 0x307   :  { %vm5398_vm8 = vcmp.lt.s32.totalorder %v5397_v11, 0  ;;  %v3905_v50 = vand.u32 2147483647, %v8631_v61  ;;  %v3909_v49 = vshrl.u32 %v3908_v41, 23  ;;  %vm3650_vm9 = vc.u32 %v8658_v63, %v8660_v46 }
 0x308   :  { %v3768_v43 = vsel %vm5398_vm8, 0, %v5397_v11  ;;  %v3651_v58 = vadd.s32 1, %v8661_v47  ;;  %v8682_v52 = vadd.f32 %v1847_v9, %v1590_v30  ;;  %v3648_v21 = vmul.u32 %v3641_v13, %v3632_v39  ;;  %v10174_v9 = vld [vmem:[#allocation19_spill] sm:$0xff] }
 0x309   :  { %v3769_v31 = vsub.s32 32, %v3768_v43  ;;  %v3773_v10 = vsub.s32 4294967266, %v3768_v43  ;;  %v5403_v36 = vadd.s32 4294967169, %v3909_v49  ;;  %vm3480_vm10 = vcmp.lt.s32.totalorder %v3479_v24, 2 }
 0x30a   :  { %vm3484_vm11 = vcmp.eq.s32.totalorder %v3479_v24, 2  ;;  %v3770_v18 = vshll.u32 %v8629_v44, %v3768_v43  ;;  %v3652_v25 = vsel %vm3650_vm9, %v3651_v58, %v8661_v47  ;;  %v3786_v27 = vsel %vm8668_vm7, 0, %v3784_v23 }
 0x30b   :  { %v6148_v12 = vpop.eup %6147  ;;  %v3771_v54 = vshrl.u32 %v3753_v57, %v3769_v31  ;;  %v3774_v5 = vadd.s32 127, %v3773_v10  ;;  %v3653_v35 = vadd.s32 %v3652_v25, %v3648_v21  ;;  %v3915_v34 = vadd.s32 1, %v5403_v36 }
 0x30c   :  { %v6150_v29 = vpop.eup %6149  ;;  %v3485_v1 = vxor.u32 2147483648, %v6148_v12  ;;  %v3912_v40 = vand.u32 8388607, %v3905_v50  ;;  %v3804_v26 = vand.u32 2139095040, %v8682_v52  ;;  %vm3481_vm12 = vcmp.eq.s32.totalorder %v3479_v24, 0 }
 0x30d   :  { %v3482_v48 = vxor.u32 2147483648, %v6150_v29  ;;  %v3772_v28 = vor.u32 %v3771_v54, %v3770_v18  ;;  %v3775_v44 = vshll.u32 %v3774_v5, 23  ;;  %v3654_v17 = vadd.s32 536870912, %v3653_v35 }
 0x30e   :  { %v3486_v33 = vsel %vm3484_vm11, %v3485_v1, %v6150_v29  ;;  %vm3916_vm13 = vcmp.gt.s32.totalorder %v3915_v34, 0  ;;  %v3805_v20 = vshrl.u32 %v3804_v26, 23  ;;  %v3790_v22 = vadd.s32 3, %v3786_v27 }
 0x30f   :  { %v3483_v16 = vsel %vm3481_vm12, %v6148_v12, %v3482_v48  ;;  %v3776_v32 = vor.u32 4788187, %v3775_v44  ;;  %v3655_v56 = vshrl.u32 %v3654_v17, 30  ;;  %vm3477_vm14 = vweird.f32 %v8325_v45 }
 0x310   :  { %v3487_v13 = vsel %vm3480_vm10, %v3483_v16, %v3486_v33  ;;  %v3913_v30 = vor.u32 8388608, %v3912_v40  ;;  %v3917_v19 = vsel %vm3916_vm13, %v3915_v34, 0  ;;  %v3779_v55 = vcvt.s32.f32 %v3772_v28 }
 0x311   :  { %v3488_v7 = vsel %vm3477_vm14, nan, %v3487_v13  ;;  %v3777_v38 = vand.u32 2147483647, %v3776_v32  ;;  %v3656_v47 = vshll.u32 %v3655_v56, 30  ;;  %vm3595_vm3 = vcmp.lt.s32.totalorder %v8482_v4, 0 }
 0x312   :  { %5272 = vst.msk [vmem:[%s9909_s2 + $0x70] sm:$0xff] %vm5257_vm15, %v3488_v7  ;;  %v3919_v11 = vand.u32 31, %v3917_v19  ;;  %v5399_v41 = vadd.s32 4294967169, %v3805_v20  ;;  %v8704_v24 = vand.u32 3, %v3790_v22  ;;  %v8709_v39 = vadd.f32 %v5887_v42, %v7120_v51 }
 0x313   :  { %5304 = vst.msk [vmem:[%s9909_s2 + $0x70] sm:$0xff] %vm49_vm1, %v10174_v9  ;;  %v3780_v45 = vmul.f32 %v3779_v55, %v3777_v38  ;;  %v8706_v57 = vsub.s32 %v3653_v35, %v3656_v47  ;;  %v3649_v23 = vadd.s32 %v8660_v46, %v8658_v63  ;;  %v3679_v49 = vsub.s32 4, %v3655_v56 }
 0x314   :  { %v3920_v43 = vsub.s32 32, %v3919_v11  ;;  %v8713_v58 = vshll.u32 %v3913_v30, 8  ;;  %v3918_v21 = vshrl.u32 %v3917_v19, 5  ;;  %v3801_v36 = vand.u32 2147483647, %v8682_v52 }
 0x315   :  { %v3781_v31 = vxor.u32 2147483648, %v3780_v45  ;;  %v3659_v10 = vsub.s32 0, %v8706_v57  ;;  %v3811_v12 = vadd.s32 1, %v5399_v41  ;;  %v3922_v54 = vshll.u32 %v10121_v37, %v3919_v11 }
 0x316   :  { %v3923_v18 = vshrl.u32 %v10117_v15, %v3920_v43  ;;  %v3926_v25 = vshrl.u32 %v10113_v62, %v3920_v43  ;;  %v3929_v51 = vshrl.u32 %v10114_v53, %v3920_v43  ;;  %v3928_v5 = vshll.u32 %v10113_v62, %v3919_v11 }
 0x317   :  { %v3782_v63 = vsel %vm3699_vm6, %v3781_v31, %v3780_v45  ;;  %v5392_v46 = vmin.u32 %v3659_v10, %v8706_v57  ;;  %v8730_v34 = vsel %vm3595_vm3, %v3679_v49, %v3655_v56  ;;  %v3921_v29 = vshrl.u32 %v10121_v37, %v3920_v43 }
 0x318   :  { %v3785_v35 = vsel %vm8668_vm7, %v8455_v2, %v3782_v63  ;;  %v3925_v1 = vshll.u32 %v10117_v15, %v3919_v11  ;;  %v3924_v40 = vor.u32 %v3923_v18, %v3922_v54  ;;  %v3930_v26 = vor.u32 %v3929_v51, %v3928_v5 }
 0x319   :  { %6151 = vcosq.f32 %v3785_v35  ;;  %v3661_v27 = vclz %v5392_v46  ;;  %v3931_v28 = vshll.u32 %v10114_v53, %v3919_v11  ;;  %v3932_v44 = vshrl.u32 %v10115_v0, %v3920_v43 }
 0x31a   :  { %6153 = vsinq.f32 %v3785_v35  ;;  %v3927_v48 = vor.u32 %v3926_v25, %v3925_v1  ;;  %v3934_v17 = vshll.u32 %v10115_v0, %v3919_v11  ;;  %v3935_v33 = vshrl.u32 %v10116_v14, %v3920_v43  ;;  %v5937_v25 = vpop.f32.mrf.mxu1 }
 0x31b   :  { %v5393_v59 = vadd.s32 4294967294, %v3661_v27  ;;  %vm3937_vm2 = vcmp.lt.s32.totalorder %v3918_v21, 1  ;;  %v3933_v20 = vor.u32 %v3932_v44, %v3931_v28  ;;  %vm3938_vm0 = vcmp.lt.s32.totalorder %v3918_v21, 2 }
 0x31c   :  { %vm3939_vm4 = vcmp.lt.s32.totalorder %v3918_v21, 3  ;;  %vm3940_vm5 = vcmp.lt.s32.totalorder %v3918_v21, 4  ;;  %v3936_v16 = vor.u32 %v3935_v33, %v3934_v17  ;;  %v3941_v32 = vsel %vm3937_vm2, %v3921_v29, %v3924_v40 }
 0x31d   :  { %vm5394_vm6 = vcmp.lt.s32.totalorder %v5393_v59, 0  ;;  %v3942_v22 = vsel %vm3940_vm5, %v3930_v26, 2102212464  ;;  %v3945_v30 = vsel %vm3937_vm2, %v3924_v40, %v3927_v48  ;;  %v3946_v19 = vsel %vm3940_vm5, %v3933_v20, 920167782 }
 0x31e   :  { %v3664_v56 = vsel %vm5394_vm6, 0, %v5393_v59  ;;  %v3943_v13 = vsel %vm3939_vm4, %v3927_v48, %v3942_v22  ;;  %v3949_v55 = vsel %vm3937_vm2, %v3927_v48, %v3930_v26  ;;  %v3947_v11 = vsel %vm3939_vm4, %v3930_v26, %v3946_v19 }
 0x31f   :  { %v3665_v42 = vsub.s32 32, %v3664_v56  ;;  %v3666_v7 = vshll.u32 %v8706_v57, %v3664_v56  ;;  %v3669_v38 = vsub.s32 4294967266, %v3664_v56  ;;  %v3944_v47 = vsel %vm3938_vm0, %v3941_v32, %v3943_v13 }
 0x320   :  { %v3950_v41 = vsel %vm3940_vm5, %v3936_v16, 1326507024  ;;  %vm3812_vm7 = vcmp.gt.s32.totalorder %v3811_v12, 0  ;;  %v3948_v49 = vsel %vm3938_vm0, %v3945_v30, %v3947_v11  ;;  %vm3789_vm8 = vweird.f32 %v8455_v2 }
 0x321   :  { %v3667_v9 = vshrl.u32 %v3649_v23, %v3665_v42  ;;  %v3670_v45 = vadd.s32 127, %v3669_v38  ;;  %v3951_v43 = vsel %vm3939_vm4, %v3933_v20, %v3950_v41  ;;  %v3813_v18 = vsel %vm3812_vm7, %v3811_v12, 0 }
 0x322   :  { %v3952_v31 = vsel %vm3938_vm0, %v3949_v55, %v3951_v43  ;;  %v8749_v10 = vmul.u32.u64.low %v8713_v58, %v3948_v49  ;;  %v8750_v57 = vmul.u32.u64.high %v8713_v58, %v3948_v49, %v8749_v10  ;;  %vm3792_vm9 = vcmp.lt.s32.totalorder %v8704_v24, 2 }
 0x323   :  { %v3668_v51 = vor.u32 %v3667_v9, %v3666_v7  ;;  %v3671_v63 = vshll.u32 %v3670_v45, 23  ;;  %v8755_v23 = vmul.u32.u64.low %v8713_v58, %v3952_v31  ;;  %v8756_v46 = vmul.u32.u64.high %v8713_v58, %v3952_v31, %v8755_v23  ;;  %v10177_v45 = vld [vmem:[#allocation28_spill] sm:$0xff] }
 0x324   :  { %vm3793_vm10 = vcmp.eq.s32.totalorder %v8704_v24, 0  ;;  %vm8762_vm11 = vcmp.le.f32.partialorder %v3593_v3, 0.7853982  ;;  %v3815_v12 = vand.u32 31, %v3813_v18  ;;  %vm3796_vm12 = vcmp.eq.s32.totalorder %v8704_v24, 2 }
 0x325   :  { %v3672_v54 = vor.u32 4788187, %v3671_v63  ;;  %v8769_v5 = vand.u32 8388607, %v3801_v36  ;;  %v8772_v35 = vadd.f32 %v5937_v25, %v8709_v39  ;;  %v3682_v1 = vsel %vm8762_vm11, 0, %v8730_v34 }
 0x326   :  { %v6152_v29 = vpop.eup %6151  ;;  %v3960_v3 = vmul.u32 %v8713_v58, %v3944_v47  ;;  %v3963_v27 = vadd.s32 1, %v8750_v57  ;;  %v3816_v40 = vsub.s32 32, %v3815_v12  ;;  %v3675_v44 = vcvt.s32.f32 %v3668_v51 }
 0x327   :  { %v6154_v26 = vpop.eup %6153  ;;  %v3797_v48 = vxor.u32 2147483648, %v6152_v29  ;;  %v3673_v28 = vand.u32 2147483647, %v3672_v54  ;;  %vm3962_vm13 = vc.u32 %v8756_v46, %v8749_v10  ;;  %v3818_v17 = vshll.u32 %v10121_v37, %v3815_v12 }
 0x328   :  { %v3794_v59 = vxor.u32 2147483648, %v6154_v26  ;;  %v3964_v39 = vsel %vm3962_vm13, %v3963_v27, %v8750_v57  ;;  %v3819_v33 = vshrl.u32 %v10117_v15, %v3816_v40  ;;  %v3822_v16 = vshrl.u32 %v10113_v62, %v3816_v40 }
 0x329   :  { %v3798_v58 = vsel %vm3796_vm12, %v3797_v48, %v6154_v26  ;;  %v3676_v34 = vmul.f32 %v3675_v44, %v3673_v28  ;;  %v3965_v20 = vadd.s32 %v3964_v39, %v3960_v3  ;;  %v3814_v22 = vshrl.u32 %v3813_v18, 5 }
 0x32a   :  { %v3795_v32 = vsel %vm3793_vm10, %v6152_v29, %v3794_v59  ;;  %v3820_v56 = vor.u32 %v3819_v33, %v3818_v17  ;;  %v3821_v13 = vshll.u32 %v10117_v15, %v3815_v12  ;;  %v3825_v7 = vshrl.u32 %v10114_v53, %v3816_v40 }
 0x32b   :  { %v3799_v30 = vsel %vm3792_vm9, %v3795_v32, %v3798_v58  ;;  %v3677_v19 = vxor.u32 2147483648, %v3676_v34  ;;  %v3966_v42 = vadd.s32 536870912, %v3965_v20  ;;  %v3824_v55 = vshll.u32 %v10113_v62, %v3815_v12 }
 0x32c   :  { %v3800_v38 = vsel %vm3789_vm8, nan, %v3799_v30  ;;  %v3827_v47 = vshll.u32 %v10114_v53, %v3815_v12  ;;  %v3828_v11 = vshrl.u32 %v10115_v0, %v3816_v40  ;;  %v3823_v9 = vor.u32 %v3822_v16, %v3821_v13  ;;  %v1601_v16 = vpop.f32.mrf.mxu0 }
 0x32d   :  { %5275 = vst.msk [vmem:[%s9909_s2 + $0x88] sm:$0xff] %vm5257_vm15, %v3800_v38  ;;  %v3678_v24 = vsel %vm3595_vm3, %v3677_v19, %v3676_v34  ;;  %v8804_v41 = vshrl.u32 %v3966_v42, 30  ;;  %v3831_v2 = vshrl.u32 %v10116_v14, %v3816_v40  ;;  %v3830_v31 = vshll.u32 %v10115_v0, %v3815_v12 }
 0x32e   :  { %5307 = vst.msk [vmem:[%s9909_s2 + $0x88] sm:$0xff] %vm49_vm1, %v10177_v45  ;;  %v3681_v49 = vsel %vm8762_vm11, %v8482_v4, %v3678_v24  ;;  %v3829_v43 = vor.u32 %v3828_v11, %v3827_v47  ;;  %v3809_v18 = vor.u32 8388608, %v8769_v5  ;;  %v3826_v25 = vor.u32 %v3825_v7, %v3824_v55 }
 0x32f   :  { %6155 = vcosq.f32 %v3681_v49  ;;  %v3968_v57 = vshll.u32 %v8804_v41, 30  ;;  %v3686_v51 = vadd.s32 3, %v3682_v1  ;;  %v3832_v63 = vor.u32 %v3831_v2, %v3830_v31 }
 0x330   :  { %6157 = vsinq.f32 %v3681_v49  ;;  %vm3833_vm14 = vcmp.lt.s32.totalorder %v3814_v22, 1  ;;  %vm3836_vm3 = vcmp.lt.s32.totalorder %v3814_v22, 4  ;;  %v4116_v21 = vand.u32 2139095040, %v8772_v35 }
 0x331   :  { %v8818_v23 = vsub.s32 %v3965_v20, %v3968_v57  ;;  %v3841_v54 = vsel %vm3833_vm14, %v3820_v56, %v3823_v9  ;;  %v3817_v29 = vshrl.u32 %v10121_v37, %v3816_v40  ;;  %vm3834_vm2 = vcmp.lt.s32.totalorder %v3814_v22, 2  ;;  %v1859_v57 = vpop.f32.mrf.mxu1 }
 0x332   :  { %vm3835_vm0 = vcmp.lt.s32.totalorder %v3814_v22, 3  ;;  %v3842_v12 = vsel %vm3836_vm3, %v3829_v43, 920167782  ;;  %v3838_v5 = vsel %vm3836_vm3, %v3826_v25, 2102212464  ;;  %v3845_v1 = vsel %vm3833_vm14, %v3823_v9, %v3826_v25 }
 0x333   :  { %v3971_v3 = vsub.s32 0, %v8818_v23  ;;  %v3843_v27 = vsel %vm3835_vm0, %v3826_v25, %v3842_v12  ;;  %v3687_v26 = vand.u32 3, %v3686_v51  ;;  %v3846_v28 = vsel %vm3836_vm3, %v3832_v63, 1326507024 }
 0x334   :  { %v3844_v48 = vsel %vm3834_vm2, %v3841_v54, %v3843_v27  ;;  %v3849_v44 = vshll.u32 %v3809_v18, 8  ;;  %v3837_v39 = vsel %vm3833_vm14, %v3817_v29, %v3820_v56  ;;  %v3847_v17 = vsel %vm3835_vm0, %v3829_v43, %v3846_v28  ;;  %v5890_v29 = vpop.f32.mrf.mxu0 }
 0x335   :  { %v5404_v59 = vmin.u32 %v3971_v3, %v8818_v23  ;;  %v4117_v40 = vshrl.u32 %v4116_v21, 23  ;;  %v3839_v33 = vsel %vm3835_vm0, %v3823_v9, %v3838_v5  ;;  %v3848_v58 = vsel %vm3834_vm2, %v3845_v1, %v3847_v17 }
 0x336   :  { %v8829_v34 = vmul.u32.u64.low %v3849_v44, %v3844_v48  ;;  %v8830_v20 = vmul.u32.u64.high %v3849_v44, %v3844_v48, %v8829_v34  ;;  %vm3907_vm4 = vcmp.lt.s32.totalorder %v8631_v61, 0  ;;  %vm3685_vm5 = vweird.f32 %v8482_v4 }
 0x337   :  { %v3973_v32 = vclz %v5404_v59  ;;  %v8834_v13 = vmul.u32.u64.low %v3849_v44, %v3848_v58  ;;  %v8835_v30 = vmul.u32.u64.high %v3849_v44, %v3848_v58, %v8834_v13  ;;  %v5411_v19 = vadd.s32 4294967169, %v4117_v40 }
 0x338   :  { %v3840_v42 = vsel %vm3834_vm2, %v3837_v39, %v3839_v33  ;;  %v4113_v7 = vand.u32 2147483647, %v8772_v35  ;;  %v1602_v38 = vadd.f32 %v1601_v16, %v7123_v60  ;;  %vm3688_vm6 = vcmp.lt.s32.totalorder %v3687_v26, 2  ;;  %v10180_v33 = vld [vmem:[#allocation27_spill] sm:$0xff] }
 0x339   :  { %v5405_v56 = vadd.s32 4294967294, %v3973_v32  ;;  %vm3689_vm7 = vcmp.eq.s32.totalorder %v3687_v26, 0  ;;  %v3859_v55 = vadd.s32 1, %v8830_v20  ;;  %v4123_v47 = vadd.s32 1, %v5411_v19 }
 0x33a   :  { %vm3692_vm8 = vcmp.eq.s32.totalorder %v3687_v26, 2  ;;  %v3961_v11 = vadd.s32 %v8749_v10, %v8756_v46  ;;  %v3991_v24 = vsub.s32 4, %v8804_v41  ;;  %v3856_v22 = vmul.u32 %v3849_v44, %v3840_v42 }
 0x33b   :  { %vm5406_vm9 = vcmp.lt.s32.totalorder %v5405_v56, 0  ;;  %vm3858_vm10 = vc.u32 %v8835_v30, %v8829_v34  ;;  %vm4124_vm11 = vcmp.gt.s32.totalorder %v4123_v47, 0  ;;  %v4120_v31 = vand.u32 8388607, %v4113_v7 }
 0x33c   :  { %v6156_v9 = vpop.eup %6155  ;;  %v3976_v2 = vsel %vm5406_vm9, 0, %v5405_v56  ;;  %v3860_v46 = vsel %vm3858_vm10, %v3859_v55, %v8830_v20  ;;  %v4125_v25 = vsel %vm4124_vm11, %v4123_v47, 0  ;;  %v3992_v3 = vsel %vm3907_vm4, %v3991_v24, %v8804_v41 }
 0x33d   :  { %v6158_v60 = vpop.eup %6157  ;;  %v3693_v45 = vxor.u32 2147483648, %v6156_v9  ;;  %v3977_v49 = vsub.s32 32, %v3976_v2  ;;  %v3981_v43 = vsub.s32 4294967266, %v3976_v2  ;;  %v3978_v10 = vshll.u32 %v8818_v23, %v3976_v2 }
 0x33e   :  { %v3690_v18 = vxor.u32 2147483648, %v6158_v60  ;;  %v3861_v21 = vadd.s32 %v3860_v46, %v3856_v22  ;;  %v4127_v5 = vand.u32 31, %v4125_v25  ;;  %v8856_v27 = vadd.f32 %v1859_v57, %v1602_v38 }
 0x33f   :  { %v3694_v51 = vsel %vm3692_vm8, %v3693_v45, %v6158_v60  ;;  %v3979_v63 = vshrl.u32 %v3961_v11, %v3977_v49  ;;  %v3982_v54 = vadd.s32 127, %v3981_v43  ;;  %vm8863_vm12 = vcmp.le.f32.partialorder %v3905_v50, 0.7853982 }
 0x340   :  { %v3691_v12 = vsel %vm3689_vm7, %v6156_v9, %v3690_v18  ;;  %v3862_v28 = vadd.s32 536870912, %v3861_v21  ;;  %v4128_v39 = vsub.s32 32, %v4127_v5  ;;  %v8868_v41 = vadd.f32 %v5890_v29, %v7126_v6 }
 0x341   :  { %v3695_v23 = vsel %vm3688_vm6, %v3691_v12, %v3694_v51  ;;  %v3980_v1 = vor.u32 %v3979_v63, %v3978_v10  ;;  %v3983_v48 = vshll.u32 %v3982_v54, 23  ;;  %v3994_v4 = vsel %vm8863_vm12, 0, %v3992_v3 }
 0x342   :  { %v3696_v44 = vsel %vm3685_vm5, nan, %v3695_v23  ;;  %v3863_v17 = vshrl.u32 %v3862_v28, 30  ;;  %v4121_v40 = vor.u32 8388608, %v4120_v31  ;;  %v8881_v50 = vshrl.u32 %v4125_v25, 5 }
 0x343   :  { %5274 = vst.msk [vmem:[%s9909_s2 + $0x80] sm:$0xff] %vm5257_vm15, %v3696_v44  ;;  %v3984_v26 = vor.u32 4788187, %v3983_v48  ;;  %v4131_v6 = vshrl.u32 %v10117_v15, %v4128_v39  ;;  %v4134_v58 = vshrl.u32 %v10113_v62, %v4128_v39  ;;  %v4012_v20 = vand.u32 2139095040, %v8856_v27 }
 0x344   :  { %5306 = vst.msk [vmem:[%s9909_s2 + $0x80] sm:$0xff] %vm49_vm1, %v10180_v33  ;;  %v3987_v32 = vcvt.s32.f32 %v3980_v1  ;;  %v3864_v13 = vshll.u32 %v3863_v17, 30  ;;  %v4137_v19 = vshrl.u32 %v10114_v53, %v4128_v39  ;;  %v4130_v56 = vshll.u32 %v10121_v37, %v4127_v5 }
 0x345   :  { %v3985_v16 = vand.u32 2147483647, %v3984_v26  ;;  %v4133_v42 = vshll.u32 %v10117_v15, %v4127_v5  ;;  %v4139_v38 = vshll.u32 %v10114_v53, %v4127_v5  ;;  %v4140_v55 = vshrl.u32 %v10115_v0, %v4128_v39 }
 0x346   :  { %v3998_v11 = vadd.s32 3, %v3994_v4  ;;  %v8891_v24 = vsub.s32 %v3861_v21, %v3864_v13  ;;  %v4136_v9 = vshll.u32 %v10113_v62, %v4127_v5  ;;  %v4132_v2 = vor.u32 %v4131_v6, %v4130_v56 }
 0x347   :  { %v3988_v47 = vmul.f32 %v3987_v32, %v3985_v16  ;;  %v4135_v22 = vor.u32 %v4134_v58, %v4133_v42  ;;  %v4141_v60 = vor.u32 %v4140_v55, %v4139_v38  ;;  %v4143_v45 = vshrl.u32 %v10116_v14, %v4128_v39 }
 0x348   :  { %vm3803_vm13 = vcmp.lt.s32.totalorder %v8682_v52, 0  ;;  %v3867_v43 = vsub.s32 0, %v8891_v24  ;;  %v4138_v31 = vor.u32 %v4137_v19, %v4136_v9  ;;  %v4142_v57 = vshll.u32 %v10115_v0, %v4127_v5 }
 0x349   :  { %v3989_v49 = vxor.u32 2147483648, %v3988_v47  ;;  %v4129_v18 = vshrl.u32 %v10121_v37, %v4128_v39  ;;  %vm4145_vm14 = vcmp.lt.s32.totalorder %v8881_v50, 1  ;;  %v4161_v10 = vshll.u32 %v4121_v40, 8 }
 0x34a   :  { %v4013_v46 = vshrl.u32 %v4012_v20, 23  ;;  %v5400_v51 = vmin.u32 %v3867_v43, %v8891_v24  ;;  %v4144_v63 = vor.u32 %v4143_v45, %v4142_v57  ;;  %vm4148_vm3 = vcmp.lt.s32.totalorder %v8881_v50, 4 }
 0x34b   :  { %v3990_v25 = vsel %vm3907_vm4, %v3989_v49, %v3988_v47  ;;  %v3887_v21 = vsub.s32 4, %v3863_v17  ;;  %v4153_v29 = vsel %vm4145_vm14, %v4132_v2, %v4135_v22  ;;  %v4154_v12 = vsel %vm4148_vm3, %v4141_v60, 920167782 }
 0x34c   :  { %v3993_v54 = vsel %vm8863_vm12, %v8631_v61, %v3990_v25  ;;  %v3869_v3 = vclz %v5400_v51  ;;  %vm4147_vm2 = vcmp.lt.s32.totalorder %v8881_v50, 3  ;;  %v4150_v5 = vsel %vm4148_vm3, %v4138_v31, 2102212464 }
 0x34d   :  { %6159 = vcosq.f32 %v3993_v54  ;;  %vm4146_vm0 = vcmp.lt.s32.totalorder %v8881_v50, 2  ;;  %v4149_v23 = vsel %vm4145_vm14, %v4129_v18, %v4132_v2  ;;  %v4155_v1 = vsel %vm4147_vm2, %v4138_v31, %v4154_v12 }
 0x34e   :  { %6161 = vsinq.f32 %v3993_v54  ;;  %v5401_v48 = vadd.s32 4294967294, %v3869_v3  ;;  %v4156_v28 = vsel %vm4146_vm0, %v4153_v29, %v4155_v1  ;;  %v4157_v44 = vsel %vm4145_vm14, %v4135_v22, %v4138_v31 }
 0x34f   :  { %v4158_v59 = vsel %vm4148_vm3, %v4144_v63, 1326507024  ;;  %v4151_v39 = vsel %vm4147_vm2, %v4135_v22, %v4150_v5  ;;  %v8923_v4 = vmul.u32.u64.low %v4161_v10, %v4156_v28  ;;  %v8924_v40 = vmul.u32.u64.high %v4161_v10, %v4156_v28, %v8923_v4 }
 0x350   :  { %v4159_v26 = vsel %vm4147_vm2, %v4141_v60, %v4158_v59  ;;  %vm5402_vm4 = vcmp.lt.s32.totalorder %v5401_v48, 0  ;;  %v4009_v6 = vand.u32 2147483647, %v8856_v27  ;;  %v5407_v58 = vadd.s32 4294967169, %v4013_v46 }
 0x351   :  { %v4160_v33 = vsel %vm4146_vm0, %v4157_v44, %v4159_v26  ;;  %v3872_v20 = vsel %vm5402_vm4, 0, %v5401_v48  ;;  %v3888_v16 = vsel %vm3803_vm13, %v3887_v21, %v3863_v17  ;;  %v3857_v19 = vadd.s32 %v8829_v34, %v8835_v30  ;;  %v5940_v30 = vpop.f32.mrf.mxu1 }
 0x352   :  { %v8932_v32 = vmul.u32.u64.low %v4161_v10, %v4160_v33  ;;  %v8933_v13 = vmul.u32.u64.high %v4161_v10, %v4160_v33, %v8932_v32  ;;  %v3873_v56 = vsub.s32 32, %v3872_v20  ;;  %v3877_v42 = vsub.s32 4294967266, %v3872_v20 }
 0x353   :  { %v4152_v38 = vsel %vm4146_vm0, %v4149_v23, %v4151_v39  ;;  %v3999_v55 = vand.u32 3, %v3998_v11  ;;  %vm8941_vm5 = vcmp.le.f32.partialorder %v3801_v36, 0.7853982  ;;  %v4171_v17 = vadd.s32 1, %v8924_v40 }
 0x354   :  { %v4019_v9 = vadd.s32 1, %v5407_v58  ;;  %v3874_v2 = vshll.u32 %v8891_v24, %v3872_v20  ;;  %v3875_v22 = vshrl.u32 %v3857_v19, %v3873_v56  ;;  %v3878_v60 = vadd.s32 127, %v3877_v42 }
 0x355   :  { %v3890_v34 = vsel %vm8941_vm5, 0, %v3888_v16  ;;  %v4168_v50 = vmul.u32 %v4161_v10, %v4152_v38  ;;  %vm4170_vm6 = vc.u32 %v8933_v13, %v8923_v4  ;;  %v4016_v36 = vand.u32 8388607, %v4009_v6 }
 0x356   :  { %vm4020_vm7 = vcmp.gt.s32.totalorder %v4019_v9, 0  ;;  %v3876_v11 = vor.u32 %v3875_v22, %v3874_v2  ;;  %v3879_v45 = vshll.u32 %v3878_v60, 23  ;;  %v4172_v49 = vsel %vm4170_vm6, %v4171_v17, %v8924_v40 }
 0x357   :  { %v4021_v43 = vsel %vm4020_vm7, %v4019_v9, 0  ;;  %v4173_v24 = vadd.s32 %v4172_v49, %v4168_v50  ;;  %v8955_v57 = vadd.f32 %v5940_v30, %v8868_v41  ;;  %vm3997_vm8 = vweird.f32 %v8631_v61  ;;  %v10183_v9 = vld [vmem:[#allocation30_spill] sm:$0xff] }
 0x358   :  { %v4023_v31 = vand.u32 31, %v4021_v43  ;;  %vm4000_vm9 = vcmp.lt.s32.totalorder %v3999_v55, 2  ;;  %vm4001_vm10 = vcmp.eq.s32.totalorder %v3999_v55, 0  ;;  %v3880_v18 = vor.u32 4788187, %v3879_v45 }
 0x359   :  { %vm4004_vm11 = vcmp.eq.s32.totalorder %v3999_v55, 2  ;;  %v3894_v46 = vadd.s32 3, %v3890_v34  ;;  %v4174_v25 = vadd.s32 536870912, %v4173_v24  ;;  %v3883_v29 = vcvt.s32.f32 %v3876_v11 }
 0x35a   :  { %v6160_v10 = vpop.eup %6159  ;;  %v4024_v51 = vsub.s32 32, %v4023_v31  ;;  %v3881_v21 = vand.u32 2147483647, %v3880_v18  ;;  %v4017_v12 = vor.u32 8388608, %v4016_v36  ;;  %v8960_v41 = vshrl.u32 %v4021_v43, 5 }
 0x35b   :  { %v6162_v63 = vpop.eup %6161  ;;  %v4005_v54 = vxor.u32 2147483648, %v6160_v10  ;;  %v8958_v5 = vshrl.u32 %v4174_v25, 30  ;;  %v4324_v23 = vand.u32 2139095040, %v8955_v57  ;;  %v4026_v28 = vshll.u32 %v10121_v37, %v4023_v31 }
 0x35c   :  { %v4002_v3 = vxor.u32 2147483648, %v6162_v63  ;;  %v3884_v48 = vmul.f32 %v3883_v29, %v3881_v21  ;;  %v4027_v44 = vshrl.u32 %v10117_v15, %v4024_v51  ;;  %v4030_v26 = vshrl.u32 %v10113_v62, %v4024_v51 }
 0x35d   :  { %v4006_v1 = vsel %vm4004_vm11, %v4005_v54, %v6162_v63  ;;  %v4176_v39 = vshll.u32 %v8958_v5, 30  ;;  %v4033_v40 = vshrl.u32 %v10114_v53, %v4024_v51  ;;  %v4029_v20 = vshll.u32 %v10117_v15, %v4023_v31 }
 0x35e   :  { %v4003_v59 = vsel %vm4001_vm10, %v6160_v10, %v4002_v3  ;;  %v3885_v58 = vxor.u32 2147483648, %v3884_v48  ;;  %v4032_v16 = vshll.u32 %v10113_v62, %v4023_v31  ;;  %v4035_v56 = vshll.u32 %v10114_v53, %v4023_v31 }
 0x35f   :  { %v4007_v33 = vsel %vm4000_vm9, %v4003_v59, %v4006_v1  ;;  %v8974_v19 = vsub.s32 %v4173_v24, %v4176_v39  ;;  %v4036_v42 = vshrl.u32 %v10115_v0, %v4024_v51  ;;  %v4028_v55 = vor.u32 %v4027_v44, %v4026_v28 }
 0x360   :  { %v4008_v32 = vsel %vm3997_vm8, nan, %v4007_v33  ;;  %v3886_v38 = vsel %vm3803_vm13, %v3885_v58, %v3884_v48  ;;  %v4038_v17 = vshll.u32 %v10115_v0, %v4023_v31  ;;  %v4039_v61 = vshrl.u32 %v10116_v14, %v4024_v51  ;;  %v1613_v48 = vpop.f32.mrf.mxu0 }
 0x361   :  { %5277 = vst.msk [vmem:[%s9909_s2 + $0x98] sm:$0xff] %vm5257_vm15, %v4008_v32  ;;  %v3889_v2 = vsel %vm8941_vm5, %v8682_v52, %v3886_v38  ;;  %v4179_v22 = vsub.s32 0, %v8974_v19  ;;  %v4031_v60 = vor.u32 %v4030_v26, %v4029_v20  ;;  %v4034_v34 = vor.u32 %v4033_v40, %v4032_v16 }
 0x362   :  { %5309 = vst.msk [vmem:[%s9909_s2 + $0x98] sm:$0xff] %vm49_vm1, %v10183_v9  ;;  %6163 = vcosq.f32 %v3889_v2  ;;  %v4037_v30 = vor.u32 %v4036_v42, %v4035_v56  ;;  %v4040_v50 = vor.u32 %v4039_v61, %v4038_v17  ;;  %v8995_v36 = vand.u32 3, %v3894_v46 }
 0x363   :  { %6165 = vsinq.f32 %v3889_v2  ;;  %v5412_v11 = vmin.u32 %v4179_v22, %v8974_v19  ;;  %vm4041_vm12 = vcmp.lt.s32.totalorder %v8960_v41, 1  ;;  %vm4043_vm13 = vcmp.lt.s32.totalorder %v8960_v41, 3 }
 0x364   :  { %v4057_v45 = vshll.u32 %v4017_v12, 8  ;;  %v4325_v49 = vshrl.u32 %v4324_v23, 23  ;;  %vm4044_vm14 = vcmp.lt.s32.totalorder %v8960_v41, 4  ;;  %v4049_v43 = vsel %vm4041_vm12, %v4028_v55, %v4031_v60 }
 0x365   :  { %v4181_v47 = vclz %v5412_v11  ;;  %v4053_v24 = vsel %vm4041_vm12, %v4031_v60, %v4034_v34  ;;  %v4025_v31 = vshrl.u32 %v10121_v37, %v4024_v51  ;;  %v4046_v18 = vsel %vm4044_vm14, %v4034_v34, 2102212464 }
 0x366   :  { %v4050_v10 = vsel %vm4044_vm14, %v4037_v30, 920167782  ;;  %v4054_v46 = vsel %vm4044_vm14, %v4040_v50, 1326507024  ;;  %vm4042_vm3 = vcmp.lt.s32.totalorder %v8960_v41, 2  ;;  %v5419_v12 = vadd.s32 4294967169, %v4325_v49 }
 0x367   :  { %v5413_v25 = vadd.s32 4294967294, %v4181_v47  ;;  %v4051_v63 = vsel %vm4043_vm13, %v4034_v34, %v4050_v10  ;;  %v4055_v54 = vsel %vm4043_vm13, %v4037_v30, %v4054_v46  ;;  %v4045_v21 = vsel %vm4041_vm12, %v4025_v31, %v4028_v55 }
 0x368   :  { %v4052_v29 = vsel %vm4042_vm3, %v4049_v43, %v4051_v63  ;;  %v4056_v51 = vsel %vm4042_vm3, %v4053_v24, %v4055_v54  ;;  %v4047_v3 = vsel %vm4043_vm13, %v4031_v60, %v4046_v18  ;;  %vm4115_vm0 = vcmp.lt.s32.totalorder %v8772_v35, 0 }
 0x369   :  { %vm5414_vm2 = vcmp.lt.s32.totalorder %v5413_v25, 0  ;;  %v9019_v23 = vmul.u32.u64.low %v4057_v45, %v4056_v51  ;;  %v9020_v1 = vmul.u32.u64.high %v4057_v45, %v4056_v51, %v9019_v23  ;;  %v4169_v39 = vadd.s32 %v8923_v4, %v8933_v13  ;;  %v1871_v4 = vpop.f32.mrf.mxu1 }
 0x36a   :  { %v4184_v28 = vsel %vm5414_vm2, 0, %v5413_v25  ;;  %v9023_v44 = vmul.u32.u64.low %v4057_v45, %v4052_v29  ;;  %v9024_v59 = vmul.u32.u64.high %v4057_v45, %v4052_v29, %v9023_v44  ;;  %v4331_v33 = vadd.s32 1, %v5419_v12  ;;  %v10186_v23 = vld [vmem:[#allocation29_spill] sm:$0xff] }
 0x36b   :  { %v4185_v26 = vsub.s32 32, %v4184_v28  ;;  %v4189_v40 = vsub.s32 4294967266, %v4184_v28  ;;  %vm3893_vm4 = vweird.f32 %v8682_v52  ;;  %vm3896_vm5 = vcmp.lt.s32.totalorder %v8995_v36, 2 }
 0x36c   :  { %vm3897_vm6 = vcmp.eq.s32.totalorder %v8995_v36, 0  ;;  %v4048_v58 = vsel %vm4042_vm3, %v4045_v21, %v4047_v3  ;;  %v1614_v20 = vadd.f32 %v1613_v48, %v7129_v8  ;;  %v4186_v16 = vshll.u32 %v8974_v19, %v4184_v28 }
 0x36d   :  { %v4187_v32 = vshrl.u32 %v4169_v39, %v4185_v26  ;;  %v4190_v56 = vadd.s32 127, %v4189_v40  ;;  %vm4066_vm7 = vc.u32 %v9020_v1, %v9023_v44  ;;  %v4199_v13 = vsub.s32 4, %v8958_v5 }
 0x36e   :  { %v4067_v42 = vadd.s32 1, %v9024_v59  ;;  %v4321_v38 = vand.u32 2147483647, %v8955_v57  ;;  %vm4332_vm8 = vcmp.gt.s32.totalorder %v4331_v33, 0  ;;  %v4064_v61 = vmul.u32 %v4057_v45, %v4048_v58 }
 0x36f   :  { %v6164_v55 = vpop.eup %6163  ;;  %v4188_v41 = vor.u32 %v4187_v32, %v4186_v16  ;;  %v4191_v17 = vshll.u32 %v4190_v56, 23  ;;  %v4333_v8 = vsel %vm4332_vm8, %v4331_v33, 0  ;;  %v9042_v60 = vadd.f32 %v1871_v4, %v1614_v20 }
 0x370   :  { %v6166_v9 = vpop.eup %6165  ;;  %v3901_v19 = vxor.u32 2147483648, %v6164_v55  ;;  %v4068_v2 = vsel %vm4066_vm7, %v4067_v42, %v9024_v59  ;;  %v4335_v22 = vand.u32 31, %v4333_v8  ;;  %vm3900_vm9 = vcmp.eq.s32.totalorder %v8995_v36, 2 }
 0x371   :  { %v3898_v34 = vxor.u32 2147483648, %v6166_v9  ;;  %vm9047_vm10 = vcmp.le.f32.partialorder %v4113_v7, 0.7853982  ;;  %v4192_v50 = vor.u32 4788187, %v4191_v17  ;;  %v4069_v11 = vadd.s32 %v4068_v2, %v4064_v61 }
 0x372   :  { %v3902_v45 = vsel %vm3900_vm9, %v3901_v19, %v6166_v9  ;;  %v4200_v49 = vsel %vm4115_vm0, %v4199_v13, %v8958_v5  ;;  %v4328_v47 = vand.u32 8388607, %v4321_v38  ;;  %v4336_v43 = vsub.s32 32, %v4335_v22 }
 0x373   :  { %v3899_v24 = vsel %vm3897_vm6, %v6164_v55, %v3898_v34  ;;  %v4193_v31 = vand.u32 2147483647, %v4192_v50  ;;  %v4195_v18 = vcvt.s32.f32 %v4188_v41  ;;  %v4070_v7 = vadd.s32 536870912, %v4069_v11 }
 0x374   :  { %v3903_v10 = vsel %vm3896_vm5, %v3899_v24, %v3902_v45  ;;  %v4339_v46 = vshrl.u32 %v10117_v15, %v4336_v43  ;;  %v4342_v25 = vshrl.u32 %v10113_v62, %v4336_v43  ;;  %v4220_v63 = vand.u32 2139095040, %v9042_v60 }
 0x375   :  { %v3904_v5 = vsel %vm3893_vm4, nan, %v3903_v10  ;;  %v4196_v54 = vmul.f32 %v4195_v18, %v4193_v31  ;;  %v9065_v21 = vshrl.u32 %v4070_v7, 30  ;;  %v4345_v29 = vshrl.u32 %v10114_v53, %v4336_v43  ;;  %v5893_v31 = vpop.f32.mrf.mxu0 }
 0x376   :  { %5276 = vst.msk [vmem:[%s9909_s2 + $0x90] sm:$0xff] %vm5257_vm15, %v3904_v5  ;;  %v4334_v36 = vshrl.u32 %v4333_v8, 5  ;;  %v4338_v51 = vshll.u32 %v10121_v37, %v4335_v22  ;;  %v4341_v12 = vshll.u32 %v10117_v15, %v4335_v22  ;;  %v4348_v3 = vshrl.u32 %v10115_v0, %v4336_v43 }
 0x377   :  { %5308 = vst.msk [vmem:[%s9909_s2 + $0x90] sm:$0xff] %vm49_vm1, %v10186_v23  ;;  %v4197_v52 = vxor.u32 2147483648, %v4196_v54  ;;  %v4072_v48 = vshll.u32 %v9065_v21, 30  ;;  %v4344_v28 = vshll.u32 %v10113_v62, %v4335_v22  ;;  %v4347_v59 = vshll.u32 %v10114_v53, %v4335_v22 }
 0x378   :  { %v4340_v39 = vor.u32 %v4339_v46, %v4338_v51  ;;  %v4343_v26 = vor.u32 %v4342_v25, %v4341_v12  ;;  %v4350_v40 = vshll.u32 %v10115_v0, %v4335_v22  ;;  %v4351_v33 = vshrl.u32 %v10116_v14, %v4336_v43  ;;  %v10187_v51 = vld [vmem:[#allocation9_spill] sm:$0xff] }
 0x379   :  { %v4198_v58 = vsel %vm4115_vm0, %v4197_v52, %v4196_v54  ;;  %v9087_v20 = vsub.s32 %v4069_v11, %v4072_v48  ;;  %v4346_v16 = vor.u32 %v4345_v29, %v4344_v28  ;;  %v4349_v32 = vor.u32 %v4348_v3, %v4347_v59 }
 0x37a   :  { %v4201_v56 = vsel %vm9047_vm10, %v8772_v35, %v4198_v58  ;;  %v4202_v4 = vsel %vm9047_vm10, 0, %v4200_v49  ;;  %v4329_v13 = vor.u32 8388608, %v4328_v47  ;;  %v4352_v42 = vor.u32 %v4351_v33, %v4350_v40 }
 0x37b   :  { %6167 = vcosq.f32 %v4201_v56  ;;  %v4075_v55 = vsub.s32 0, %v9087_v20  ;;  %v4337_v41 = vshrl.u32 %v10121_v37, %v4336_v43  ;;  %v4221_v17 = vshrl.u32 %v4220_v63, 23 }
 0x37c   :  { %6169 = vsinq.f32 %v4201_v56  ;;  %vm4353_vm11 = vcmp.lt.s32.totalorder %v4334_v36, 1  ;;  %vm4355_vm12 = vcmp.lt.s32.totalorder %v4334_v36, 3  ;;  %vm4356_vm13 = vcmp.lt.s32.totalorder %v4334_v36, 4 }
 0x37d   :  { %v5408_v61 = vmin.u32 %v4075_v55, %v9087_v20  ;;  %v4358_v8 = vsel %vm4356_vm13, %v4346_v16, 2102212464  ;;  %v4361_v9 = vsel %vm4353_vm11, %v4340_v39, %v4343_v26  ;;  %v4362_v19 = vsel %vm4356_vm13, %v4349_v32, 920167782 }
 0x37e   :  { %v4206_v2 = vadd.s32 3, %v4202_v4  ;;  %v4363_v22 = vsel %vm4355_vm12, %v4346_v16, %v4362_v19  ;;  %v4365_v34 = vsel %vm4353_vm11, %v4343_v26, %v4346_v16  ;;  %v4366_v30 = vsel %vm4356_vm13, %v4352_v42, 1326507024 }
 0x37f   :  { %v4077_v50 = vclz %v5408_v61  ;;  %vm4354_vm14 = vcmp.lt.s32.totalorder %v4334_v36, 2  ;;  %v4357_v11 = vsel %vm4353_vm11, %v4337_v41, %v4340_v39  ;;  %v4369_v45 = vshll.u32 %v4329_v13, 8 }
 0x380   :  { %v4359_v49 = vsel %vm4355_vm12, %v4343_v26, %v4358_v8  ;;  %v4364_v47 = vsel %vm4354_vm14, %v4361_v9, %v4363_v22  ;;  %v4367_v43 = vsel %vm4355_vm12, %v4349_v32, %v4366_v30  ;;  %v5415_v24 = vadd.s32 4294967169, %v4221_v17 }
 0x381   :  { %v5409_v18 = vadd.s32 4294967294, %v4077_v50  ;;  %v4368_v7 = vsel %vm4354_vm14, %v4365_v34, %v4367_v43  ;;  %v9102_v10 = vmul.u32.u64.low %v4369_v45, %v4364_v47  ;;  %v9103_v46 = vmul.u32.u64.high %v4369_v45, %v4364_v47, %v9102_v10 }
 0x382   :  { %v4095_v25 = vsub.s32 4, %v9065_v21  ;;  %v9107_v63 = vmul.u32.u64.low %v4369_v45, %v4368_v7  ;;  %v9108_v5 = vmul.u32.u64.high %v4369_v45, %v4368_v7, %v9107_v63  ;;  %v4227_v54 = vadd.s32 1, %v5415_v24 }
 0x383   :  { %vm4011_vm3 = vcmp.lt.s32.totalorder %v8856_v27, 0  ;;  %vm5410_vm2 = vcmp.lt.s32.totalorder %v5409_v18, 0  ;;  %v4360_v29 = vsel %vm4354_vm14, %v4357_v11, %v4359_v49  ;;  %v9113_v12 = vadd.f32 %v5893_v31, %v10187_v51  ;;  %v5943_v51 = vpop.f32.mrf.mxu1 }
 0x384   :  { %v4207_v3 = vand.u32 3, %v4206_v2  ;;  %v4080_v23 = vsel %vm5410_vm2, 0, %v5409_v18  ;;  %v4217_v52 = vand.u32 2147483647, %v9042_v60  ;;  %vm4228_vm0 = vcmp.gt.s32.totalorder %v4227_v54, 0 }
 0x385   :  { %vm4205_vm4 = vweird.f32 %v8772_v35  ;;  %v4065_v48 = vadd.s32 %v9023_v44, %v9020_v1  ;;  %v4081_v28 = vsub.s32 32, %v4080_v23  ;;  %v4085_v59 = vsub.s32 4294967266, %v4080_v23 }
 0x386   :  { %v4379_v39 = vadd.s32 1, %v9103_v46  ;;  %v4096_v36 = vsel %vm4011_vm3, %v4095_v25, %v9065_v21  ;;  %v4376_v26 = vmul.u32 %v4369_v45, %v4360_v29  ;;  %vm4378_vm5 = vc.u32 %v9108_v5, %v9102_v10  ;;  %v10190_v25 = vld [vmem:[#allocation34_spill] sm:$0xff] }
 0x387   :  { %v4229_v40 = vsel %vm4228_vm0, %v4227_v54, 0  ;;  %v4082_v33 = vshll.u32 %v9087_v20, %v4080_v23  ;;  %v4083_v58 = vshrl.u32 %v4065_v48, %v4081_v28  ;;  %v4086_v16 = vadd.s32 127, %v4085_v59 }
 0x388   :  { %v4380_v32 = vsel %vm4378_vm5, %v4379_v39, %v9103_v46  ;;  %v6168_v1 = vpop.eup %6167  ;;  %vm4212_vm6 = vcmp.eq.s32.totalorder %v4207_v3, 2  ;;  %vm9129_vm7 = vcmp.le.f32.partialorder %v4009_v6, 0.7853982  ;;  %v4231_v56 = vand.u32 31, %v4229_v40 }
 0x389   :  { %v4381_v21 = vadd.s32 %v4380_v32, %v4376_v26  ;;  %v6170_v4 = vpop.eup %6169  ;;  %v4213_v13 = vxor.u32 2147483648, %v6168_v1  ;;  %v4084_v42 = vor.u32 %v4083_v58, %v4082_v33  ;;  %v4087_v55 = vshll.u32 %v4086_v16, 23 }
 0x38a   :  { %v4098_v20 = vsel %vm9129_vm7, 0, %v4096_v36  ;;  %v4210_v41 = vxor.u32 2147483648, %v6170_v4  ;;  %v4224_v61 = vand.u32 8388607, %v4217_v52  ;;  %v4232_v8 = vsub.s32 32, %v4231_v56 }
 0x38b   :  { %v4382_v17 = vadd.s32 536870912, %v4381_v21  ;;  %vm4208_vm8 = vcmp.lt.s32.totalorder %v4207_v3, 2  ;;  %vm4209_vm9 = vcmp.eq.s32.totalorder %v4207_v3, 0  ;;  %v4214_v6 = vsel %vm4212_vm6, %v4213_v13, %v6170_v4 }
 0x38c   :  { %v4088_v9 = vor.u32 4788187, %v4087_v55  ;;  %v4211_v19 = vsel %vm4209_vm9, %v6168_v1, %v4210_v41  ;;  %v4091_v2 = vcvt.s32.f32 %v4084_v42  ;;  %v9137_v22 = vadd.s32 3, %v4098_v20 }
 0x38d   :  { %v9139_v34 = vshrl.u32 %v4382_v17, 30  ;;  %v4215_v30 = vsel %vm4208_vm8, %v4211_v19, %v4214_v6  ;;  %v4235_v11 = vshrl.u32 %v10117_v15, %v4232_v8  ;;  %v4238_v45 = vshrl.u32 %v10113_v62, %v4232_v8 }
 0x38e   :  { %v4089_v50 = vand.u32 2147483647, %v4088_v9  ;;  %v4216_v49 = vsel %vm4205_vm4, nan, %v4215_v30  ;;  %v4225_v43 = vor.u32 8388608, %v4224_v61  ;;  %v4230_v24 = vshrl.u32 %v4229_v40, 5 }
 0x38f   :  { %v4384_v47 = vshll.u32 %v9139_v34, 30  ;;  %5279 = vst.msk [vmem:[%s9909_s2 + $0xa8] sm:$0xff] %vm5257_vm15, %v4216_v49  ;;  %v4234_v18 = vshll.u32 %v10121_v37, %v4231_v56  ;;  %v4237_v7 = vshll.u32 %v10117_v15, %v4231_v56  ;;  %v4241_v46 = vshrl.u32 %v10114_v53, %v4232_v8 }
 0x390   :  { %v4092_v31 = vmul.f32 %v4091_v2, %v4089_v50  ;;  %5311 = vst.msk [vmem:[%s9909_s2 + $0xa8] sm:$0xff] %vm49_vm1, %v10190_v25  ;;  %v4240_v63 = vshll.u32 %v10113_v62, %v4231_v56  ;;  %v4243_v54 = vshll.u32 %v10114_v53, %v4231_v56  ;;  %v4244_v29 = vshrl.u32 %v10115_v0, %v4232_v8 }
 0x391   :  { %v9158_v35 = vsub.s32 %v4381_v21, %v4384_v47  ;;  %v4236_v23 = vor.u32 %v4235_v11, %v4234_v18  ;;  %v4239_v48 = vor.u32 %v4238_v45, %v4237_v7  ;;  %v4247_v28 = vshrl.u32 %v10116_v14, %v4232_v8  ;;  %v1625_v11 = vpop.f32.mrf.mxu0 }
 0x392   :  { %v4093_v3 = vxor.u32 2147483648, %v4092_v31  ;;  %vm4323_vm10 = vcmp.lt.s32.totalorder %v8955_v57, 0  ;;  %v4242_v39 = vor.u32 %v4241_v46, %v4240_v63  ;;  %v4245_v36 = vor.u32 %v4244_v29, %v4243_v54  ;;  %v10193_v63 = vld [vmem:[#allocation16_spill] sm:$0xff] }
 0x393   :  { %v4387_v59 = vsub.s32 0, %v9158_v35  ;;  %v4246_v26 = vshll.u32 %v10115_v0, %v4231_v56  ;;  %vm4249_vm11 = vcmp.lt.s32.totalorder %v4230_v24, 1  ;;  %v4265_v33 = vshll.u32 %v4225_v43, 8 }
 0x394   :  { %v4094_v40 = vsel %vm4011_vm3, %v4093_v3, %v4092_v31  ;;  %v9170_v58 = vadd.f32 %v5943_v51, %v9113_v12  ;;  %vm4252_vm12 = vcmp.lt.s32.totalorder %v4230_v24, 4  ;;  %v4233_v21 = vshrl.u32 %v10121_v37, %v4232_v8 }
 0x395   :  { %v4097_v16 = vsel %vm9129_vm7, %v8856_v27, %v4094_v40  ;;  %v5420_v32 = vmin.u32 %v4387_v59, %v9158_v35  ;;  %v4248_v1 = vor.u32 %v4247_v28, %v4246_v26  ;;  %v4257_v56 = vsel %vm4249_vm11, %v4236_v23, %v4239_v48 }
 0x396   :  { %6171 = vcosq.f32 %v4097_v16  ;;  %v4258_v4 = vsel %vm4252_vm12, %v4245_v36, 920167782  ;;  %vm9181_vm13 = vcmp.le.f32.partialorder %v4321_v38, 0.7853982  ;;  %vm4251_vm14 = vcmp.lt.s32.totalorder %v4230_v24, 3 }
 0x397   :  { %6173 = vsinq.f32 %v4097_v16  ;;  %v4389_v44 = vclz %v5420_v32  ;;  %v4254_v13 = vsel %vm4252_vm12, %v4242_v39, 2102212464  ;;  %v4407_v42 = vsub.s32 4, %v9139_v34 }
 0x398   :  { %vm4250_vm3 = vcmp.lt.s32.totalorder %v4230_v24, 2  ;;  %v4259_v55 = vsel %vm4251_vm14, %v4242_v39, %v4258_v4  ;;  %v4261_v20 = vsel %vm4249_vm11, %v4239_v48, %v4242_v39  ;;  %v4253_v17 = vsel %vm4249_vm11, %v4233_v21, %v4236_v23  ;;  %v1883_v23 = vpop.f32.mrf.mxu1 }
 0x399   :  { %v5421_v41 = vadd.s32 4294967294, %v4389_v44  ;;  %v4260_v61 = vsel %vm4250_vm3, %v4257_v56, %v4259_v55  ;;  %v4262_v38 = vsel %vm4252_vm12, %v4248_v1, 1326507024  ;;  %v4255_v8 = vsel %vm4251_vm14, %v4239_v48, %v4254_v13 }
 0x39a   :  { %v4263_v6 = vsel %vm4251_vm14, %v4245_v36, %v4262_v38  ;;  %v9191_v9 = vmul.u32.u64.low %v4265_v33, %v4260_v61  ;;  %v9192_v19 = vmul.u32.u64.high %v4265_v33, %v4260_v61, %v9191_v9  ;;  %v4377_v2 = vadd.s32 %v9102_v10, %v9108_v5 }
 0x39b   :  { %vm5422_vm2 = vcmp.lt.s32.totalorder %v5421_v41, 0  ;;  %v4264_v30 = vsel %vm4250_vm3, %v4261_v20, %v4263_v6  ;;  %v4532_v50 = vand.u32 2139095040, %v9170_v58  ;;  %v4408_v49 = vsel %vm4323_vm10, %v4407_v42, %v9139_v34 }
 0x39c   :  { %v4392_v45 = vsel %vm5422_vm2, 0, %v5421_v41  ;;  %v9202_v47 = vmul.u32.u64.low %v4265_v33, %v4264_v30  ;;  %v9203_v43 = vmul.u32.u64.high %v4265_v33, %v4264_v30, %v9202_v47  ;;  %v4256_v7 = vsel %vm4250_vm3, %v4253_v17, %v4255_v8 }
 0x39d   :  { %v4393_v31 = vsub.s32 32, %v4392_v45  ;;  %v4397_v18 = vsub.s32 4294967266, %v4392_v45  ;;  %v4533_v46 = vshrl.u32 %v4532_v50, 23  ;;  %v4103_v10 = vand.u32 3, %v9137_v22 }
 0x39e   :  { %v4275_v5 = vadd.s32 1, %v9192_v19  ;;  %v4529_v25 = vand.u32 2147483647, %v9170_v58  ;;  %v1626_v54 = vadd.f32 %v1625_v11, %v10193_v63  ;;  %v4394_v29 = vshll.u32 %v9158_v35, %v4392_v45 }
 0x39f   :  { %v4395_v51 = vshrl.u32 %v4377_v2, %v4393_v31  ;;  %v4398_v34 = vadd.s32 127, %v4397_v18  ;;  %v5427_v3 = vadd.s32 4294967169, %v4533_v46  ;;  %v4410_v48 = vsel %vm9181_vm13, 0, %v4408_v49  ;;  %v10194_v31 = vld [vmem:[#allocation33_spill] sm:$0xff] }
 0x3a0   :  { %v4272_v24 = vmul.u32 %v4265_v33, %v4256_v7  ;;  %vm4274_vm0 = vc.u32 %v9203_v43, %v9191_v9  ;;  %v4536_v35 = vand.u32 8388607, %v4529_v25  ;;  %v9218_v26 = vadd.f32 %v1883_v23, %v1626_v54 }
 0x3a1   :  { %v4396_v22 = vor.u32 %v4395_v51, %v4394_v29  ;;  %v4399_v28 = vshll.u32 %v4398_v34, 23  ;;  %v4276_v59 = vsel %vm4274_vm0, %v4275_v5, %v9192_v19  ;;  %v4539_v39 = vadd.s32 1, %v5427_v3 }
 0x3a2   :  { %v4277_v36 = vadd.s32 %v4276_v59, %v4272_v24  ;;  %vm4105_vm4 = vcmp.eq.s32.totalorder %v4103_v10, 0  ;;  %vm4108_vm5 = vcmp.eq.s32.totalorder %v4103_v10, 2  ;;  %v4414_v1 = vadd.s32 3, %v4410_v48 }
 0x3a3   :  { %v6172_v40 = vpop.eup %6171  ;;  %v4400_v16 = vor.u32 4788187, %v4399_v28  ;;  %vm4540_vm6 = vcmp.gt.s32.totalorder %v4539_v39, 0  ;;  %v4403_v13 = vcvt.s32.f32 %v4396_v22  ;;  %v4537_v41 = vor.u32 8388608, %v4536_v35 }
 0x3a4   :  { %v6174_v33 = vpop.eup %6173  ;;  %v4109_v32 = vxor.u32 2147483648, %v6172_v40  ;;  %v4278_v21 = vadd.s32 536870912, %v4277_v36  ;;  %v4541_v56 = vsel %vm4540_vm6, %v4539_v39, 0  ;;  %v4428_v17 = vand.u32 2139095040, %v9218_v26 }
 0x3a5   :  { %v4106_v4 = vxor.u32 2147483648, %v6174_v33  ;;  %v4401_v44 = vand.u32 2147483647, %v4400_v16  ;;  %v4543_v42 = vand.u32 31, %v4541_v56  ;;  %vm4104_vm7 = vcmp.lt.s32.totalorder %v4103_v10, 2 }
 0x3a6   :  { %v4110_v55 = vsel %vm4108_vm5, %v4109_v32, %v6174_v33  ;;  %v9220_v20 = vshrl.u32 %v4278_v21, 30  ;;  %vm4101_vm8 = vweird.f32 %v8856_v27  ;;  %v9226_v50 = vand.u32 3, %v4414_v1 }
 0x3a7   :  { %v4107_v61 = vsel %vm4105_vm4, %v6172_v40, %v4106_v4  ;;  %v4404_v38 = vmul.f32 %v4403_v13, %v4401_v44  ;;  %v4544_v8 = vsub.s32 32, %v4543_v42  ;;  %v9236_v47 = vshll.u32 %v4537_v41, 8  ;;  %v5896_v13 = vpop.f32.mrf.mxu0 }
 0x3a8   :  { %v4111_v6 = vsel %vm4104_vm7, %v4107_v61, %v4110_v55  ;;  %v4280_v19 = vshll.u32 %v9220_v20, 30  ;;  %v4429_v27 = vshrl.u32 %v4428_v17, 23  ;;  %v4542_v7 = vshrl.u32 %v4541_v56, 5 }
 0x3a9   :  { %v4112_v2 = vsel %vm4101_vm8, nan, %v4111_v6  ;;  %v4405_v30 = vxor.u32 2147483648, %v4404_v38  ;;  %v4547_v11 = vshrl.u32 %v10117_v15, %v4544_v8  ;;  %v4550_v49 = vshrl.u32 %v10113_v62, %v4544_v8 }
 0x3aa   :  { %5278 = vst.msk [vmem:[%s9909_s2 + $0xa0] sm:$0xff] %vm5257_vm15, %v4112_v2  ;;  %v9233_v45 = vsub.s32 %v4277_v36, %v4280_v19  ;;  %v4546_v46 = vshll.u32 %v10121_v37, %v4543_v42  ;;  %v4553_v10 = vshrl.u32 %v10114_v53, %v4544_v8  ;;  %v4549_v54 = vshll.u32 %v10117_v15, %v4543_v42 }
 0x3ab   :  { %5310 = vst.msk [vmem:[%s9909_s2 + $0xa0] sm:$0xff] %vm49_vm1, %v10194_v31  ;;  %v4406_v18 = vsel %vm4323_vm10, %v4405_v30, %v4404_v38  ;;  %v4552_v29 = vshll.u32 %v10113_v62, %v4543_v42  ;;  %v4555_v34 = vshll.u32 %v10114_v53, %v4543_v42  ;;  %v4556_v3 = vshrl.u32 %v10115_v0, %v4544_v8  ;;  %v10195_v30 = vld [vmem:[#allocation17_spill] sm:$0xff] }
 0x3ac   :  { %v4409_v5 = vsel %vm9181_vm13, %v8955_v57, %v4406_v18  ;;  %v4283_v63 = vsub.s32 0, %v9233_v45  ;;  %v4548_v51 = vor.u32 %v4547_v11, %v4546_v46  ;;  %v4551_v48 = vor.u32 %v4550_v49, %v4549_v54 }
 0x3ad   :  { %6175 = vcosq.f32 %v4409_v5  ;;  %v4554_v24 = vor.u32 %v4553_v10, %v4552_v29  ;;  %v4557_v22 = vor.u32 %v4556_v3, %v4555_v34  ;;  %v4558_v12 = vshll.u32 %v10115_v0, %v4543_v42 }
 0x3ae   :  { %6177 = vsinq.f32 %v4409_v5  ;;  %v5416_v23 = vmin.u32 %v4283_v63, %v9233_v45  ;;  %v4559_v28 = vshrl.u32 %v10116_v14, %v4544_v8  ;;  %v4425_v59 = vand.u32 2147483647, %v9218_v26  ;;  %v5946_v63 = vpop.f32.mrf.mxu1 }
 0x3af   :  { %v4545_v36 = vshrl.u32 %v10121_v37, %v4544_v8  ;;  %vm4561_vm9 = vcmp.lt.s32.totalorder %v4542_v7, 1  ;;  %v5423_v35 = vadd.s32 4294967169, %v4429_v27  ;;  %vm4562_vm10 = vcmp.lt.s32.totalorder %v4542_v7, 2 }
 0x3b0   :  { %v4285_v39 = vclz %v5416_v23  ;;  %v4560_v40 = vor.u32 %v4559_v28, %v4558_v12  ;;  %vm4563_vm11 = vcmp.lt.s32.totalorder %v4542_v7, 3  ;;  %vm4564_vm12 = vcmp.lt.s32.totalorder %v4542_v7, 4 }
 0x3b1   :  { %v4566_v33 = vsel %vm4564_vm12, %v4554_v24, 2102212464  ;;  %v4569_v32 = vsel %vm4561_vm9, %v4548_v51, %v4551_v48  ;;  %v4570_v1 = vsel %vm4564_vm12, %v4557_v22, 920167782  ;;  %v4565_v21 = vsel %vm4561_vm9, %v4545_v36, %v4548_v51 }
 0x3b2   :  { %v5417_v16 = vadd.s32 4294967294, %v4285_v39  ;;  %v4571_v56 = vsel %vm4563_vm11, %v4554_v24, %v4570_v1  ;;  %v4573_v4 = vsel %vm4561_vm9, %v4551_v48, %v4554_v24  ;;  %v4574_v44 = vsel %vm4564_vm12, %v4560_v40, 1326507024 }
 0x3b3   :  { %v4567_v42 = vsel %vm4563_vm11, %v4551_v48, %v4566_v33  ;;  %v4572_v55 = vsel %vm4562_vm10, %v4569_v32, %v4571_v56  ;;  %v4575_v41 = vsel %vm4563_vm11, %v4557_v22, %v4574_v44  ;;  %vm4219_vm14 = vcmp.lt.s32.totalorder %v9042_v60, 0 }
 0x3b4   :  { %vm5418_vm13 = vcmp.lt.s32.totalorder %v5417_v16, 0  ;;  %v4576_v61 = vsel %vm4562_vm10, %v4573_v4, %v4575_v41  ;;  %v9264_v38 = vmul.u32.u64.low %v9236_v47, %v4572_v55  ;;  %v9265_v8 = vmul.u32.u64.high %v9236_v47, %v4572_v55, %v9264_v38 }
 0x3b5   :  { %v4288_v17 = vsel %vm5418_vm13, 0, %v5417_v16  ;;  %v4273_v6 = vadd.s32 %v9191_v9, %v9203_v43  ;;  %v1644_v11 = vadd.f32 %v5896_v13, %v10195_v30  ;;  %vm4413_vm3 = vweird.f32 %v8955_v57  ;;  %v10198_v57 = vld [vmem:[#allocation40_spill] sm:$0xff] }
 0x3b6   :  { %v4289_v19 = vsub.s32 32, %v4288_v17  ;;  %v4293_v2 = vsub.s32 4294967266, %v4288_v17  ;;  %vm4416_vm2 = vcmp.lt.s32.totalorder %v9226_v50, 2  ;;  %v4435_v31 = vadd.s32 1, %v5423_v35 }
 0x3b7   :  { %v9274_v49 = vmul.u32.u64.low %v9236_v47, %v4576_v61  ;;  %v9275_v27 = vmul.u32.u64.high %v9236_v47, %v4576_v61, %v9274_v49  ;;  %v4290_v18 = vshll.u32 %v9233_v45, %v4288_v17  ;;  %v4568_v5 = vsel %vm4562_vm10, %v4565_v21, %v4567_v42 }
 0x3b8   :  { %v4291_v46 = vshrl.u32 %v4273_v6, %v4289_v19  ;;  %v4294_v10 = vadd.s32 127, %v4293_v2  ;;  %vm4417_vm0 = vcmp.eq.s32.totalorder %v9226_v50, 0  ;;  %v4587_v9 = vadd.s32 1, %v9265_v8 }
 0x3b9   :  { %v4432_v43 = vand.u32 8388607, %v4425_v59  ;;  %vm4436_vm4 = vcmp.gt.s32.totalorder %v4435_v31, 0  ;;  %vm9285_vm5 = vcmp.le.f32.partialorder %v4217_v52, 0.7853982  ;;  %v4303_v7 = vsub.s32 4, %v9220_v20 }
 0x3ba   :  { %v6176_v54 = vpop.eup %6175  ;;  %v4292_v45 = vor.u32 %v4291_v46, %v4290_v18  ;;  %v4295_v51 = vshll.u32 %v4294_v10, 23  ;;  %v4437_v34 = vsel %vm4436_vm4, %v4435_v31, 0  ;;  %vm4420_vm6 = vcmp.eq.s32.totalorder %v9226_v50, 2 }
 0x3bb   :  { %v6178_v3 = vpop.eup %6177  ;;  %v4421_v23 = vxor.u32 2147483648, %v6176_v54  ;;  %v4584_v48 = vmul.u32 %v9236_v47, %v4568_v5  ;;  %vm4586_vm7 = vc.u32 %v9275_v27, %v9264_v38  ;;  %v9295_v12 = vadd.f32 %v5946_v63, %v1644_v11 }
 0x3bc   :  { %v4418_v24 = vxor.u32 2147483648, %v6178_v3  ;;  %v4296_v22 = vor.u32 4788187, %v4295_v51  ;;  %v4588_v52 = vsel %vm4586_vm7, %v4587_v9, %v9265_v8  ;;  %v4433_v36 = vor.u32 8388608, %v4432_v43 }
 0x3bd   :  { %v4422_v28 = vsel %vm4420_vm6, %v4421_v23, %v6178_v3  ;;  %v4589_v39 = vadd.s32 %v4588_v52, %v4584_v48  ;;  %v4439_v35 = vand.u32 31, %v4437_v34  ;;  %v4299_v33 = vcvt.s32.f32 %v4292_v45 }
 0x3be   :  { %v4419_v40 = vsel %vm4417_vm0, %v6176_v54, %v4418_v24  ;;  %v4297_v16 = vand.u32 2147483647, %v4296_v22  ;;  %v4304_v47 = vsel %vm4219_vm14, %v4303_v7, %v9220_v20  ;;  %v9304_v21 = vshrl.u32 %v4437_v34, 5 }
 0x3bf   :  { %v4423_v32 = vsel %vm4416_vm2, %v4419_v40, %v4422_v28  ;;  %v4590_v1 = vadd.s32 536870912, %v4589_v39  ;;  %v4440_v56 = vsub.s32 32, %v4439_v35  ;;  %v4442_v13 = vshll.u32 %v10121_v37, %v4439_v35 }
 0x3c0   :  { %v4424_v4 = vsel %vm4413_vm3, nan, %v4423_v32  ;;  %v4300_v44 = vmul.f32 %v4299_v33, %v4297_v16  ;;  %v4445_v42 = vshll.u32 %v10117_v15, %v4439_v35  ;;  %v4448_v41 = vshll.u32 %v10113_v62, %v4439_v35 }
 0x3c1   :  { %5281 = vst.msk [vmem:[%s9909_s2 + $0xb8] sm:$0xff] %vm5257_vm15, %v4424_v4  ;;  %v9314_v20 = vshrl.u32 %v4590_v1, 30  ;;  %v4443_v50 = vshrl.u32 %v10117_v15, %v4440_v56  ;;  %v4446_v55 = vshrl.u32 %v10113_v62, %v4440_v56  ;;  %v4449_v61 = vshrl.u32 %v10114_v53, %v4440_v56 }
 0x3c2   :  { %5313 = vst.msk [vmem:[%s9909_s2 + $0xb8] sm:$0xff] %vm49_vm1, %v10198_v57  ;;  %v4301_v17 = vxor.u32 2147483648, %v4300_v44  ;;  %v4451_v8 = vshll.u32 %v10114_v53, %v4439_v35  ;;  %v4452_v6 = vshrl.u32 %v10115_v0, %v4440_v56  ;;  %v4306_v19 = vsel %vm9285_vm5, 0, %v4304_v47  ;;  %v1637_v47 = vpop.f32.mrf.mxu0 }
 0x3c3   :  { %v4592_v2 = vshll.u32 %v9314_v20, 30  ;;  %v4444_v30 = vor.u32 %v4443_v50, %v4442_v13  ;;  %v4447_v49 = vor.u32 %v4446_v55, %v4445_v42  ;;  %v4450_v31 = vor.u32 %v4449_v61, %v4448_v41  ;;  %v10199_v50 = vld [vmem:[#allocation20_spill] sm:$0xff] }
 0x3c4   :  { %v4302_v11 = vsel %vm4219_vm14, %v4301_v17, %v4300_v44  ;;  %v4453_v18 = vor.u32 %v4452_v6, %v4451_v8  ;;  %v4454_v5 = vshll.u32 %v10115_v0, %v4439_v35  ;;  %v4455_v9 = vshrl.u32 %v10116_v14, %v4440_v56 }
 0x3c5   :  { %v4305_v46 = vsel %vm9285_vm5, %v9042_v60, %v4302_v11  ;;  %v9335_v10 = vsub.s32 %v4589_v39, %v4592_v2  ;;  %vm4457_vm8 = vcmp.lt.s32.totalorder %v9304_v21, 1  ;;  %v4473_v43 = vshll.u32 %v4433_v36, 8 }
 0x3c6   :  { %6179 = vcosq.f32 %v4305_v46  ;;  %v4740_v63 = vand.u32 2139095040, %v9295_v12  ;;  %v4456_v45 = vor.u32 %v4455_v9, %v4454_v5  ;;  %vm4460_vm9 = vcmp.lt.s32.totalorder %v9304_v21, 4 }
 0x3c7   :  { %6181 = vsinq.f32 %v4305_v46  ;;  %v4595_v54 = vsub.s32 0, %v9335_v10  ;;  %vm4458_vm10 = vcmp.lt.s32.totalorder %v9304_v21, 2  ;;  %vm4459_vm11 = vcmp.lt.s32.totalorder %v9304_v21, 3 }
 0x3c8   :  { %v4465_v29 = vsel %vm4457_vm8, %v4444_v30, %v4447_v49  ;;  %v4466_v51 = vsel %vm4460_vm9, %v4453_v18, 920167782  ;;  %v4441_v34 = vshrl.u32 %v10121_v37, %v4440_v56  ;;  %v4462_v3 = vsel %vm4460_vm9, %v4450_v31, 2102212464 }
 0x3c9   :  { %v5428_v7 = vmin.u32 %v4595_v54, %v9335_v10  ;;  %v4467_v23 = vsel %vm4459_vm11, %v4450_v31, %v4466_v51  ;;  %v4469_v24 = vsel %vm4457_vm8, %v4447_v49, %v4450_v31  ;;  %v4470_v22 = vsel %vm4460_vm9, %v4456_v45, 1326507024 }
 0x3ca   :  { %v4468_v48 = vsel %vm4458_vm10, %v4465_v29, %v4467_v23  ;;  %v4741_v52 = vshrl.u32 %v4740_v63, 23  ;;  %v4310_v28 = vadd.s32 3, %v4306_v19  ;;  %v4461_v36 = vsel %vm4457_vm8, %v4441_v34, %v4444_v30 }
 0x3cb   :  { %v4597_v39 = vclz %v5428_v7  ;;  %v4463_v35 = vsel %vm4459_vm11, %v4447_v49, %v4462_v3  ;;  %v4471_v40 = vsel %vm4459_vm11, %v4453_v18, %v4470_v22  ;;  %vm4531_vm12 = vcmp.lt.s32.totalorder %v9170_v58, 0 }
 0x3cc   :  { %v9355_v16 = vmul.u32.u64.low %v4473_v43, %v4468_v48  ;;  %v9356_v33 = vmul.u32.u64.high %v4473_v43, %v4468_v48, %v9355_v16  ;;  %v4472_v1 = vsel %vm4458_vm10, %v4469_v24, %v4471_v40  ;;  %v5435_v56 = vadd.s32 4294967169, %v4741_v52 }
 0x3cd   :  { %v5429_v32 = vadd.s32 4294967294, %v4597_v39  ;;  %v9362_v4 = vmul.u32.u64.low %v4473_v43, %v4472_v1  ;;  %v9363_v44 = vmul.u32.u64.high %v4473_v43, %v4472_v1, %v9362_v4  ;;  %v4464_v13 = vsel %vm4458_vm10, %v4461_v36, %v4463_v35 }
 0x3ce   :  { %v4747_v42 = vadd.s32 1, %v5435_v56  ;;  %v9368_v55 = vadd.f32 %v1637_v47, %v10199_v50  ;;  %vm4309_vm14 = vweird.f32 %v9042_v60  ;;  %v4311_v41 = vand.u32 3, %v4310_v28  ;;  %v10200_v47 = vld [vmem:[#allocation36_spill] sm:$0xff]  ;;  %v10203_v4 = vld [vmem:[#allocation21_spill] sm:$0xff] }
 0x3cf   :  { %vm5430_vm13 = vcmp.lt.s32.totalorder %v5429_v32, 0  ;;  %v4483_v17 = vadd.s32 1, %v9356_v33  ;;  %v4737_v61 = vand.u32 2147483647, %v9295_v12  ;;  %v4585_v8 = vadd.s32 %v9264_v38, %v9275_v27 }
 0x3d0   :  { %v4600_v57 = vsel %vm5430_vm13, 0, %v5429_v32  ;;  %vm4748_vm3 = vcmp.gt.s32.totalorder %v4747_v42, 0  ;;  %v4615_v21 = vsub.s32 4, %v9314_v20  ;;  %v4480_v2 = vmul.u32 %v4473_v43, %v4464_v13 }
 0x3d1   :  { %v4601_v6 = vsub.s32 32, %v4600_v57  ;;  %v4605_v19 = vsub.s32 4294967266, %v4600_v57  ;;  %vm4482_vm2 = vc.u32 %v9363_v44, %v9355_v16  ;;  %v4749_v30 = vsel %vm4748_vm3, %v4747_v42, 0 }
 0x3d2   :  { %v4602_v49 = vshll.u32 %v9335_v10, %v4600_v57  ;;  %v4484_v46 = vsel %vm4482_vm2, %v4483_v17, %v9356_v33  ;;  %vm4312_vm0 = vcmp.lt.s32.totalorder %v4311_v41, 2  ;;  %v4751_v9 = vand.u32 31, %v4749_v30 }
 0x3d3   :  { %v6180_v11 = vpop.eup %6179  ;;  %v4603_v31 = vshrl.u32 %v4585_v8, %v4601_v6  ;;  %v4606_v18 = vadd.s32 127, %v4605_v19  ;;  %v4485_v27 = vadd.s32 %v4484_v46, %v4480_v2  ;;  %vm4316_vm4 = vcmp.eq.s32.totalorder %v4311_v41, 2 }
 0x3d4   :  { %v6182_v5 = vpop.eup %6181  ;;  %v4317_v38 = vxor.u32 2147483648, %v6180_v11  ;;  %vm4313_vm5 = vcmp.eq.s32.totalorder %v4311_v41, 0  ;;  %v4752_v51 = vsub.s32 32, %v4751_v9  ;;  %v4616_v10 = vsel %vm4531_vm12, %v4615_v21, %v9314_v20  ;;  %v1895_v41 = vpop.f32.mrf.mxu1 }
 0x3d5   :  { %v4314_v63 = vxor.u32 2147483648, %v6182_v5  ;;  %v4604_v54 = vor.u32 %v4603_v31, %v4602_v49  ;;  %v4607_v43 = vshll.u32 %v4606_v18, 23  ;;  %v4486_v29 = vadd.s32 536870912, %v4485_v27 }
 0x3d6   :  { %v4318_v45 = vsel %vm4316_vm4, %v4317_v38, %v6182_v5  ;;  %v4744_v3 = vand.u32 8388607, %v4737_v61  ;;  %v9388_v24 = vshrl.u32 %v4749_v30, 5  ;;  %v4755_v22 = vshrl.u32 %v10117_v15, %v4752_v51 }
 0x3d7   :  { %v4315_v7 = vsel %vm4313_vm5, %v6180_v11, %v4314_v63  ;;  %v4608_v34 = vor.u32 4788187, %v4607_v43  ;;  %v9386_v48 = vshrl.u32 %v4486_v29, 30  ;;  %v4611_v39 = vcvt.s32.f32 %v4604_v54 }
 0x3d8   :  { %v4319_v23 = vsel %vm4312_vm0, %v4315_v7, %v4318_v45  ;;  %v4758_v36 = vshrl.u32 %v10113_v62, %v4752_v51  ;;  %v4754_v35 = vshll.u32 %v10121_v37, %v4751_v9  ;;  %v4757_v40 = vshll.u32 %v10117_v15, %v4751_v9 }
 0x3d9   :  { %v4320_v52 = vsel %vm4309_vm14, nan, %v4319_v23  ;;  %v4609_v28 = vand.u32 2147483647, %v4608_v34  ;;  %v4488_v20 = vshll.u32 %v9386_v48, 30  ;;  %v4761_v33 = vshrl.u32 %v10114_v53, %v4752_v51 }
 0x3da   :  { %5280 = vst.msk [vmem:[%s9909_s2 + $0xb0] sm:$0xff] %vm5257_vm15, %v4320_v52  ;;  %v4760_v32 = vshll.u32 %v10113_v62, %v4751_v9  ;;  %v4763_v1 = vshll.u32 %v10114_v53, %v4751_v9  ;;  %v4764_v56 = vshrl.u32 %v10115_v0, %v4752_v51  ;;  %vm9412_vm6 = vcmp.le.f32.partialorder %v4529_v25, 0.7853982 }
 0x3db   :  { %5312 = vst.msk [vmem:[%s9909_s2 + $0xb0] sm:$0xff] %vm49_vm1, %v10200_v47  ;;  %v4612_v60 = vmul.f32 %v4611_v39, %v4609_v28  ;;  %v9416_v13 = vsub.s32 %v4485_v27, %v4488_v20  ;;  %v4756_v42 = vor.u32 %v4755_v22, %v4754_v35  ;;  %v4759_v50 = vor.u32 %v4758_v36, %v4757_v40  ;;  %v5899_v39 = vpop.f32.mrf.mxu0 }
 0x3dc   :  { %v4762_v17 = vor.u32 %v4761_v33, %v4760_v32  ;;  %v4765_v8 = vor.u32 %v4764_v56, %v4763_v1  ;;  %v4767_v6 = vshrl.u32 %v10116_v14, %v4752_v51  ;;  %v4618_v19 = vsel %vm9412_vm6, 0, %v4616_v10 }
 0x3dd   :  { %v4613_v57 = vxor.u32 2147483648, %v4612_v60  ;;  %v4491_v21 = vsub.s32 0, %v9416_v13  ;;  %v4745_v2 = vor.u32 8388608, %v4744_v3  ;;  %v4766_v25 = vshll.u32 %v10115_v0, %v4751_v9 }
 0x3de   :  { %v4753_v11 = vshrl.u32 %v10121_v37, %v4752_v51  ;;  %vm4769_vm7 = vcmp.lt.s32.totalorder %v9388_v24, 1  ;;  %v9428_v49 = vadd.f32 %v1895_v41, %v9368_v55  ;;  %vm4772_vm8 = vcmp.lt.s32.totalorder %v9388_v24, 4 }
 0x3df   :  { %v4614_v30 = vsel %vm4531_vm12, %v4613_v57, %v4612_v60  ;;  %v5424_v18 = vmin.u32 %v4491_v21, %v9416_v13  ;;  %v4768_v46 = vor.u32 %v4767_v6, %v4766_v25  ;;  %v4774_v5 = vsel %vm4772_vm8, %v4762_v17, 2102212464 }
 0x3e0   :  { %v4617_v31 = vsel %vm9412_vm6, %v9170_v58, %v4614_v30  ;;  %v4777_v38 = vsel %vm4769_vm7, %v4756_v42, %v4759_v50  ;;  %v4778_v55 = vsel %vm4772_vm8, %v4765_v8, 920167782  ;;  %vm4771_vm9 = vcmp.lt.s32.totalorder %v9388_v24, 3 }
 0x3e1   :  { %6183 = vcosq.f32 %v4617_v31  ;;  %v4493_v27 = vclz %v5424_v18  ;;  %v4785_v9 = vshll.u32 %v4745_v2, 8  ;;  %vm4770_vm10 = vcmp.lt.s32.totalorder %v9388_v24, 2  ;;  %v5949_v2 = vpop.f32.mrf.mxu1 }
 0x3e2   :  { %6185 = vsinq.f32 %v4617_v31  ;;  %v4773_v63 = vsel %vm4769_vm7, %v4753_v11, %v4756_v42  ;;  %v4779_v54 = vsel %vm4771_vm9, %v4762_v17, %v4778_v55  ;;  %v4781_v43 = vsel %vm4769_vm7, %v4759_v50, %v4762_v17 }
 0x3e3   :  { %v5425_v45 = vadd.s32 4294967294, %v4493_v27  ;;  %v4775_v29 = vsel %vm4771_vm9, %v4759_v50, %v4774_v5  ;;  %v4780_v51 = vsel %vm4770_vm10, %v4777_v38, %v4779_v54  ;;  %v4782_v7 = vsel %vm4772_vm8, %v4768_v46, 1326507024 }
 0x3e4   :  { %v4783_v34 = vsel %vm4771_vm9, %v4765_v8, %v4782_v7  ;;  %v9451_v10 = vmul.u32.u64.low %v4785_v9, %v4780_v51  ;;  %v9452_v3 = vmul.u32.u64.high %v4785_v9, %v4780_v51, %v9451_v10  ;;  %v4636_v23 = vand.u32 2139095040, %v9428_v49 }
 0x3e5   :  { %v4622_v22 = vadd.s32 3, %v4618_v19  ;;  %vm5426_vm11 = vcmp.lt.s32.totalorder %v5425_v45, 0  ;;  %v4511_v52 = vsub.s32 4, %v9386_v48  ;;  %v4784_v28 = vsel %vm4770_vm10, %v4781_v43, %v4783_v34 }
 0x3e6   :  { %v4496_v36 = vsel %vm5426_vm11, 0, %v5425_v45  ;;  %v9459_v20 = vmul.u32.u64.low %v4785_v9, %v4784_v28  ;;  %v9460_v35 = vmul.u32.u64.high %v4785_v9, %v4784_v28, %v9459_v20  ;;  %v4637_v40 = vshrl.u32 %v4636_v23, 23 }
 0x3e7   :  { %v4481_v33 = vadd.s32 %v9355_v16, %v9363_v44  ;;  %v4497_v47 = vsub.s32 32, %v4496_v36  ;;  %v4501_v60 = vsub.s32 4294967266, %v4496_v36  ;;  %v4776_v32 = vsel %vm4770_vm10, %v4773_v63, %v4775_v29 }
 0x3e8   :  { %vm4427_vm12 = vcmp.lt.s32.totalorder %v9218_v26, 0  ;;  %v4795_v1 = vadd.s32 1, %v9452_v3  ;;  %v5431_v56 = vadd.s32 4294967169, %v4637_v40  ;;  %v1656_v42 = vadd.f32 %v5899_v39, %v10203_v4 }
 0x3e9   :  { %v4498_v50 = vshll.u32 %v9416_v13, %v4496_v36  ;;  %v4499_v41 = vshrl.u32 %v4481_v33, %v4497_v47  ;;  %v4502_v57 = vadd.s32 127, %v4501_v60  ;;  %v4633_v17 = vand.u32 2147483647, %v9428_v49 }
 0x3ea   :  { %v4512_v16 = vsel %vm4427_vm12, %v4511_v52, %v9386_v48  ;;  %v4792_v44 = vmul.u32 %v4785_v9, %v4776_v32  ;;  %vm4794_vm13 = vc.u32 %v9460_v35, %v9451_v10  ;;  %v4643_v24 = vadd.s32 1, %v5431_v56 }
 0x3eb   :  { %v4623_v8 = vand.u32 3, %v4622_v22  ;;  %v4500_v6 = vor.u32 %v4499_v41, %v4498_v50  ;;  %v4503_v19 = vshll.u32 %v4502_v57, 23  ;;  %v4796_v21 = vsel %vm4794_vm13, %v4795_v1, %v9452_v3 }
 0x3ec   :  { %vm4621_vm14 = vweird.f32 %v9170_v58  ;;  %vm9480_vm3 = vcmp.le.f32.partialorder %v4425_v59, 0.7853982  ;;  %v4797_v48 = vadd.s32 %v4796_v21, %v4792_v44  ;;  %vm4644_vm2 = vcmp.gt.s32.totalorder %v4643_v24, 0  ;;  %v10206_v58 = vld [vmem:[#allocation42_spill] sm:$0xff] }
 0x3ed   :  { %v4504_v30 = vor.u32 4788187, %v4503_v19  ;;  %v4514_v11 = vsel %vm9480_vm3, 0, %v4512_v16  ;;  %v4640_v31 = vand.u32 8388607, %v4633_v17  ;;  %v4645_v18 = vsel %vm4644_vm2, %v4643_v24, 0 }
 0x3ee   :  { %v6184_v25 = vpop.eup %6183  ;;  %v4798_v38 = vadd.s32 536870912, %v4797_v48  ;;  %v4647_v55 = vand.u32 31, %v4645_v18  ;;  %v9488_v27 = vadd.f32 %v5949_v2, %v1656_v42  ;;  %vm4628_vm0 = vcmp.eq.s32.totalorder %v4623_v8, 2 }
 0x3ef   :  { %v6186_v46 = vpop.eup %6185  ;;  %v4629_v5 = vxor.u32 2147483648, %v6184_v25  ;;  %v4505_v9 = vand.u32 2147483647, %v4504_v30  ;;  %v4507_v63 = vcvt.s32.f32 %v4500_v6  ;;  %vm4625_vm4 = vcmp.eq.s32.totalorder %v4623_v8, 0 }
 0x3f0   :  { %v4626_v59 = vxor.u32 2147483648, %v6186_v46  ;;  %v9490_v43 = vshrl.u32 %v4798_v38, 30  ;;  %v4648_v45 = vsub.s32 32, %v4647_v55  ;;  %vm4624_vm5 = vcmp.lt.s32.totalorder %v4623_v8, 2 }
 0x3f1   :  { %v4630_v54 = vsel %vm4628_vm0, %v4629_v5, %v6186_v46  ;;  %v4508_v51 = vmul.f32 %v4507_v63, %v4505_v9  ;;  %v4518_v7 = vadd.s32 3, %v4514_v11  ;;  %v4641_v23 = vor.u32 8388608, %v4640_v31 }
 0x3f2   :  { %v4627_v29 = vsel %vm4625_vm4, %v6184_v25, %v4626_v59  ;;  %v4800_v3 = vshll.u32 %v9490_v43, 30  ;;  %v4948_v22 = vand.u32 2139095040, %v9488_v27  ;;  %v4651_v39 = vshrl.u32 %v10117_v15, %v4648_v45 }
 0x3f3   :  { %v4631_v34 = vsel %vm4624_vm5, %v4627_v29, %v4630_v54  ;;  %v4509_v28 = vxor.u32 2147483648, %v4508_v51  ;;  %v4654_v36 = vshrl.u32 %v10113_v62, %v4648_v45  ;;  %v4650_v40 = vshll.u32 %v10121_v37, %v4647_v55 }
 0x3f4   :  { %v4632_v52 = vsel %vm4621_vm14, nan, %v4631_v34  ;;  %v9502_v20 = vsub.s32 %v4797_v48, %v4800_v3  ;;  %v4653_v33 = vshll.u32 %v10117_v15, %v4647_v55  ;;  %v4657_v47 = vshrl.u32 %v10114_v53, %v4648_v45 }
 0x3f5   :  { %5283 = vst.msk [vmem:[%s9909_s2 + $0xc8] sm:$0xff] %vm5257_vm15, %v4632_v52  ;;  %v4510_v60 = vsel %vm4427_vm12, %v4509_v28, %v4508_v51  ;;  %v4646_v32 = vshrl.u32 %v4645_v18, 5  ;;  %v4656_v1 = vshll.u32 %v10113_v62, %v4647_v55  ;;  %v4659_v56 = vshll.u32 %v10114_v53, %v4647_v55 }
 0x3f6   :  { %5315 = vst.msk [vmem:[%s9909_s2 + $0xc8] sm:$0xff] %vm49_vm1, %v10206_v58  ;;  %v4513_v4 = vsel %vm9480_vm3, %v9218_v26, %v4510_v60  ;;  %v4803_v42 = vsub.s32 0, %v9502_v20  ;;  %v4652_v50 = vor.u32 %v4651_v39, %v4650_v40  ;;  %v4655_v41 = vor.u32 %v4654_v36, %v4653_v33 }
 0x3f7   :  { %6187 = vcosq.f32 %v4513_v4  ;;  %v4660_v57 = vshrl.u32 %v10115_v0, %v4648_v45  ;;  %v4662_v16 = vshll.u32 %v10115_v0, %v4647_v55  ;;  %v4663_v44 = vshrl.u32 %v10116_v14, %v4648_v45 }
 0x3f8   :  { %6189 = vsinq.f32 %v4513_v4  ;;  %v5436_v24 = vmin.u32 %v4803_v42, %v9502_v20  ;;  %v4658_v8 = vor.u32 %v4657_v47, %v4656_v1  ;;  %v9524_v6 = vand.u32 3, %v4518_v7  ;;  %v1649_v47 = vpop.f32.mrf.mxu0 }
 0x3f9   :  { %v4661_v19 = vor.u32 %v4660_v57, %v4659_v56  ;;  %v4664_v21 = vor.u32 %v4663_v44, %v4662_v16  ;;  %v4949_v2 = vshrl.u32 %v4948_v22, 23  ;;  %v4649_v48 = vshrl.u32 %v10121_v37, %v4648_v45  ;;  %v10209_v16 = vld [vmem:[#allocation22_spill] sm:$0xff] }
 0x3fa   :  { %v4805_v13 = vclz %v5436_v24  ;;  %vm4665_vm6 = vcmp.lt.s32.totalorder %v4646_v32, 1  ;;  %v4681_v25 = vshll.u32 %v4641_v23, 8  ;;  %vm4666_vm7 = vcmp.lt.s32.totalorder %v4646_v32, 2 }
 0x3fb   :  { %vm4667_vm8 = vcmp.lt.s32.totalorder %v4646_v32, 3  ;;  %vm4668_vm9 = vcmp.lt.s32.totalorder %v4646_v32, 4  ;;  %v4673_v30 = vsel %vm4665_vm6, %v4652_v50, %v4655_v41  ;;  %v4677_v46 = vsel %vm4665_vm6, %v4655_v41, %v4658_v8 }
 0x3fc   :  { %v5437_v11 = vadd.s32 4294967294, %v4805_v13  ;;  %v4670_v31 = vsel %vm4668_vm9, %v4658_v8, 2102212464  ;;  %v4674_v18 = vsel %vm4668_vm9, %v4661_v19, 920167782  ;;  %v4669_v5 = vsel %vm4665_vm6, %v4649_v48, %v4652_v50 }
 0x3fd   :  { %v4675_v38 = vsel %vm4667_vm8, %v4658_v8, %v4674_v18  ;;  %v4678_v55 = vsel %vm4668_vm9, %v4664_v21, 1326507024  ;;  %v5443_v59 = vadd.s32 4294967169, %v4949_v2  ;;  %v4671_v9 = vsel %vm4667_vm8, %v4655_v41, %v4670_v31 }
 0x3fe   :  { %vm5438_vm10 = vcmp.lt.s32.totalorder %v5437_v11, 0  ;;  %v4676_v63 = vsel %vm4666_vm7, %v4673_v30, %v4675_v38  ;;  %v4679_v54 = vsel %vm4667_vm8, %v4661_v19, %v4678_v55  ;;  %vm4739_vm11 = vcmp.lt.s32.totalorder %v9295_v12, 0 }
 0x3ff   :  { %v4808_v45 = vsel %vm5438_vm10, 0, %v5437_v11  ;;  %v4680_v29 = vsel %vm4666_vm7, %v4677_v46, %v4679_v54  ;;  %v9529_v51 = vmul.u32.u64.low %v4681_v25, %v4676_v63  ;;  %v9530_v7 = vmul.u32.u64.high %v4681_v25, %v4676_v63, %v9529_v51 }
 0x400   :  { %v4793_v34 = vadd.s32 %v9451_v10, %v9460_v35  ;;  %v4809_v3 = vsub.s32 32, %v4808_v45  ;;  %v4813_v23 = vsub.s32 4294967266, %v4808_v45  ;;  %vm4517_vm12 = vweird.f32 %v9218_v26  ;;  %v10210_v26 = vld [vmem:[#allocation41_spill] sm:$0xff] }
 0x401   :  { %vm4520_vm13 = vcmp.lt.s32.totalorder %v9524_v6, 2  ;;  %v9538_v22 = vmul.u32.u64.low %v4681_v25, %v4680_v29  ;;  %v9539_v52 = vmul.u32.u64.high %v4681_v25, %v4680_v29, %v9538_v22  ;;  %v4955_v28 = vadd.s32 1, %v5443_v59 }
 0x402   :  { %v4810_v39 = vshll.u32 %v9502_v20, %v4808_v45  ;;  %v4811_v36 = vshrl.u32 %v4793_v34, %v4809_v3  ;;  %v4814_v40 = vadd.s32 127, %v4813_v23  ;;  %v4672_v33 = vsel %vm4666_vm7, %v4669_v5, %v4671_v9  ;;  %v1907_v22 = vpop.f32.mrf.mxu1 }
 0x403   :  { %vm4521_vm14 = vcmp.eq.s32.totalorder %v9524_v6, 0  ;;  %v4691_v10 = vadd.s32 1, %v9530_v7  ;;  %v4945_v35 = vand.u32 2147483647, %v9488_v27  ;;  %vm4956_vm3 = vcmp.gt.s32.totalorder %v4955_v28, 0 }
 0x404   :  { %v6188_v58 = vpop.eup %6187  ;;  %vm9548_vm2 = vcmp.le.f32.partialorder %v4737_v61, 0.7853982  ;;  %v4812_v20 = vor.u32 %v4811_v36, %v4810_v39  ;;  %v4815_v1 = vshll.u32 %v4814_v40, 23  ;;  %v4823_v32 = vsub.s32 4, %v9490_v43 }
 0x405   :  { %v4957_v56 = vsel %vm4956_vm3, %v4955_v28, 0  ;;  %v6190_v4 = vpop.eup %6189  ;;  %vm4524_vm0 = vcmp.eq.s32.totalorder %v9524_v6, 2  ;;  %v4525_v42 = vxor.u32 2147483648, %v6188_v58  ;;  %v4688_v50 = vmul.u32 %v4681_v25, %v4672_v33 }
 0x406   :  { %vm4690_vm4 = vc.u32 %v9539_v52, %v9529_v51  ;;  %v4522_v41 = vxor.u32 2147483648, %v6190_v4  ;;  %v4816_v57 = vor.u32 4788187, %v4815_v1  ;;  %v1650_v44 = vadd.f32 %v1649_v47, %v10209_v16 }
 0x407   :  { %v4692_v61 = vsel %vm4690_vm4, %v4691_v10, %v9530_v7  ;;  %v4526_v24 = vsel %vm4524_vm0, %v4525_v42, %v6190_v4  ;;  %v4952_v19 = vand.u32 8388607, %v4945_v35  ;;  %v4959_v21 = vand.u32 31, %v4957_v56  ;;  %v5902_v42 = vpop.f32.mrf.mxu0 }
 0x408   :  { %v4693_v8 = vadd.s32 %v4692_v61, %v4688_v50  ;;  %v4523_v2 = vsel %vm4521_vm14, %v6188_v58, %v4522_v41  ;;  %v4817_v13 = vand.u32 2147483647, %v4816_v57  ;;  %v4819_v48 = vcvt.s32.f32 %v4812_v20 }
 0x409   :  { %v4824_v25 = vsel %vm4739_vm11, %v4823_v32, %v9490_v43  ;;  %v4527_v30 = vsel %vm4520_vm13, %v4523_v2, %v4526_v24  ;;  %v9567_v31 = vshrl.u32 %v4957_v56, 5  ;;  %v4960_v18 = vsub.s32 32, %v4959_v21 }
 0x40a   :  { %v4694_v11 = vadd.s32 536870912, %v4693_v8  ;;  %v4528_v46 = vsel %vm4517_vm12, nan, %v4527_v30  ;;  %v4820_v5 = vmul.f32 %v4819_v48, %v4817_v13  ;;  %v4962_v38 = vshll.u32 %v10121_v37, %v4959_v21  ;;  %v10211_v13 = vld [vmem:[#allocation23_spill] sm:$0xff] }
 0x40b   :  { %v4965_v55 = vshll.u32 %v10117_v15, %v4959_v21  ;;  %5282 = vst.msk [vmem:[%s9909_s2 + $0xc0] sm:$0xff] %vm5257_vm15, %v4528_v46  ;;  %v4963_v6 = vshrl.u32 %v10117_v15, %v4960_v18  ;;  %v4966_v59 = vshrl.u32 %v10113_v62, %v4960_v18  ;;  %v4968_v9 = vshll.u32 %v10113_v62, %v4959_v21 }
 0x40c   :  { %v9577_v43 = vshrl.u32 %v4694_v11, 30  ;;  %5314 = vst.msk [vmem:[%s9909_s2 + $0xc0] sm:$0xff] %vm49_vm1, %v10210_v26  ;;  %v4821_v63 = vxor.u32 2147483648, %v4820_v5  ;;  %v4969_v54 = vshrl.u32 %v10114_v53, %v4960_v18  ;;  %v4971_v45 = vshll.u32 %v10114_v53, %v4959_v21 }
 0x40d   :  { %v4972_v29 = vshrl.u32 %v10115_v0, %v4960_v18  ;;  %v4826_v7 = vsel %vm9548_vm2, 0, %v4824_v25  ;;  %v4953_v3 = vor.u32 8388608, %v4952_v19  ;;  %v4964_v23 = vor.u32 %v4963_v6, %v4962_v38 }
 0x40e   :  { %v4696_v34 = vshll.u32 %v9577_v43, 30  ;;  %v4822_v28 = vsel %vm4739_vm11, %v4821_v63, %v4820_v5  ;;  %v4967_v39 = vor.u32 %v4966_v59, %v4965_v55  ;;  %v4970_v36 = vor.u32 %v4969_v54, %v4968_v9  ;;  %v5952_v55 = vpop.f32.mrf.mxu1 }
 0x40f   :  { %v4973_v40 = vor.u32 %v4972_v29, %v4971_v45  ;;  %v4825_v33 = vsel %vm9548_vm2, %v9295_v12, %v4822_v28  ;;  %v4974_v47 = vshll.u32 %v10115_v0, %v4959_v21  ;;  %v4975_v58 = vshrl.u32 %v10116_v14, %v4960_v18 }
 0x410   :  { %v9598_v10 = vsub.s32 %v4693_v8, %v4696_v34  ;;  %6191 = vcosq.f32 %v4825_v33  ;;  %v4830_v20 = vadd.s32 3, %v4826_v7  ;;  %vm4977_vm5 = vcmp.lt.s32.totalorder %v9567_v31, 1 }
 0x411   :  { %v9603_v1 = vadd.f32 %v1907_v22, %v1650_v44  ;;  %6193 = vsinq.f32 %v4825_v33  ;;  %v4976_v56 = vor.u32 %v4975_v58, %v4974_v47  ;;  %vm4980_vm6 = vcmp.lt.s32.totalorder %v9567_v31, 4 }
 0x412   :  { %v4699_v32 = vsub.s32 0, %v9598_v10  ;;  %vm4978_vm7 = vcmp.lt.s32.totalorder %v9567_v31, 2  ;;  %vm4979_vm8 = vcmp.lt.s32.totalorder %v9567_v31, 3  ;;  %v4985_v60 = vsel %vm4977_vm5, %v4964_v23, %v4967_v39 }
 0x413   :  { %v4986_v4 = vsel %vm4980_vm6, %v4973_v40, 920167782  ;;  %v4961_v41 = vshrl.u32 %v10121_v37, %v4960_v18  ;;  %v4982_v57 = vsel %vm4980_vm6, %v4970_v36, 2102212464  ;;  %v4989_v44 = vsel %vm4977_vm5, %v4967_v39, %v4970_v36 }
 0x414   :  { %v5432_v50 = vmin.u32 %v4699_v32, %v9598_v10  ;;  %v4987_v61 = vsel %vm4979_vm8, %v4970_v36, %v4986_v4  ;;  %v4990_v24 = vsel %vm4980_vm6, %v4976_v56, 1326507024  ;;  %v4993_v8 = vshll.u32 %v4953_v3, 8 }
 0x415   :  { %v4988_v16 = vsel %vm4978_vm7, %v4985_v60, %v4987_v61  ;;  %v4831_v19 = vand.u32 3, %v4830_v20  ;;  %v4981_v2 = vsel %vm4977_vm5, %v4961_v41, %v4964_v23  ;;  %v1668_v48 = vadd.f32 %v5902_v42, %v10211_v13 }
 0x416   :  { %v4701_v21 = vclz %v5432_v50  ;;  %v4983_v25 = vsel %vm4979_vm8, %v4967_v39, %v4982_v57  ;;  %v4991_v30 = vsel %vm4979_vm8, %v4973_v40, %v4990_v24  ;;  %v4844_v38 = vand.u32 2139095040, %v9603_v1 }
 0x417   :  { %v9626_v11 = vmul.u32.u64.low %v4993_v8, %v4988_v16  ;;  %v9627_v18 = vmul.u32.u64.high %v4993_v8, %v4988_v16, %v9626_v11  ;;  %v4992_v5 = vsel %vm4978_vm7, %v4989_v44, %v4991_v30  ;;  %vm4635_vm9 = vcmp.lt.s32.totalorder %v9428_v49, 0 }
 0x418   :  { %v5433_v46 = vadd.s32 4294967294, %v4701_v21  ;;  %v9634_v6 = vmul.u32.u64.low %v4993_v8, %v4992_v5  ;;  %v9635_v59 = vmul.u32.u64.high %v4993_v8, %v4992_v5, %v9634_v6  ;;  %vm4832_vm10 = vcmp.lt.s32.totalorder %v4831_v19, 2 }
 0x419   :  { %vm9639_vm11 = vcmp.le.f32.partialorder %v4633_v17, 0.7853982  ;;  %v4984_v26 = vsel %vm4978_vm7, %v4981_v2, %v4983_v25  ;;  %v4845_v63 = vshrl.u32 %v4844_v38, 23  ;;  %vm4829_vm13 = vweird.f32 %v9295_v12 }
 0x41a   :  { %vm5434_vm12 = vcmp.lt.s32.totalorder %v5433_v46, 0  ;;  %v4719_v45 = vsub.s32 4, %v9577_v43  ;;  %v5003_v29 = vadd.s32 1, %v9627_v18  ;;  %v9648_v7 = vadd.f32 %v5952_v55, %v1668_v48  ;;  %v10214_v48 = vld [vmem:[#allocation44_spill] sm:$0xff] }
 0x41b   :  { %v4704_v54 = vsel %vm5434_vm12, 0, %v5433_v46  ;;  %v4689_v17 = vadd.s32 %v9529_v51, %v9539_v52  ;;  %v5439_v23 = vadd.s32 4294967169, %v4845_v63  ;;  %v5000_v31 = vmul.u32 %v4993_v8, %v4984_v26 }
 0x41c   :  { %v4705_v34 = vsub.s32 32, %v4704_v54  ;;  %v4709_v3 = vsub.s32 4294967266, %v4704_v54  ;;  %v4706_v22 = vshll.u32 %v9598_v10, %v4704_v54  ;;  %vm5002_vm14 = vc.u32 %v9635_v59, %v9626_v11 }
 0x41d   :  { %v4841_v28 = vand.u32 2147483647, %v9603_v1  ;;  %v6192_v39 = vpop.eup %6191  ;;  %v5004_v33 = vsel %vm5002_vm14, %v5003_v29, %v9627_v18  ;;  %v4851_v47 = vadd.s32 1, %v5439_v23  ;;  %vm4836_vm3 = vcmp.eq.s32.totalorder %v4831_v19, 2 }
 0x41e   :  { %v4707_v36 = vshrl.u32 %v4689_v17, %v4705_v34  ;;  %v4710_v40 = vadd.s32 127, %v4709_v3  ;;  %v6194_v58 = vpop.eup %6193  ;;  %v4837_v51 = vxor.u32 2147483648, %v6192_v39  ;;  %v4720_v52 = vsel %vm4635_vm9, %v4719_v45, %v9577_v43 }
 0x41f   :  { %v5005_v10 = vadd.s32 %v5004_v33, %v5000_v31  ;;  %v4834_v20 = vxor.u32 2147483648, %v6194_v58  ;;  %vm4852_vm2 = vcmp.gt.s32.totalorder %v4851_v47, 0  ;;  %vm4833_vm0 = vcmp.eq.s32.totalorder %v4831_v19, 0 }
 0x420   :  { %v4708_v32 = vor.u32 %v4707_v36, %v4706_v22  ;;  %v4711_v56 = vshll.u32 %v4710_v40, 23  ;;  %v4838_v60 = vsel %vm4836_vm3, %v4837_v51, %v6194_v58  ;;  %v4853_v42 = vsel %vm4852_vm2, %v4851_v47, 0 }
 0x421   :  { %v5006_v4 = vadd.s32 536870912, %v5005_v10  ;;  %v4835_v50 = vsel %vm4833_vm0, %v6192_v39, %v4834_v20  ;;  %v4848_v57 = vand.u32 8388607, %v4841_v28  ;;  %v5156_v61 = vand.u32 2139095040, %v9648_v7 }
 0x422   :  { %v4712_v41 = vor.u32 4788187, %v4711_v56  ;;  %v4839_v16 = vsel %vm4832_vm10, %v4835_v50, %v4838_v60  ;;  %v4722_v43 = vsel %vm9639_vm11, 0, %v4720_v52  ;;  %v4855_v24 = vand.u32 31, %v4853_v42 }
 0x423   :  { %v9666_v44 = vshrl.u32 %v5006_v4, 30  ;;  %v4840_v8 = vsel %vm4829_vm13, nan, %v4839_v16  ;;  %v4715_v2 = vcvt.s32.f32 %v4708_v32  ;;  %v4726_v30 = vadd.s32 3, %v4722_v43 }
 0x424   :  { %v4713_v21 = vand.u32 2147483647, %v4712_v41  ;;  %5285 = vst.msk [vmem:[%s9909_s2 + $0xd8] sm:$0xff] %vm5257_vm15, %v4840_v8  ;;  %v4856_v19 = vsub.s32 32, %v4855_v24  ;;  %v4849_v12 = vor.u32 8388608, %v4848_v57  ;;  %v5157_v18 = vshrl.u32 %v5156_v61, 23 }
 0x425   :  { %v5008_v13 = vshll.u32 %v9666_v44, 30  ;;  %5317 = vst.msk [vmem:[%s9909_s2 + $0xd8] sm:$0xff] %vm49_vm1, %v10214_v48  ;;  %v4854_v5 = vshrl.u32 %v4853_v42, 5  ;;  %v4858_v38 = vshll.u32 %v10121_v37, %v4855_v24  ;;  %v4864_v63 = vshll.u32 %v10113_v62, %v4855_v24 }
 0x426   :  { %v4716_v25 = vmul.f32 %v4715_v2, %v4713_v21  ;;  %v4859_v55 = vshrl.u32 %v10117_v15, %v4856_v19  ;;  %v4862_v26 = vshrl.u32 %v10113_v62, %v4856_v19  ;;  %v4865_v54 = vshrl.u32 %v10114_v53, %v4856_v19 }
 0x427   :  { %v9680_v46 = vsub.s32 %v5005_v10, %v5008_v13  ;;  %v4861_v29 = vshll.u32 %v10117_v15, %v4855_v24  ;;  %v4867_v17 = vshll.u32 %v10114_v53, %v4855_v24  ;;  %v4868_v34 = vshrl.u32 %v10115_v0, %v4856_v19 }
 0x428   :  { %v4717_v6 = vxor.u32 2147483648, %v4716_v25  ;;  %v4860_v23 = vor.u32 %v4859_v55, %v4858_v38  ;;  %v4866_v22 = vor.u32 %v4865_v54, %v4864_v63  ;;  %v9693_v31 = vshll.u32 %v4849_v12, 8  ;;  %v1661_v63 = vpop.f32.mrf.mxu0 }
 0x429   :  { %v5011_v45 = vsub.s32 0, %v9680_v46  ;;  %v4863_v40 = vor.u32 %v4862_v26, %v4861_v29  ;;  %v4869_v33 = vor.u32 %v4868_v34, %v4867_v17  ;;  %v4870_v47 = vshll.u32 %v10115_v0, %v4855_v24  ;;  %v10215_v17 = vld [vmem:[#allocation24_spill] sm:$0xff] }
 0x42a   :  { %v4718_v3 = vsel %vm4635_vm9, %v4717_v6, %v4716_v25  ;;  %v4871_v58 = vshrl.u32 %v10116_v14, %v4856_v19  ;;  %v5451_v51 = vadd.s32 4294967169, %v5157_v18  ;;  %vm4873_vm4 = vcmp.lt.s32.totalorder %v4854_v5, 1 }
 0x42b   :  { %v4721_v39 = vsel %vm9639_vm11, %v9428_v49, %v4718_v3  ;;  %v5444_v36 = vmin.u32 %v5011_v45, %v9680_v46  ;;  %vm4876_vm5 = vcmp.lt.s32.totalorder %v4854_v5, 4  ;;  %v4857_v10 = vshrl.u32 %v10121_v37, %v4856_v19 }
 0x42c   :  { %6195 = vcosq.f32 %v4721_v39  ;;  %v4872_v20 = vor.u32 %v4871_v58, %v4870_v47  ;;  %vm4874_vm6 = vcmp.lt.s32.totalorder %v4854_v5, 2  ;;  %v4878_v9 = vsel %vm4876_vm5, %v4866_v22, 2102212464 }
 0x42d   :  { %6197 = vsinq.f32 %v4721_v39  ;;  %v5013_v52 = vclz %v5444_v36  ;;  %vm4875_vm7 = vcmp.lt.s32.totalorder %v4854_v5, 3  ;;  %v4881_v56 = vsel %vm4873_vm4, %v4860_v23, %v4863_v40 }
 0x42e   :  { %v4882_v60 = vsel %vm4876_vm5, %v4869_v33, 920167782  ;;  %v4877_v4 = vsel %vm4873_vm4, %v4857_v10, %v4860_v23  ;;  %v4885_v50 = vsel %vm4873_vm4, %v4863_v40, %v4866_v22  ;;  %v4886_v41 = vsel %vm4876_vm5, %v4872_v20, 1326507024 }
 0x42f   :  { %v5445_v32 = vadd.s32 4294967294, %v5013_v52  ;;  %v4883_v42 = vsel %vm4875_vm7, %v4866_v22, %v4882_v60  ;;  %v4879_v57 = vsel %vm4875_vm7, %v4863_v40, %v4878_v9  ;;  %v4887_v16 = vsel %vm4875_vm7, %v4869_v33, %v4886_v41 }
 0x430   :  { %v4884_v61 = vsel %vm4874_vm6, %v4881_v56, %v4883_v42  ;;  %v4888_v24 = vsel %vm4874_vm6, %v4885_v50, %v4887_v16  ;;  %v5001_v2 = vadd.s32 %v9626_v11, %v9635_v59  ;;  %v5163_v48 = vadd.s32 1, %v5451_v51 }
 0x431   :  { %vm5446_vm8 = vcmp.lt.s32.totalorder %v5445_v32, 0  ;;  %v9705_v8 = vmul.u32.u64.low %v9693_v31, %v4884_v61  ;;  %v9706_v21 = vmul.u32.u64.high %v9693_v31, %v4884_v61, %v9705_v8  ;;  %v4727_v25 = vand.u32 3, %v4726_v30 }
 0x432   :  { %v5016_v43 = vsel %vm5446_vm8, 0, %v5445_v32  ;;  %v4880_v12 = vsel %vm4874_vm6, %v4877_v4, %v4879_v57  ;;  %v9713_v18 = vmul.u32.u64.low %v9693_v31, %v4888_v24  ;;  %v9714_v38 = vmul.u32.u64.high %v9693_v31, %v4888_v24, %v9713_v18 }
 0x433   :  { %v5017_v13 = vsub.s32 32, %v5016_v43  ;;  %v5021_v19 = vsub.s32 4294967266, %v5016_v43  ;;  %v5018_v55 = vshll.u32 %v9680_v46, %v5016_v43  ;;  %vm5164_vm9 = vcmp.gt.s32.totalorder %v5163_v48, 0 }
 0x434   :  { %vm4725_vm10 = vweird.f32 %v9428_v49  ;;  %vm4947_vm11 = vcmp.lt.s32.totalorder %v9488_v27, 0  ;;  %v4899_v11 = vadd.s32 1, %v9706_v21  ;;  %v5153_v59 = vand.u32 2147483647, %v9648_v7  ;;  %v10218_v49 = vld [vmem:[#allocation43_spill] sm:$0xff] }
 0x435   :  { %v5019_v6 = vshrl.u32 %v5001_v2, %v5017_v13  ;;  %v5022_v26 = vadd.s32 127, %v5021_v19  ;;  %v5165_v30 = vsel %vm5164_vm9, %v5163_v48, 0  ;;  %v5031_v45 = vsub.s32 4, %v9666_v44  ;;  %v1919_v48 = vpop.f32.mrf.mxu1 }
 0x436   :  { %v5167_v29 = vand.u32 31, %v5165_v30  ;;  %vm4728_vm12 = vcmp.lt.s32.totalorder %v4727_v25, 2  ;;  %v4896_v46 = vmul.u32 %v9693_v31, %v4880_v12  ;;  %vm4898_vm13 = vc.u32 %v9714_v38, %v9705_v8 }
 0x437   :  { %v5020_v5 = vor.u32 %v5019_v6, %v5018_v55  ;;  %v5023_v54 = vshll.u32 %v5022_v26, 23  ;;  %v1662_v34 = vadd.f32 %v1661_v63, %v10215_v17  ;;  %vm4729_vm14 = vcmp.eq.s32.totalorder %v4727_v25, 0 }
 0x438   :  { %vm9728_vm3 = vcmp.le.f32.partialorder %v4945_v35, 0.7853982  ;;  %v4900_v39 = vsel %vm4898_vm13, %v4899_v11, %v9706_v21  ;;  %v5168_v36 = vsub.s32 32, %v5167_v29  ;;  %vm4732_vm2 = vcmp.eq.s32.totalorder %v4727_v25, 2 }
 0x439   :  { %v6196_v3 = vpop.eup %6195  ;;  %v5024_v22 = vor.u32 4788187, %v5023_v54  ;;  %v4901_v33 = vadd.s32 %v4900_v39, %v4896_v46  ;;  %v5160_v47 = vand.u32 8388607, %v5153_v59  ;;  %v5027_v52 = vcvt.s32.f32 %v5020_v5 }
 0x43a   :  { %v6198_v40 = vpop.eup %6197  ;;  %v4733_v31 = vxor.u32 2147483648, %v6196_v3  ;;  %v5032_v35 = vsel %vm4947_vm11, %v5031_v45, %v9666_v44  ;;  %v9738_v9 = vshrl.u32 %v5165_v30, 5  ;;  %v5171_v32 = vshrl.u32 %v10117_v15, %v5168_v36 }
 0x43b   :  { %v4730_v58 = vxor.u32 2147483648, %v6198_v40  ;;  %v5025_v51 = vand.u32 2147483647, %v5024_v22  ;;  %v4902_v20 = vadd.s32 536870912, %v4901_v33  ;;  %v5170_v4 = vshll.u32 %v10121_v37, %v5167_v29 }
 0x43c   :  { %v4734_v10 = vsel %vm4732_vm2, %v4733_v31, %v6198_v40  ;;  %v5174_v42 = vshrl.u32 %v10113_v62, %v5168_v36  ;;  %v5173_v57 = vshll.u32 %v10117_v15, %v5167_v29  ;;  %v5177_v44 = vshrl.u32 %v10114_v53, %v5168_v36 }
 0x43d   :  { %v4731_v56 = vsel %vm4729_vm14, %v6196_v3, %v4730_v58  ;;  %v5028_v60 = vmul.f32 %v5027_v52, %v5025_v51  ;;  %v9745_v41 = vshrl.u32 %v4902_v20, 30  ;;  %v5179_v43 = vshll.u32 %v10114_v53, %v5167_v29 }
 0x43e   :  { %v4735_v50 = vsel %vm4728_vm12, %v4731_v56, %v4734_v10  ;;  %v5180_v24 = vshrl.u32 %v10115_v0, %v5168_v36  ;;  %v5172_v2 = vor.u32 %v5171_v32, %v5170_v4  ;;  %v5176_v13 = vshll.u32 %v10113_v62, %v5167_v29 }
 0x43f   :  { %v4736_v61 = vsel %vm4725_vm10, nan, %v4735_v50  ;;  %v5029_v16 = vxor.u32 2147483648, %v5028_v60  ;;  %v4904_v21 = vshll.u32 %v9745_v41, 30  ;;  %v5183_v19 = vshrl.u32 %v10116_v14, %v5168_v36 }
 0x440   :  { %5284 = vst.msk [vmem:[%s9909_s2 + $0xd0] sm:$0xff] %vm5257_vm15, %v4736_v61  ;;  %v5175_v12 = vor.u32 %v5174_v42, %v5173_v57  ;;  %v5181_v18 = vor.u32 %v5180_v24, %v5179_v43  ;;  %v5182_v55 = vshll.u32 %v10115_v0, %v5167_v29  ;;  %v5161_v63 = vor.u32 8388608, %v5160_v47 }
 0x441   :  { %5316 = vst.msk [vmem:[%s9909_s2 + $0xd0] sm:$0xff] %vm49_vm1, %v10218_v49  ;;  %v5030_v25 = vsel %vm4947_vm11, %v5029_v16, %v5028_v60  ;;  %v4905_v26 = vsub.s32 %v4901_v33, %v4904_v21  ;;  %v5178_v11 = vor.u32 %v5177_v44, %v5176_v13  ;;  %v5034_v30 = vsel %vm9728_vm3, 0, %v5032_v35 }
 0x442   :  { %v5033_v6 = vsel %vm9728_vm3, %v9488_v27, %v5030_v25  ;;  %v5184_v5 = vor.u32 %v5183_v19, %v5182_v55  ;;  %v9773_v54 = vadd.f32 %v1919_v48, %v1662_v34  ;;  %vm5185_vm0 = vcmp.lt.s32.totalorder %v9738_v9, 1 }
 0x443   :  { %6199 = vcosq.f32 %v5033_v6  ;;  %v4907_v45 = vsub.s32 0, %v4905_v26  ;;  %vm5188_vm4 = vcmp.lt.s32.totalorder %v9738_v9, 4  ;;  %v5169_v29 = vshrl.u32 %v10121_v37, %v5168_v36 }
 0x444   :  { %6201 = vsinq.f32 %v5033_v6  ;;  %vm5187_vm5 = vcmp.lt.s32.totalorder %v9738_v9, 3  ;;  %v5193_v46 = vsel %vm5185_vm0, %v5172_v2, %v5175_v12  ;;  %v5194_v17 = vsel %vm5188_vm4, %v5181_v18, 920167782 }
 0x445   :  { %v5440_v3 = vmin.u32 %v4907_v45, %v4905_v26  ;;  %vm5186_vm6 = vcmp.lt.s32.totalorder %v9738_v9, 2  ;;  %v5190_v23 = vsel %vm5188_vm4, %v5178_v11, 2102212464  ;;  %v5195_v34 = vsel %vm5187_vm5, %v5178_v11, %v5194_v17 }
 0x446   :  { %v5196_v22 = vsel %vm5186_vm6, %v5193_v46, %v5195_v34  ;;  %v5197_v39 = vsel %vm5185_vm0, %v5175_v12, %v5178_v11  ;;  %v5198_v40 = vsel %vm5188_vm4, %v5184_v5, 1326507024  ;;  %v5201_v31 = vshll.u32 %v5161_v63, 8 }
 0x447   :  { %v5038_v36 = vadd.s32 3, %v5034_v30  ;;  %v4909_v33 = vclz %v5440_v3  ;;  %v5189_v47 = vsel %vm5185_vm0, %v5169_v29, %v5172_v2  ;;  %v5191_v58 = vsel %vm5187_vm5, %v5175_v12, %v5190_v23 }
 0x448   :  { %v5199_v51 = vsel %vm5187_vm5, %v5181_v18, %v5198_v40  ;;  %v9788_v52 = vmul.u32.u64.low %v5201_v31, %v5196_v22  ;;  %v9789_v35 = vmul.u32.u64.high %v5201_v31, %v5196_v22, %v9788_v52  ;;  %v5052_v32 = vand.u32 2139095040, %v9773_v54 }
 0x449   :  { %v5441_v10 = vadd.s32 4294967294, %v4909_v33  ;;  %v5200_v20 = vsel %vm5186_vm6, %v5197_v39, %v5199_v51  ;;  %v5192_v4 = vsel %vm5186_vm6, %v5189_v47, %v5191_v58  ;;  %v5039_v50 = vand.u32 3, %v5038_v36 }
 0x44a   :  { %v9795_v56 = vmul.u32.u64.low %v5201_v31, %v5200_v20  ;;  %v9796_v60 = vmul.u32.u64.high %v5201_v31, %v5200_v20, %v9795_v56  ;;  %v5053_v42 = vshrl.u32 %v5052_v32, 23  ;;  %v5211_v44 = vadd.s32 1, %v9789_v35 }
 0x44b   :  { %vm5442_vm7 = vcmp.lt.s32.totalorder %v5441_v10, 0  ;;  %v4897_v61 = vadd.s32 %v9705_v8, %v9714_v38  ;;  %v5208_v2 = vmul.u32 %v5201_v31, %v5192_v4  ;;  %v5049_v13 = vand.u32 2147483647, %v9773_v54  ;;  %v10219_v31 = vld [vmem:[#allocation46_spill] sm:$0xff] }
 0x44c   :  { %v4912_v57 = vsel %vm5442_vm7, 0, %v5441_v10  ;;  %v5447_v24 = vadd.s32 4294967169, %v5053_v42  ;;  %vm5210_vm8 = vc.u32 %v9796_v60, %v9788_v52  ;;  %vm5040_vm9 = vcmp.lt.s32.totalorder %v5039_v50, 2 }
 0x44d   :  { %v4913_v16 = vsub.s32 32, %v4912_v57  ;;  %v4917_v43 = vsub.s32 4294967266, %v4912_v57  ;;  %v4914_v21 = vshll.u32 %v4905_v26, %v4912_v57  ;;  %v5212_v49 = vsel %vm5210_vm8, %v5211_v44, %v9789_v35 }
 0x44e   :  { %v5059_v25 = vadd.s32 1, %v5447_v24  ;;  %vm5044_vm10 = vcmp.eq.s32.totalorder %v5039_v50, 2  ;;  %v5213_v38 = vadd.s32 %v5212_v49, %v5208_v2  ;;  %vm5041_vm12 = vcmp.eq.s32.totalorder %v5039_v50, 0 }
 0x44f   :  { %v4915_v19 = vshrl.u32 %v4897_v61, %v4913_v16  ;;  %v4918_v48 = vadd.s32 127, %v4917_v43  ;;  %v4927_v45 = vsub.s32 4, %v9745_v41  ;;  %v5056_v29 = vand.u32 8388607, %v5049_v13 }
 0x450   :  { %v6200_v9 = vpop.eup %6199  ;;  %vm5060_vm11 = vcmp.gt.s32.totalorder %v5059_v25, 0  ;;  %v5214_v63 = vadd.s32 536870912, %v5213_v38  ;;  %vm5037_vm13 = vweird.f32 %v9488_v27  ;;  %vm4843_vm14 = vcmp.lt.s32.totalorder %v9603_v1, 0 }
 0x451   :  { %v6202_v12 = vpop.eup %6201  ;;  %v5045_v8 = vxor.u32 2147483648, %v6200_v9  ;;  %v4916_v55 = vor.u32 %v4915_v19, %v4914_v21  ;;  %v4919_v6 = vshll.u32 %v4918_v48, 23  ;;  %v5061_v11 = vsel %vm5060_vm11, %v5059_v25, 0 }
 0x452   :  { %v5042_v18 = vxor.u32 2147483648, %v6202_v12  ;;  %v9812_v17 = vshrl.u32 %v5214_v63, 30  ;;  %v5063_v3 = vand.u32 31, %v5061_v11  ;;  %vm9827_vm3 = vcmp.le.f32.partialorder %v4841_v28, 0.7853982 }
 0x453   :  { %v5046_v26 = vsel %vm5044_vm10, %v5045_v8, %v6202_v12  ;;  %v4920_v5 = vor.u32 4788187, %v4919_v6  ;;  %v4923_v22 = vcvt.s32.f32 %v4916_v55  ;;  %v4928_v33 = vsel %vm4843_vm14, %v4927_v45, %v9745_v41 }
 0x454   :  { %v5043_v30 = vsel %vm5041_vm12, %v6200_v9, %v5042_v18  ;;  %v5216_v39 = vshll.u32 %v9812_v17, 30  ;;  %v5064_v40 = vsub.s32 32, %v5063_v3  ;;  %v5057_v47 = vor.u32 8388608, %v5056_v29 }
 0x455   :  { %v5047_v46 = vsel %vm5040_vm9, %v5043_v30, %v5046_v26  ;;  %v4921_v34 = vand.u32 2147483647, %v4920_v5  ;;  %v5062_v51 = vshrl.u32 %v5061_v11, 5  ;;  %v5066_v35 = vshll.u32 %v10121_v37, %v5063_v3 }
 0x456   :  { %v5048_v23 = vsel %vm5037_vm13, nan, %v5047_v46  ;;  %v5217_v58 = vsub.s32 %v5213_v38, %v5216_v39  ;;  %v5067_v10 = vshrl.u32 %v10117_v15, %v5064_v40  ;;  %v5070_v32 = vshrl.u32 %v10113_v62, %v5064_v40 }
 0x457   :  { %5287 = vst.msk [vmem:[%s9909_s2 + $0xe8] sm:$0xff] %vm5257_vm15, %v5048_v23  ;;  %v4924_v36 = vmul.f32 %v4923_v22, %v4921_v34  ;;  %v5072_v28 = vshll.u32 %v10113_v62, %v5063_v3  ;;  %v5073_v56 = vshrl.u32 %v10114_v53, %v5064_v40  ;;  %v5069_v42 = vshll.u32 %v10117_v15, %v5063_v3 }
 0x458   :  { %5319 = vst.msk [vmem:[%s9909_s2 + $0xe8] sm:$0xff] %vm49_vm1, %v10219_v31  ;;  %v5219_v4 = vsub.s32 0, %v5217_v58  ;;  %v5075_v50 = vshll.u32 %v10114_v53, %v5063_v3  ;;  %v5076_v41 = vshrl.u32 %v10115_v0, %v5064_v40  ;;  %v4930_v44 = vsel %vm9827_vm3, 0, %v4928_v33 }
 0x459   :  { %v4925_v20 = vxor.u32 2147483648, %v4924_v36  ;;  %v5068_v61 = vor.u32 %v5067_v10, %v5066_v35  ;;  %v5074_v16 = vor.u32 %v5073_v56, %v5072_v28  ;;  %v5071_v24 = vor.u32 %v5070_v32, %v5069_v42 }
 0x45a   :  { %v5452_v43 = vmin.u32 %v5219_v4, %v5217_v58  ;;  %v5077_v21 = vor.u32 %v5076_v41, %v5075_v50  ;;  %v5078_v53 = vshll.u32 %v10115_v0, %v5063_v3  ;;  %v5079_v15 = vshrl.u32 %v10116_v14, %v5064_v40 }
 0x45b   :  { %v4926_v57 = vsel %vm4843_vm14, %v4925_v20, %v4924_v36  ;;  %v5097_v2 = vshll.u32 %v5057_v47, 8  ;;  %vm5081_vm2 = vcmp.lt.s32.totalorder %v5062_v51, 1  ;;  %vm5084_vm0 = vcmp.lt.s32.totalorder %v5062_v51, 4 }
 0x45c   :  { %v4929_v62 = vsel %vm9827_vm3, %v9603_v1, %v4926_v57  ;;  %v5221_v9 = vclz %v5452_v43  ;;  %v5065_v19 = vshrl.u32 %v10121_v37, %v5064_v40  ;;  %v5080_v48 = vor.u32 %v5079_v15, %v5078_v53  ;;  %v10222_v43 = vld [vmem:[#allocation45_spill] sm:$0xff] }
 0x45d   :  { %6203 = vcosq.f32 %v4929_v62  ;;  %vm5082_vm4 = vcmp.lt.s32.totalorder %v5062_v51, 2  ;;  %v5086_v49 = vsel %vm5084_vm0, %v5074_v16, 2102212464  ;;  %vm5083_vm5 = vcmp.lt.s32.totalorder %v5062_v51, 3 }
 0x45e   :  { %6205 = vsinq.f32 %v4929_v62  ;;  %v5453_v25 = vadd.s32 4294967294, %v5221_v9  ;;  %v5089_v12 = vsel %vm5081_vm2, %v5068_v61, %v5071_v24  ;;  %v5090_v8 = vsel %vm5084_vm0, %v5077_v21, 920167782 }
 0x45f   :  { %v5085_v38 = vsel %vm5081_vm2, %v5065_v19, %v5068_v61  ;;  %v5091_v18 = vsel %vm5083_vm5, %v5074_v16, %v5090_v8  ;;  %v5093_v55 = vsel %vm5081_vm2, %v5071_v24, %v5074_v16  ;;  %v5094_v0 = vsel %vm5084_vm0, %v5080_v48, 1326507024 }
 0x460   :  { %vm5454_vm6 = vcmp.lt.s32.totalorder %v5453_v25, 0  ;;  %v5087_v14 = vsel %vm5083_vm5, %v5071_v24, %v5086_v49  ;;  %v5092_v6 = vsel %vm5082_vm4, %v5089_v12, %v5091_v18  ;;  %v5095_v26 = vsel %vm5083_vm5, %v5077_v21, %v5094_v0 }
 0x461   :  { %v5224_v63 = vsel %vm5454_vm6, 0, %v5453_v25  ;;  %v5096_v11 = vsel %vm5082_vm4, %v5093_v55, %v5095_v26  ;;  %v9854_v37 = vmul.u32.u64.low %v5097_v2, %v5092_v6  ;;  %v9855_v30 = vmul.u32.u64.high %v5097_v2, %v5092_v6, %v9854_v37 }
 0x462   :  { %v4934_v5 = vadd.s32 3, %v4930_v44  ;;  %v5209_v45 = vadd.s32 %v9788_v52, %v9796_v60  ;;  %v5225_v29 = vsub.s32 32, %v5224_v63  ;;  %v5229_v46 = vsub.s32 4294967266, %v5224_v63 }
 0x463   :  { %v9859_v3 = vmul.u32.u64.low %v5097_v2, %v5096_v11  ;;  %v9860_v23 = vmul.u32.u64.high %v5097_v2, %v5096_v11, %v9859_v3  ;;  %v5226_v34 = vshll.u32 %v5217_v58, %v5224_v63  ;;  %v5088_v40 = vsel %vm5082_vm4, %v5085_v38, %v5087_v14 }
 0x464   :  { %v5227_v22 = vshrl.u32 %v5209_v45, %v5225_v29  ;;  %v5230_v39 = vadd.s32 127, %v5229_v46  ;;  %v5107_v31 = vadd.s32 1, %v9855_v30  ;;  %v4935_v27 = vand.u32 3, %v4934_v5 }
 0x465   :  { %v5104_v47 = vmul.u32 %v5097_v2, %v5088_v40  ;;  %vm5106_vm7 = vc.u32 %v9860_v23, %v9854_v37  ;;  %vm4933_vm11 = vweird.f32 %v9603_v1  ;;  %vm5155_vm12 = vcmp.lt.s32.totalorder %v9648_v7, 0 }
 0x466   :  { %v5228_v36 = vor.u32 %v5227_v22, %v5226_v34  ;;  %v5231_v33 = vshll.u32 %v5230_v39, 23  ;;  %v5108_v60 = vsel %vm5106_vm7, %v5107_v31, %v9855_v30  ;;  %vm4940_vm8 = vcmp.eq.s32.totalorder %v4935_v27, 2 }
 0x467   :  { %v5109_v32 = vadd.s32 %v5108_v60, %v5104_v47  ;;  %vm4937_vm9 = vcmp.eq.s32.totalorder %v4935_v27, 0  ;;  %vm4936_vm10 = vcmp.lt.s32.totalorder %v4935_v27, 2  ;;  %v5239_v16 = vsub.s32 4, %v9812_v17 }
 0x468   :  { %v5232_v52 = vor.u32 4788187, %v5231_v33  ;;  %v5235_v51 = vcvt.s32.f32 %v5228_v36  ;;  %vm5154_vm13 = vcmp.le.f32.partialorder %v5153_v59, 0.7853982  ;;  %v5105_v8 = vadd.s32 %v9854_v37, %v9860_v23  ;;  %v10223_v23 = vld [vmem:[#allocation48_spill] sm:$0xff] }
 0x469   :  { %v5110_v4 = vadd.s32 536870912, %v5109_v32  ;;  %v5240_v53 = vsel %vm5155_vm12, %v5239_v16, %v9812_v17  ;;  %vm5245_vm4 = vweird.f32 %v9648_v7  ;;  %vm5051_vm5 = vcmp.lt.s32.totalorder %v9773_v54, 0 }
 0x46a   :  { %v6204_v35 = vpop.eup %6203  ;;  %v5233_v28 = vand.u32 2147483647, %v5232_v52  ;;  %v5242_v9 = vsel %vm5154_vm13, 0, %v5240_v53  ;;  %vm5050_vm6 = vcmp.le.f32.partialorder %v5049_v13, 0.7853982 }
 0x46b   :  { %v6206_v10 = vpop.eup %6205  ;;  %v4941_v20 = vxor.u32 2147483648, %v6204_v35  ;;  %v5111_v57 = vshrl.u32 %v5110_v4, 30  ;;  %v5246_v48 = vadd.s32 3, %v5242_v9 }
 0x46c   :  { %v4938_v58 = vxor.u32 2147483648, %v6206_v10  ;;  %v5236_v50 = vmul.f32 %v5235_v51, %v5233_v28 }
 0x46d   :  { %v4942_v56 = vsel %vm4940_vm8, %v4941_v20, %v6206_v10  ;;  %v5112_v62 = vshll.u32 %v5111_v57, 30  ;;  %v5247_v12 = vand.u32 3, %v5246_v48 }
 0x46e   :  { %v4939_v42 = vsel %vm4937_vm9, %v6204_v35, %v4938_v58  ;;  %v5237_v61 = vxor.u32 2147483648, %v5236_v50  ;;  %v10224_v58 = vld [vmem:[#allocation47_spill] sm:$0xff] }
 0x46f   :  { %v4943_v41 = vsel %vm4936_vm10, %v4939_v42, %v4942_v56  ;;  %v5113_v21 = vsub.s32 %v5109_v32, %v5112_v62  ;;  %vm5252_vm3 = vcmp.eq.s32.totalorder %v5247_v12, 2  ;;  %vm5249_vm2 = vcmp.eq.s32.totalorder %v5247_v12, 0 }
 0x470   :  { %v4944_v44 = vsel %vm4933_vm11, nan, %v4943_v41  ;;  %v5238_v1 = vsel %vm5155_vm12, %v5237_v61, %v5236_v50  ;;  %vm5248_vm0 = vcmp.lt.s32.totalorder %v5247_v12, 2  ;;  %vm5141_vm10 = vweird.f32 %v9773_v54 }
 0x471   :  { %5286 = vst.msk [vmem:[%s9909_s2 + $0xe0] sm:$0xff] %vm5257_vm15, %v4944_v44  ;;  %v5241_v24 = vsel %vm5154_vm13, %v9648_v7, %v5238_v1  ;;  %v5115_v15 = vsub.s32 0, %v5113_v21  ;;  %v5135_v7 = vsub.s32 4, %v5111_v57 }
 0x472   :  { %5318 = vst.msk [vmem:[%s9909_s2 + $0xe0] sm:$0xff] %vm49_vm1, %v10222_v43  ;;  %6207 = vcosq.f32 %v5241_v24 }
 0x473   :  { %6209 = vsinq.f32 %v5241_v24  ;;  %v5448_v2 = vmin.u32 %v5115_v15, %v5113_v21  ;;  %v5136_v31 = vsel %vm5051_vm5, %v5135_v7, %v5111_v57 }
 0x474   :  { %v5138_v27 = vsel %vm5050_vm6, 0, %v5136_v31 }
 0x475   :  { %v5117_v19 = vclz %v5448_v2  ;;  %v5142_v36 = vadd.s32 3, %v5138_v27 }
 0x477   :  { %v5449_v49 = vadd.s32 4294967294, %v5117_v19  ;;  %v5143_v33 = vand.u32 3, %v5142_v36 }
 0x479   :  { %vm5450_vm14 = vcmp.lt.s32.totalorder %v5449_v49, 0  ;;  %vm5148_vm7 = vcmp.eq.s32.totalorder %v5143_v33, 2  ;;  %vm5145_vm8 = vcmp.eq.s32.totalorder %v5143_v33, 0  ;;  %vm5144_vm9 = vcmp.lt.s32.totalorder %v5143_v33, 2 }
 0x47a   :  { %v5120_v25 = vsel %vm5450_vm14, 0, %v5449_v49 }
 0x47b   :  { %v5121_v59 = vsub.s32 32, %v5120_v25  ;;  %v5125_v38 = vsub.s32 4294967266, %v5120_v25  ;;  %v5122_v55 = vshll.u32 %v5113_v21, %v5120_v25 }
 0x47d   :  { %v5123_v0 = vshrl.u32 %v5105_v8, %v5121_v59  ;;  %v5126_v14 = vadd.s32 127, %v5125_v38 }
 0x47f   :  { %v6208_v18 = vpop.eup %6207  ;;  %v5124_v63 = vor.u32 %v5123_v0, %v5122_v55  ;;  %v5127_v11 = vshll.u32 %v5126_v14, 23 }
 0x480   :  { %v6210_v6 = vpop.eup %6209  ;;  %v5253_v17 = vxor.u32 2147483648, %v6208_v18 }
 0x481   :  { %v5250_v26 = vxor.u32 2147483648, %v6210_v6  ;;  %v5128_v45 = vor.u32 4788187, %v5127_v11  ;;  %v5131_v3 = vcvt.s32.f32 %v5124_v63 }
 0x482   :  { %v5254_v30 = vsel %vm5252_vm3, %v5253_v17, %v6210_v6 }
 0x483   :  { %v5251_v5 = vsel %vm5249_vm2, %v6208_v18, %v5250_v26  ;;  %v5129_v46 = vand.u32 2147483647, %v5128_v45 }
 0x484   :  { %v5255_v37 = vsel %vm5248_vm0, %v5251_v5, %v5254_v30 }
 0x485   :  { %v5256_v29 = vsel %vm5245_vm4, nan, %v5255_v37  ;;  %v5132_v34 = vmul.f32 %v5131_v3, %v5129_v46 }
 0x486   :  { %5289 = vst.msk [vmem:[%s9909_s2 + $0xf8] sm:$0xff] %vm5257_vm15, %v5256_v29 }
 0x487   :  { %5321 = vst.msk [vmem:[%s9909_s2 + $0xf8] sm:$0xff] %vm49_vm1, %v10223_v23  ;;  %v5133_v22 = vxor.u32 2147483648, %v5132_v34 }
 0x489   :  { %v5134_v39 = vsel %vm5051_vm5, %v5133_v22, %v5132_v34 }
 0x48a   :  { %v5137_v40 = vsel %vm5050_vm6, %v9773_v54, %v5134_v39 }
 0x48b   :  { %6211 = vcosq.f32 %v5137_v40 }
 0x48c   :  { %6213 = vsinq.f32 %v5137_v40 }
 0x498   :  { %v6212_v47 = vpop.eup %6211 }
 0x499   :  { %v6214_v35 = vpop.eup %6213  ;;  %v5149_v52 = vxor.u32 2147483648, %v6212_v47 }
 0x49a   :  { %v5146_v60 = vxor.u32 2147483648, %v6214_v35 }
 0x49b   :  { %v5150_v10 = vsel %vm5148_vm7, %v5149_v52, %v6214_v35 }
 0x49c   :  { %v5147_v20 = vsel %vm5145_vm8, %v6212_v47, %v5146_v60 }
 0x49d   :  { %v5151_v13 = vsel %vm5144_vm9, %v5147_v20, %v5150_v10 }
 0x49e   :  { %v5152_v32 = vsel %vm5141_vm10, nan, %v5151_v13 }
 0x49f   :  { %5288 = vst.msk [vmem:[%s9909_s2 + $0xf0] sm:$0xff] %vm5257_vm15, %v5152_v32 }
 0x4a0   :  { %5320 = vst.msk [vmem:[%s9909_s2 + $0xf0] sm:$0xff] %vm49_vm1, %v10224_v58 }

</bundles_post_ra>
